<compile_context>
chip_gen: v5e
topology: v5e:2x2
jax: 0.10.0
libtpu: 0.0.40
codegen_flags: <defaults>
</compile_context>

<pallas_src>
import functools

import jax
import jax.numpy as jnp
import numpy as np
from jax import lax
from jax.experimental import pallas as pl
from jax.experimental.pallas import tpu as pltpu

# Model dims (hidden_dim default is 2048; small stand-in keeps the demo tiny).
HIDDEN = 256          # stand-in for hidden_dim=2048 (constructor arg)
CAT = 65              # cat_num
CAT_PAD = 128         # classifier output padded to a full lane width
FC1 = 1024
IMG = 224             # 8*8 conv -> 28, /2 -> 14, /2 -> 7, avg_pool2d(7) -> 1
P = 7 * 7             # surviving conv1 patches per sample
CIN = 3 * 8 * 8       # flattened 8x8x3 patch
CONV_OUT = 128
BN_EPS = 1e-5

# Tile caps; actual tiles are the largest multiples of 8 that divide n_pad.
BT_CAP = 32           # kernel-1 samples per grid step (conv matmul M = BT*49)
TILE_I_CAP = 128      # kernel-2 output-row (A) tile
TILE_J_CAP_BF16 = 32  # kernel-2 reduction (B) tile on bf16-VPU chips
TILE_J_CAP_F32 = 16   # halved when the pairing math runs in f32 (v5e)

CONV_DTYPE = jnp.bfloat16   # MXU-native on v5e/v6e/v7x; accumulation is f32.


def _pair_dtype():
    """bf16 pairing math on chips with a bf16 VPU (v6e/v7x), else f32."""
    try:
        kind = jax.devices()[0].device_kind.lower()
    except Exception:
        return jnp.float32
    if ("v6" in kind) or ("v7" in kind) or ("7x" in kind):
        return jnp.bfloat16
    return jnp.float32


def _round_up(x, m):
    return ((x + m - 1) // m) * m


def _pick_tile(n_pad, cap):
    """Largest multiple of 8 that divides n_pad and is <= cap."""
    best, t = 8, 8
    while t <= min(cap, n_pad):
        if n_pad % t == 0:
            best = t
        t += 8
    return best


# ---------------------------------------------------------------------------
# Kernel 1: patchify-conv / BN / ReLU chain + avg-pool + fc_c1 "B" epilogue.
#   x_ref    : (BT*P, CIN)  flattened bf16 patches for BT samples
#   pool_ref : (BT, BT*P)   block-diagonal 1/P pooling matrix (f32)
#   bfeat_ref: (BT, FC1)    B = feat @ Wb + bc1 (padded rows -> -1e30)
# ---------------------------------------------------------------------------
def _conv_feat_kernel(x_ref, pool_ref, w1_ref, b1_ref, w2_ref, b2_ref,
                      w3_ref, b3_ref, wb_ref, bc1_ref, bfeat_ref, *,
                      bt, n_actual, mask_rows):
    h = jnp.dot(x_ref[...], w1_ref[...], preferred_element_type=jnp.float32)
    h = jnp.maximum(h + b1_ref[...], 0.0).astype(w2_ref.dtype)      # (BT*P, 32)
    h = jnp.dot(h, w2_ref[...], preferred_element_type=jnp.float32)
    h = jnp.maximum(h + b2_ref[...], 0.0).astype(w3_ref.dtype)      # (BT*P, 64)
    h = jnp.dot(h, w3_ref[...], preferred_element_type=jnp.float32)
    h = jnp.maximum(h + b3_ref[...], 0.0)                           # (BT*P,128)
    # avg_pool2d(7) over the full 7x7 map == per-sample mean over P patches,
    # expressed as a tiny matmul to avoid non-8-aligned reshapes in VMEM.
    feat = jnp.dot(pool_ref[...], h, preferred_element_type=jnp.float32)
    # Hoisted i-invariant half of fc_c1 (computed ONCE per sample here instead
    # of once per i-tile inside kernel 2).
    b = (jnp.dot(feat.astype(wb_ref.dtype), wb_ref[...],
                 preferred_element_type=jnp.float32)
         + bc1_ref[...])                                            # (BT, FC1)
    if mask_rows:
        # Padded sample rows: push pre-activation to -1e30 so relu(A+B)==0 in
        # kernel 2.  Safe in f32/bf16; would overflow to -inf in fp16.
        row = (pl.program_id(0) * bt
               + lax.broadcasted_iota(jnp.int32, (bt, 1), 0))
        b = jnp.where(row < n_actual, b, -1e30)
    bfeat_ref[...] = b.astype(bfeat_ref.dtype)


# ---------------------------------------------------------------------------
# Kernel 2: pairing path.  grid = (n_pad/TI, n_pad/TJ), i parallel, j reduce.
#   a_ref: (TI, FC1) = z1 @ Wa tile (pair dtype)
#   b_ref: (TJ, FC1) = feat @ Wb + bc1 tile (pair dtype, padded rows -1e30)
# ---------------------------------------------------------------------------
def _fc_pair_kernel(a_ref, b_ref, wc2_ref, bc2_ref, out_ref, acc_scr, *,
                    tj, n_actual):
    j = pl.program_id(1)

    @pl.when(j == 0)
    def _():
        acc_scr[...] = jnp.zeros_like(acc_scr)

    a = a_ref[...]                                        # (TI, FC1)

    def body(jj, carry):
        # One (TI, FC1) add/relu tile per j row; no (TI, TJ, FC1) broadcast
        # temp is ever materialized (keeps the VALU loop spill-free).
        row = b_ref[pl.ds(jj, 1), :]                      # (1, FC1)
        acc_scr[...] += jnp.maximum(a + row, 0.0).astype(jnp.float32)
        return carry

    lax.fori_loop(0, tj, body, 0, unroll=True)

    @pl.when(j == pl.num_programs(1) - 1)
    def _():
        # fc_c2 once per i tile; output lane-padded to 128 wide.
        # NOTE: padded i rows carry garbage here -- caller slices [:n, :CAT].
        out_ref[...] = (jnp.dot(acc_scr[...].astype(wc2_ref.dtype),
                                wc2_ref[...],
                                preferred_element_type=jnp.float32)
                        + jnp.float32(n_actual) * bc2_ref[...])


def fdc3_forward(z1, z2, params):
    """FDC3.forward(z1, z2, test=True, random_detach=False), drop_xp=False."""
    (w1, b1, w2, b2, w3, b3, wa, wb, bc1, wc2, bc2) = params
    n = z2.shape[0]
    # The stride-gather shortcut below is valid ONLY because conv2/conv3 are
    # 1x1 convs and avg_pool2d(7) spans the whole 7x7 conv3 output.
    assert z2.shape[1:] == (3, IMG, IMG) and z1.shape == (n, HIDDEN)

    pair_dtype = _pair_dtype()
    n_pad = _round_up(n, 8)
    bt = _pick_tile(n_pad, BT_CAP)
    ti = _pick_tile(n_pad, TILE_I_CAP)
    tj = _pick_tile(n_pad, TILE_J_CAP_BF16 if pair_dtype == jnp.bfloat16
                    else TILE_J_CAP_F32)

    # Gather the 49 contributing 8x8 patches per sample, (c, kh, kw) order.
    # TODO(synk): this strided gather/transpose still runs as an XLA op; it
    # could be fused into kernel 1 with memory_space=pl.ANY + strided DMAs.
    xp = z2.astype(jnp.float32).reshape(n, 3, 28, 8, 28, 8)[:, :, ::4, :, ::4, :]
    xp = jnp.transpose(xp, (0, 2, 4, 1, 3, 5)).reshape(n, P, CIN)
    xp = xp.astype(CONV_DTYPE)                       # bf16 halves HBM traffic
    if n_pad != n:
        xp = jnp.pad(xp, ((0, n_pad - n), (0, 0), (0, 0)))
    xg = xp.reshape(n_pad * P, CIN)

    # Block-diagonal pooling matrix: pool[s, s*P + p] = 1/P.
    pool = jnp.repeat(jnp.eye(bt, dtype=jnp.float32), P, axis=1) / float(P)

    w1c, w2c, w3c = (w.astype(CONV_DTYPE) for w in (w1, w2, w3))
    wbc = wb.astype(CONV_DTYPE)

    kernel1 = functools.partial(_conv_feat_kernel, bt=bt, n_actual=n,
                                mask_rows=(n_pad != n))
    bfeat = pl.pallas_call(
        kernel1,
        out_shape=jax.ShapeDtypeStruct((n_pad, FC1), pair_dtype),
        grid=(n_pad // bt,),
        in_specs=[
            pl.BlockSpec((bt * P, CIN), lambda s: (s, 0)),
            pl.BlockSpec((bt, bt * P), lambda s: (0, 0)),
            pl.BlockSpec((CIN, 32), lambda s: (0, 0)),
            pl.BlockSpec((1, 32), lambda s: (0, 0)),
            pl.BlockSpec((32, 64), lambda s: (0, 0)),
            pl.BlockSpec((1, 64), lambda s: (0, 0)),
            pl.BlockSpec((64, CONV_OUT), lambda s: (0, 0)),
            pl.BlockSpec((1, CONV_OUT), lambda s: (0, 0)),
            pl.BlockSpec((CONV_OUT, FC1), lambda s: (0, 0)),
            pl.BlockSpec((1, FC1), lambda s: (0, 0)),
        ],
        out_specs=pl.BlockSpec((bt, FC1), lambda s: (s, 0)),
        compiler_params=pltpu.CompilerParams(
            dimension_semantics=("parallel",),
            vmem_limit_bytes=32 * 1024 * 1024),
    )(xg, pool, w1c, b1, w2c, b2, w3c, b3, wbc, bc1)

    # Hoisted j-invariant half of fc_c1: A = z1 @ Wa as one XLA matmul (at
    # hidden_dim=2048 this keeps an 8 MB double-buffered weight out of
    # kernel-2 VMEM) stored directly in the pairing dtype.
    a_full = jnp.dot(z1.astype(CONV_DTYPE), wa.astype(CONV_DTYPE),
                     preferred_element_type=jnp.float32).astype(pair_dtype)
    if n_pad != n:
        a_full = jnp.pad(a_full, ((0, n_pad - n), (0, 0)))

    wc2p = jnp.pad(wc2, ((0, 0), (0, CAT_PAD - CAT))).astype(jnp.bfloat16)
    bc2p = jnp.pad(bc2, ((0, 0), (0, CAT_PAD - CAT)))

    ni, nj = n_pad // ti, n_pad // tj
    kernel2 = functools.partial(_fc_pair_kernel, tj=tj, n_actual=n)
    outp = pl.pallas_call(
        kernel2,
        out_shape=jax.ShapeDtypeStruct((n_pad, CAT_PAD), jnp.float32),
        grid=(ni, nj),
        in_specs=[
            pl.BlockSpec((ti, FC1), lambda i, j: (i, 0)),
            pl.BlockSpec((tj, FC1), lambda i, j: (j, 0)),
            pl.BlockSpec((FC1, CAT_PAD), lambda i, j: (0, 0)),
            pl.BlockSpec((1, CAT_PAD), lambda i, j: (0, 0)),
        ],
        out_specs=pl.BlockSpec((ti, CAT_PAD), lambda i, j: (i, 0)),
        scratch_shapes=[pltpu.VMEM((ti, FC1), jnp.float32)],   # j-sum acc
        compiler_params=pltpu.CompilerParams(
            dimension_semantics=("parallel", "arbitrary"),
            vmem_limit_bytes=32 * 1024 * 1024),
    )(a_full, bfeat, wc2p, bc2p)

    return outp[:n, :CAT]


# ---------------------------------------------------------------------------
# Deterministic synthetic parameters.  BatchNorm (eval mode, running stats)
# is folded into the conv weights (scale) + a per-channel bias.
# TODO(synk): training-mode BN (batch statistics) not implemented.
# ---------------------------------------------------------------------------
def init_params(key):
    ks = jax.random.split(key, 12)

    def nrm(k, shape, scale):
        return (scale * jax.random.normal(k, shape)).astype(jnp.float32)

    # conv weights stored (Cin_flat, Cout) == torch weight.reshape(Cout,-1).T
    w1 = nrm(ks[0], (CIN, 32), 0.1)       # conv1: 8x8 s8 patchify
    w2 = nrm(ks[1], (32, 64), 0.1)        # conv2: 1x1 s2
    w3 = nrm(ks[2], (64, CONV_OUT), 0.1)  # conv3: 1x1 s2

    def bn_fold(k, w, c):
        k1, k2, k3, k4 = jax.random.split(k, 4)
        gamma = 1.0 + 0.1 * jax.random.normal(k1, (c,))
        beta = 0.1 * jax.random.normal(k2, (c,))
        rm = 0.1 * jax.random.normal(k3, (c,))
        rv = jax.random.uniform(k4, (c,), minval=0.5, maxval=1.5)
        scale = gamma / jnp.sqrt(rv + BN_EPS)
        bias = beta - rm * scale
        return ((w * scale[None, :]).astype(jnp.float32),
                bias.reshape(1, c).astype(jnp.float32))

    w1f, b1 = bn_fold(ks[3], w1, 32)
    w2f, b2 = bn_fold(ks[4], w2, 64)
    w3f, b3 = bn_fold(ks[5], w3, CONV_OUT)

    # fc_c1: Linear(hidden + 128, 1024), stored as transposed split weights.
    wa = nrm(ks[6], (HIDDEN, FC1), 0.05)
    wb = nrm(ks[7], (CONV_OUT, FC1), 0.05)
    bc1 = nrm(ks[8], (1, FC1), 0.05)
    # fc_c2: Linear(1024, cat_num)
    wc2 = nrm(ks[9], (FC1, CAT), 0.05)
    bc2 = nrm(ks[10], (1, CAT), 0.05)

    return (w1f, b1, w2f, b2, w3f, b3, wa, wb, bc1, wc2, bc2)


# Pure-JAX reference of the same forward (full spatial path, for sanity).
def reference(z1, z2, params):
    (w1, b1, w2, b2, w3, b3, wa, wb, bc1, wc2, bc2) = params
    hi = jax.lax.Precision.HIGHEST
    n = z2.shape[0]

    xp = z2.reshape(n, 3, 28, 8, 28, 8)
    xp = jnp.transpose(xp, (0, 2, 4, 1, 3, 5)).reshape(n, 28, 28, CIN)
    h1 = jax.nn.relu(jnp.einsum("nhwc,ck->nhwk", xp, w1, precision=hi)
                     + b1.reshape(1, 1, 1, -1))
    h2 = jax.nn.relu(jnp.einsum("nhwc,ck->nhwk", h1[:, ::2, ::2], w2,
                                precision=hi) + b2.reshape(1, 1, 1, -1))
    h3 = jax.nn.relu(jnp.einsum("nhwc,ck->nhwk", h2[:, ::2, ::2], w3,
                                precision=hi) + b3.reshape(1, 1, 1, -1))
    feat = jnp.mean(h3, axis=(1, 2))

    a = jnp.dot(z1, wa, precision=hi)
    b = jnp.dot(feat, wb, precision=hi)
    hh = jax.nn.relu(a[:, None, :] + b[None, :, :] + bc1[None, :, :])
    out = jnp.einsum("ijh,hc->ijc", hh, wc2, precision=hi) + bc2[None, :, :]
    return jnp.sum(out, axis=1)


if __name__ == "__main__":
    key = jax.random.PRNGKey(0)
    k_z1, k_z2, k_p = jax.random.split(key, 3)

    N = 12   # not a multiple of 8 -> exercises padding + in-kernel row masking
    z1 = jax.random.normal(k_z1, (N, HIDDEN), jnp.float32)
    z2 = jax.random.normal(k_z2, (N, 3, IMG, IMG), jnp.float32)
    params = init_params(k_p)

    out = jax.block_until_ready(fdc3_forward(z1, z2, params))
    assert out.shape == (N, CAT) and bool(jnp.all(jnp.isfinite(out)))

    ref = reference(z1, z2, params)
    # Loose-ish tolerance: conv/pairing inputs run in bf16 with f32
    # accumulation on bf16-VPU chips; tighter on f32-pairing chips.
    np.testing.assert_allclose(np.asarray(out), np.asarray(ref),
                               rtol=5e-2, atol=3e-1)
    print("KERNEL_OK")
</pallas_src>

<mosaic_0001>
module attributes {stable_mosaic.version = 11 : i64} {
  func.func @_conv_feat_kernel(%arg0: i32, %arg1: memref<784x192xbf16, #tpu.memory_space<vmem>>, %arg2: memref<16x784xf32, #tpu.memory_space<vmem>>, %arg3: memref<192x32xbf16, #tpu.memory_space<vmem>>, %arg4: memref<1x32xf32, #tpu.memory_space<vmem>>, %arg5: memref<32x64xbf16, #tpu.memory_space<vmem>>, %arg6: memref<1x64xf32, #tpu.memory_space<vmem>>, %arg7: memref<64x128xbf16, #tpu.memory_space<vmem>>, %arg8: memref<1x128xf32, #tpu.memory_space<vmem>>, %arg9: memref<128x1024xbf16, #tpu.memory_space<vmem>>, %arg10: memref<1x1024xf32, #tpu.memory_space<vmem>>, %arg11: memref<16x1024xf32, #tpu.memory_space<vmem>>) attributes {dimension_semantics = [#tpu.dimension_semantics<parallel>], iteration_bounds = array<i64: 1>, scalar_prefetch = 0 : i64, scratch_operands = 0 : i64, tpu.core_type = #tpu.core_type<tc>, window_params = [{transform_indices = @transform_0, window_bounds = array<i64: 784, 192>}, {pipeline_mode = #tpu.pipeline_mode<synchronous>, transform_indices = @transform_1, window_bounds = array<i64: 16, 784>}, {pipeline_mode = #tpu.pipeline_mode<synchronous>, transform_indices = @transform_2, window_bounds = array<i64: 192, 32>}, {pipeline_mode = #tpu.pipeline_mode<synchronous>, transform_indices = @transform_3, window_bounds = array<i64: 1, 32>}, {pipeline_mode = #tpu.pipeline_mode<synchronous>, transform_indices = @transform_4, window_bounds = array<i64: 32, 64>}, {pipeline_mode = #tpu.pipeline_mode<synchronous>, transform_indices = @transform_5, window_bounds = array<i64: 1, 64>}, {pipeline_mode = #tpu.pipeline_mode<synchronous>, transform_indices = @transform_6, window_bounds = array<i64: 64, 128>}, {pipeline_mode = #tpu.pipeline_mode<synchronous>, transform_indices = @transform_7, window_bounds = array<i64: 1, 128>}, {pipeline_mode = #tpu.pipeline_mode<synchronous>, transform_indices = @transform_8, window_bounds = array<i64: 128, 1024>}, {pipeline_mode = #tpu.pipeline_mode<synchronous>, transform_indices = @transform_9, window_bounds = array<i64: 1, 1024>}, {transform_indices = @transform_10, window_bounds = array<i64: 16, 1024>}]} {
    %c0 = arith.constant 0 : index
    %c0_0 = arith.constant 0 : index
    %0 = vector.load %arg1[%c0, %c0_0] : memref<784x192xbf16, #tpu.memory_space<vmem>>, vector<784x192xbf16>
    %c0_1 = arith.constant 0 : index
    %c0_2 = arith.constant 0 : index
    %1 = vector.load %arg3[%c0_1, %c0_2] : memref<192x32xbf16, #tpu.memory_space<vmem>>, vector<192x32xbf16>
    %cst = arith.constant dense<0.000000e+00> : vector<784x32xf32>
    %2 = tpu.matmul %0, %1, %cst {dimension_numbers = #tpu.dot_dimension_numbers<[1], [0], [0], [1], [0, 0, 1, 1], [], []>} : vector<784x192xbf16>, vector<192x32xbf16>, vector<784x32xf32> -> vector<784x32xf32>
    %c0_3 = arith.constant 0 : index
    %c0_4 = arith.constant 0 : index
    %3 = vector.load %arg4[%c0_3, %c0_4] : memref<1x32xf32, #tpu.memory_space<vmem>>, vector<1x32xf32>
    %4 = vector.broadcast %3 : vector<1x32xf32> to vector<784x32xf32>
    %5 = arith.addf %2, %4 : vector<784x32xf32>
    %cst_5 = arith.constant 0.000000e+00 : f32
    %6 = vector.broadcast %cst_5 : f32 to vector<784x32xf32>
    %7 = arith.maximumf %5, %6 : vector<784x32xf32>
    %8 = arith.truncf %7 : vector<784x32xf32> to vector<784x32xbf16>
    %c0_6 = arith.constant 0 : index
    %c0_7 = arith.constant 0 : index
    %9 = vector.load %arg5[%c0_6, %c0_7] : memref<32x64xbf16, #tpu.memory_space<vmem>>, vector<32x64xbf16>
    %cst_8 = arith.constant dense<0.000000e+00> : vector<784x64xf32>
    %10 = tpu.matmul %8, %9, %cst_8 {dimension_numbers = #tpu.dot_dimension_numbers<[1], [0], [0], [1], [0, 0, 1, 1], [], []>} : vector<784x32xbf16>, vector<32x64xbf16>, vector<784x64xf32> -> vector<784x64xf32>
    %c0_9 = arith.constant 0 : index
    %c0_10 = arith.constant 0 : index
    %11 = vector.load %arg6[%c0_9, %c0_10] : memref<1x64xf32, #tpu.memory_space<vmem>>, vector<1x64xf32>
    %12 = vector.broadcast %11 : vector<1x64xf32> to vector<784x64xf32>
    %13 = arith.addf %10, %12 : vector<784x64xf32>
    %cst_11 = arith.constant 0.000000e+00 : f32
    %14 = vector.broadcast %cst_11 : f32 to vector<784x64xf32>
    %15 = arith.maximumf %13, %14 : vector<784x64xf32>
    %16 = arith.truncf %15 : vector<784x64xf32> to vector<784x64xbf16>
    %c0_12 = arith.constant 0 : index
    %c0_13 = arith.constant 0 : index
    %17 = vector.load %arg7[%c0_12, %c0_13] : memref<64x128xbf16, #tpu.memory_space<vmem>>, vector<64x128xbf16>
    %cst_14 = arith.constant dense<0.000000e+00> : vector<784x128xf32>
    %18 = tpu.matmul %16, %17, %cst_14 {dimension_numbers = #tpu.dot_dimension_numbers<[1], [0], [0], [1], [0, 0, 1, 1], [], []>} : vector<784x64xbf16>, vector<64x128xbf16>, vector<784x128xf32> -> vector<784x128xf32>
    %c0_15 = arith.constant 0 : index
    %c0_16 = arith.constant 0 : index
    %19 = vector.load %arg8[%c0_15, %c0_16] : memref<1x128xf32, #tpu.memory_space<vmem>>, vector<1x128xf32>
    %20 = vector.broadcast %19 : vector<1x128xf32> to vector<784x128xf32>
    %21 = arith.addf %18, %20 : vector<784x128xf32>
    %cst_17 = arith.constant 0.000000e+00 : f32
    %22 = vector.broadcast %cst_17 : f32 to vector<784x128xf32>
    %23 = arith.maximumf %21, %22 : vector<784x128xf32>
    %c0_18 = arith.constant 0 : index
    %c0_19 = arith.constant 0 : index
    %24 = vector.load %arg2[%c0_18, %c0_19] : memref<16x784xf32, #tpu.memory_space<vmem>>, vector<16x784xf32>
    %cst_20 = arith.constant dense<0.000000e+00> : vector<16x128xf32>
    %25 = tpu.matmul %24, %23, %cst_20 {dimension_numbers = #tpu.dot_dimension_numbers<[1], [0], [0], [1], [0, 0, 1, 1], [], []>} : vector<16x784xf32>, vector<784x128xf32>, vector<16x128xf32> -> vector<16x128xf32>
    %26 = arith.truncf %25 : vector<16x128xf32> to vector<16x128xbf16>
    %c0_21 = arith.constant 0 : index
    %c0_22 = arith.constant 0 : index
    %27 = vector.load %arg9[%c0_21, %c0_22] : memref<128x1024xbf16, #tpu.memory_space<vmem>>, vector<128x1024xbf16>
    %cst_23 = arith.constant dense<0.000000e+00> : vector<16x1024xf32>
    %28 = tpu.matmul %26, %27, %cst_23 {dimension_numbers = #tpu.dot_dimension_numbers<[1], [0], [0], [1], [0, 0, 1, 1], [], []>} : vector<16x128xbf16>, vector<128x1024xbf16>, vector<16x1024xf32> -> vector<16x1024xf32>
    %c0_24 = arith.constant 0 : index
    %c0_25 = arith.constant 0 : index
    %29 = vector.load %arg10[%c0_24, %c0_25] : memref<1x1024xf32, #tpu.memory_space<vmem>>, vector<1x1024xf32>
    %30 = vector.broadcast %29 : vector<1x1024xf32> to vector<16x1024xf32>
    %31 = arith.addf %28, %30 : vector<16x1024xf32>
    %c16_i32 = arith.constant 16 : i32
    %32 = arith.muli %arg0, %c16_i32 : i32
    %33 = tpu.iota {dimensions = array<i32: 0>} : vector<16x1xi32>
    %34 = vector.broadcast %32 : i32 to vector<16x1xi32>
    %35 = arith.addi %34, %33 : vector<16x1xi32>
    %c12_i32 = arith.constant 12 : i32
    %36 = vector.broadcast %c12_i32 : i32 to vector<16x1xi32>
    %37 = arith.cmpi slt, %35, %36 : vector<16x1xi32>
    %cst_26 = arith.constant -1.000000e+30 : f32
    %38 = vector.shape_cast %37 : vector<16x1xi1> to vector<16x1xi1>
    %39 = vector.broadcast %38 : vector<16x1xi1> to vector<16x1024xi1>
    %40 = vector.broadcast %cst_26 : f32 to vector<16x1024xf32>
    %41 = arith.select %39, %31, %40 : vector<16x1024xi1>, vector<16x1024xf32>
    %c0_27 = arith.constant 0 : index
    %c0_28 = arith.constant 0 : index
    %42 = vector.load %arg11[%c0_27, %c0_28] : memref<16x1024xf32, #tpu.memory_space<vmem>>, vector<16x1024xf32>
    tpu.vector_store %arg11[%c0_27, %c0_28], %41 {strides = array<i32>} : memref<16x1024xf32, #tpu.memory_space<vmem>>, vector<16x1024xf32>,
    return
  }
  func.func @transform_0(%arg0: i32) -> (i32, i32) {
    %c0_i32 = arith.constant 0 : i32
    %c0_i32_0 = arith.constant 0 : i32
    return %arg0, %c0_i32 : i32, i32
  }
  func.func @transform_1(%arg0: i32) -> (i32, i32) {
    %c0_i32 = arith.constant 0 : i32
    %c0_i32_0 = arith.constant 0 : i32
    %c0_i32_1 = arith.constant 0 : i32
    return %c0_i32, %c0_i32_0 : i32, i32
  }
  func.func @transform_2(%arg0: i32) -> (i32, i32) {
    %c0_i32 = arith.constant 0 : i32
    %c0_i32_0 = arith.constant 0 : i32
    %c0_i32_1 = arith.constant 0 : i32
    return %c0_i32, %c0_i32_0 : i32, i32
  }
  func.func @transform_3(%arg0: i32) -> (i32, i32) {
    %c0_i32 = arith.constant 0 : i32
    %c0_i32_0 = arith.constant 0 : i32
    %c0_i32_1 = arith.constant 0 : i32
    return %c0_i32, %c0_i32_0 : i32, i32
  }
  func.func @transform_4(%arg0: i32) -> (i32, i32) {
    %c0_i32 = arith.constant 0 : i32
    %c0_i32_0 = arith.constant 0 : i32
    %c0_i32_1 = arith.constant 0 : i32
    return %c0_i32, %c0_i32_0 : i32, i32
  }
  func.func @transform_5(%arg0: i32) -> (i32, i32) {
    %c0_i32 = arith.constant 0 : i32
    %c0_i32_0 = arith.constant 0 : i32
    %c0_i32_1 = arith.constant 0 : i32
    return %c0_i32, %c0_i32_0 : i32, i32
  }
  func.func @transform_6(%arg0: i32) -> (i32, i32) {
    %c0_i32 = arith.constant 0 : i32
    %c0_i32_0 = arith.constant 0 : i32
    %c0_i32_1 = arith.constant 0 : i32
    return %c0_i32, %c0_i32_0 : i32, i32
  }
  func.func @transform_7(%arg0: i32) -> (i32, i32) {
    %c0_i32 = arith.constant 0 : i32
    %c0_i32_0 = arith.constant 0 : i32
    %c0_i32_1 = arith.constant 0 : i32
    return %c0_i32, %c0_i32_0 : i32, i32
  }
  func.func @transform_8(%arg0: i32) -> (i32, i32) {
    %c0_i32 = arith.constant 0 : i32
    %c0_i32_0 = arith.constant 0 : i32
    %c0_i32_1 = arith.constant 0 : i32
    return %c0_i32, %c0_i32_0 : i32, i32
  }
  func.func @transform_9(%arg0: i32) -> (i32, i32) {
    %c0_i32 = arith.constant 0 : i32
    %c0_i32_0 = arith.constant 0 : i32
    %c0_i32_1 = arith.constant 0 : i32
    return %c0_i32, %c0_i32_0 : i32, i32
  }
  func.func @transform_10(%arg0: i32) -> (i32, i32) {
    %c0_i32 = arith.constant 0 : i32
    %c0_i32_0 = arith.constant 0 : i32
    return %arg0, %c0_i32 : i32, i32
  }
}

</mosaic_0001>

<bundles_post_ra>
// kernel: tpu_custom_call.1
= control target key start
LH: loop header
LB: loop body
LE: loop exit
PB: predicated region body
PF: predicated region fallthrough
CT: control target
= control target key end

     0   :  { %s6260_s0 = inlined_call_operand.vmem [shape: bf16[784,192], index: 0, kind: input, shape index: {}]   ;;  %s6261_s1 = inlined_call_operand.vmem [shape: f32[16,784], index: 1, kind: input, shape index: {}]   ;;  %s6262_s2 = inlined_call_operand.vmem [shape: bf16[192,32], index: 2, kind: input, shape index: {}]   ;;  %s6263_s3 = inlined_call_operand.vmem [shape: f32[1,32], index: 3, kind: input, shape index: {}]   ;;  %s6264_s4 = inlined_call_operand.vmem [shape: bf16[32,64], index: 4, kind: input, shape index: {}]   ;;  %s6265_s5 = inlined_call_operand.vmem [shape: f32[1,64], index: 5, kind: input, shape index: {}]   ;;  %s6266_s6 = inlined_call_operand.vmem [shape: bf16[64,128], index: 6, kind: input, shape index: {}]   ;;  %s6267_s7 = inlined_call_operand.vmem [shape: f32[1,128], index: 7, kind: input, shape index: {}]   ;;  %s6268_s8 = inlined_call_operand.vmem [shape: bf16[128,1024], index: 8, kind: input, shape index: {}]   ;;  %s6269_s9 = inlined_call_operand.vmem [shape: f32[1,1024], index: 9, kind: input, shape index: {}]   ;;  %s6270_s10 = inlined_call_operand.hbm [shape: f32[16,1024], index: 10, kind: output, shape index: {}]  }
   0x1   :  { %v4317_v0 = vld [vmem:[%s6262_s2 + $0x38] sm:$0xff]  ;;  %v4316_v2 = vld [vmem:[%s6262_s2 + $0x30] sm:$0xff]  ;;  %v4315_v4 = vld [vmem:[%s6262_s2 + $0x28] sm:$0xff] }
   0x2   :  { %v4321_v1 = vld [vmem:[%s6262_s2 + $0x58] sm:$0xff]  ;;  %824 = vmatpush.bf16.msra.mxu0 %v4317_v0  ;;  %v4320_v3 = vld [vmem:[%s6262_s2 + $0x50] sm:$0xff]  ;;  %v4319_v5 = vld [vmem:[%s6262_s2 + $0x48] sm:$0xff] }
   0x3   :  { %1082 = vmatpush.bf16.msra.mxu1 %v4321_v1 }
   0x6   :  { %825 = vmatpush.bf16.msra.mxu0 %v4316_v2 }
   0x7   :  { %1083 = vmatpush.bf16.msra.mxu1 %v4320_v3 }
   0x8   :  { %15 = vsyncpa [#allocation3], 0  ;;  %v4314_v6 = vld [vmem:[%s6262_s2 + $0x20] sm:$0xff]  ;;  %v3347_v9 = vld [vmem:[%s6260_s0 + $0x8] sm:$0xf0]  ;;  %vm676_vm0 = vcmask 523264  }
   0x9   :  { %v4318_v7 = vld [vmem:[%s6262_s2 + $0x40] sm:$0xff]  ;;  %v4313_v10 = vld [vmem:[%s6262_s2 + $0x18] sm:$0xff]  ;;  %v4312_v12 = vld [vmem:[%s6262_s2 + $0x10] sm:$0xff]  ;;  %vm1499_vm1 = vcmask 261120   ;;  %vm2597_vm2 = vcmask 130048   ;;  %s4431_s19 = smov 1024  }
   0xa   :  { %826 = vmatpush.bf16.msra.mxu0 %v4315_v4  ;;  %v4212_v8 = vld [vmem:[%s6260_s0 + $0x4] sm:$0xf]  ;;  %v4311_v13 = vld [vmem:[%s6262_s2 + $0x8] sm:$0xff]  ;;  %v3345_v15 = vld [vmem:[%s6260_s0] sm:$0xf] }
   0xb   :  { %1084 = vmatpush.bf16.msra.mxu1 %v4319_v5  ;;  %v3350_v11 = vor.u32 %v4212_v8, %v3347_v9  ;;  %v4310_v14 = vld [vmem:[%s6262_s2] sm:$0xff]  ;;  %v4213_v16 = vld [vmem:[%s6260_s0 + $0x4] sm:$0xf0]  ;;  %v4214_v17 = vld [vmem:[%s6260_s0 + $0x14] sm:$0xf] }
   0xc   :  { %v3355_v18 = vld [vmem:[%s6260_s0 + $0x18] sm:$0xf0]  ;;  %v3346_v19 = vor.u32 %v4213_v16, %v3345_v15  ;;  %v3353_v21 = vld [vmem:[%s6260_s0 + $0x10] sm:$0xf]  ;;  %v4215_v22 = vld [vmem:[%s6260_s0 + $0x14] sm:$0xf0] }
   0xd   :  { %v3358_v20 = vor.u32 %v4214_v17, %v3355_v18  ;;  %v4216_v23 = vld [vmem:[%s6260_s0 + $0x24] sm:$0xf]  ;;  %v3363_v24 = vld [vmem:[%s6260_s0 + $0x28] sm:$0xf0]  ;;  %v3354_v25 = vor.u32 %v4215_v22, %v3353_v21  ;;  %v3361_v27 = vld [vmem:[%s6260_s0 + $0x20] sm:$0xf] }
   0xe   :  { %827 = vmatpush.bf16.msra.mxu0 %v4314_v6  ;;  %v3366_v26 = vor.u32 %v4216_v23, %v3363_v24  ;;  %v4217_v28 = vld [vmem:[%s6260_s0 + $0x24] sm:$0xf0]  ;;  %v4218_v29 = vld [vmem:[%s6260_s0 + $0x34] sm:$0xf]  ;;  %v3371_v30 = vld [vmem:[%s6260_s0 + $0x38] sm:$0xf0] }
   0xf   :  { %1085 = vmatpush.bf16.msra.mxu1 %v4318_v7  ;;  %v3362_v31 = vor.u32 %v4217_v28, %v3361_v27  ;;  %v3374_v32 = vor.u32 %v4218_v29, %v3371_v30  ;;  %v3369_v33 = vld [vmem:[%s6260_s0 + $0x30] sm:$0xf]  ;;  %v4219_v34 = vld [vmem:[%s6260_s0 + $0x34] sm:$0xf0]  ;;  %v4220_v35 = vld [vmem:[%s6260_s0 + $0x44] sm:$0xf] }
  0x10   :  { %v3379_v36 = vld [vmem:[%s6260_s0 + $0x48] sm:$0xf0]  ;;  %v3370_v37 = vor.u32 %v4219_v34, %v3369_v33  ;;  %v3377_v39 = vld [vmem:[%s6260_s0 + $0x40] sm:$0xf]  ;;  %v4221_v40 = vld [vmem:[%s6260_s0 + $0x44] sm:$0xf0] }
  0x11   :  { %v3382_v38 = vor.u32 %v4220_v35, %v3379_v36  ;;  %v4222_v41 = vld [vmem:[%s6260_s0 + $0x54] sm:$0xf]  ;;  %v3387_v42 = vld [vmem:[%s6260_s0 + $0x58] sm:$0xf0]  ;;  %v3378_v43 = vor.u32 %v4221_v40, %v3377_v39  ;;  %v3385_v45 = vld [vmem:[%s6260_s0 + $0x50] sm:$0xf] }
  0x12   :  { %828 = vmatpush.bf16.msra.mxu0 %v4313_v10  ;;  %3783 = vmatmul.msk.bf16.vlgmr.msra.gmra.mxu1 %vm676_vm0, %v3350_v11  ;;  %v3390_v44 = vor.u32 %v4222_v41, %v3387_v42  ;;  %v4223_v46 = vld [vmem:[%s6260_s0 + $0x54] sm:$0xf0]  ;;  %v4224_v47 = vld [vmem:[%s6260_s0 + $0x64] sm:$0xf]  ;;  %v3395_v48 = vld [vmem:[%s6260_s0 + $0x68] sm:$0xf0] }
  0x13   :  { %v3386_v49 = vor.u32 %v4223_v46, %v3385_v45  ;;  %v3398_v50 = vor.u32 %v4224_v47, %v3395_v48  ;;  %v3393_v51 = vld [vmem:[%s6260_s0 + $0x60] sm:$0xf]  ;;  %v4225_v52 = vld [vmem:[%s6260_s0 + $0x64] sm:$0xf0]  ;;  %v4226_v53 = vld [vmem:[%s6260_s0 + $0x74] sm:$0xf] }
  0x14   :  { %v3403_v54 = vld [vmem:[%s6260_s0 + $0x78] sm:$0xf0]  ;;  %v3394_v55 = vor.u32 %v4225_v52, %v3393_v51  ;;  %v4323_v57 = vld [vmem:[%s6264_s4 + $0x8] sm:$0xff]  ;;  %v3401_v58 = vld [vmem:[%s6260_s0 + $0x70] sm:$0xf] }
  0x15   :  { %v3406_v56 = vor.u32 %v4226_v53, %v3403_v54  ;;  %1653 = vmatpush.bf16.msra.mxu2 %v4323_v57  ;;  %v4227_v59 = vld [vmem:[%s6260_s0 + $0x74] sm:$0xf0]  ;;  %v4322_v60 = vld [vmem:[%s6264_s4] sm:$0xff]  ;;  %v3411_v62 = vld [vmem:[%s6260_s0 + $0x88] sm:$0xf0] }
  0x16   :  { %829 = vmatpush.bf16.msra.mxu0 %v4312_v12  ;;  %v4228_v61 = vld [vmem:[%s6260_s0 + $0x84] sm:$0xf]  ;;  %v3402_v63 = vor.u32 %v4227_v59, %v3401_v58  ;;  %v3409_v3 = vld [vmem:[%s6260_s0 + $0x80] sm:$0xf]  ;;  %v4229_v4 = vld [vmem:[%s6260_s0 + $0x84] sm:$0xf0] }
  0x17   :  { %v3414_v0 = vor.u32 %v4228_v61, %v3411_v62  ;;  %v4230_v5 = vld [vmem:[%s6260_s0 + $0x94] sm:$0xf]  ;;  %v3419_v6 = vld [vmem:[%s6260_s0 + $0x98] sm:$0xf0]  ;;  %v3410_v7 = vor.u32 %v4229_v4, %v3409_v3  ;;  %v4656_v10 = vld [vmem:[%s6263_s3] ss:$0 sm:$0xff] }
  0x18   :  { %v3422_v9 = vor.u32 %v4230_v5, %v3419_v6  ;;  %v3417_v18 = vld [vmem:[%s6260_s0 + $0x90] sm:$0xf]  ;;  %v4232_v22 = vld [vmem:[%s6260_s0 + $0xa4] sm:$0xf]  ;;  %v3427_v23 = vld [vmem:[%s6260_s0 + $0xa8] sm:$0xf0] }
  0x19   :  { %1654 = vmatpush.bf16.msra.mxu2 %v4322_v60  ;;  %v3430_v27 = vor.u32 %v4232_v22, %v3427_v23  ;;  %v3425_v35 = vld [vmem:[%s6260_s0 + $0xa0] sm:$0xf]  ;;  %v4233_v36 = vld [vmem:[%s6260_s0 + $0xa4] sm:$0xf0]  ;;  %v4234_v39 = vld [vmem:[%s6260_s0 + $0xb4] sm:$0xf] }
  0x1a   :  { %830 = vmatpush.bf16.msra.mxu0 %v4311_v13  ;;  %v3435_v40 = vld [vmem:[%s6260_s0 + $0xb8] sm:$0xf0]  ;;  %v3426_v42 = vor.u32 %v4233_v36, %v3425_v35  ;;  %v3433_v52 = vld [vmem:[%s6260_s0 + $0xb0] sm:$0xf]  ;;  %v4235_v53 = vld [vmem:[%s6260_s0 + $0xb4] sm:$0xf0] }
  0x1b   :  { %v3443_v57 = vld [vmem:[%s6260_s0 + $0xc8] sm:$0xf0]  ;;  %v3434_v59 = vor.u32 %v4235_v53, %v3433_v52  ;;  %v3441_v5 = vld [vmem:[%s6260_s0 + $0xc0] sm:$0xf]  ;;  %v4237_v6 = vld [vmem:[%s6260_s0 + $0xc4] sm:$0xf0] }
  0x1c   :  { %v3449_v23 = vld [vmem:[%s6260_s0 + $0xd0] sm:$0xf] }
  0x1e   :  { %831 = vmatpush.bf16.msra.mxu0 %v4310_v14 }
  0x21   :  { %832 = vmatmul.bf16.vlgmr.msra.gmra.mxu0 %v3346_v19  ;;  %v4231_v19 = vld [vmem:[%s6260_s0 + $0x94] sm:$0xf0] }
  0x22   :  { %3784 = vmatmul.msk.bf16.gmra.mxu1 %vm676_vm0, %v3358_v20 }
  0x31   :  { %837 = vmatmul.bf16.gmra.mxu0 %v3354_v25  ;;  %v3418_v25 = vor.u32 %v4231_v19, %v3417_v18 }
  0x32   :  { %3785 = vmatmul.msk.bf16.gmra.mxu1 %vm676_vm0, %v3366_v26 }
  0x41   :  { %842 = vmatmul.bf16.gmra.mxu0 %v3362_v31 }
  0x42   :  { %3786 = vmatmul.msk.bf16.gmra.mxu1 %vm676_vm0, %v3374_v32 }
  0x51   :  { %847 = vmatmul.bf16.gmra.mxu0 %v3370_v37 }
  0x52   :  { %3787 = vmatmul.msk.bf16.gmra.mxu1 %vm676_vm0, %v3382_v38 }
  0x61   :  { %852 = vmatmul.bf16.gmra.mxu0 %v3378_v43 }
  0x62   :  { %3788 = vmatmul.msk.bf16.gmra.mxu1 %vm676_vm0, %v3390_v44  ;;  %v3438_v44 = vor.u32 %v4234_v39, %v3435_v40  ;;  %v3457_v40 = vld [vmem:[%s6260_s0 + $0xe0] sm:$0xf] }
  0x71   :  { %857 = vmatmul.bf16.gmra.mxu0 %v3386_v49 }
  0x72   :  { %3789 = vmatmul.msk.bf16.gmra.mxu1 %vm676_vm0, %v3398_v50 }
  0x81   :  { %862 = vmatmul.bf16.gmra.mxu0 %v3394_v55 }
  0x82   :  { %3790 = vmatmul.msk.bf16.gmra.mxu1 %vm676_vm0, %v3406_v56  ;;  %v4236_v56 = vld [vmem:[%s6260_s0 + $0xc4] sm:$0xf] }
  0x83   :  { %v3446_v61 = vor.u32 %v4236_v56, %v3443_v57  ;;  %v3465_v57 = vld [vmem:[%s6260_s0 + $0xf0] sm:$0xf] }
  0x8f   :  { %v1087_v1 = vpop.f32.mrf.mxu1 }
  0x91   :  { %867 = vmatmul.bf16.gmra.mxu0 %v3402_v63 }
  0x92   :  { %3791 = vmatmul.msk.bf16.gmra.mxu1 %vm676_vm0, %v3414_v0 }
  0x97   :  { %v1089_v2 = vpop.f32.mrf.mxu1 }
  0x9e   :  { %v833_v8 = vpop.f32.mrf.mxu0 }
  0x9f   :  { %v1092_v11 = vpop.f32.mrf.mxu1  ;;  %v834_v12 = vadd.f32 %v4656_v10, %v833_v8 }
  0xa1   :  { %872 = vmatmul.bf16.gmra.mxu0 %v3410_v7  ;;  %v1088_v14 = vadd.f32 %v1087_v1, %v834_v12 }
  0xa2   :  { %3792 = vmatmul.msk.bf16.gmra.mxu1 %vm676_vm0, %v3422_v9  ;;  %v4238_v9 = vld [vmem:[%s6260_s0 + $0xd4] sm:$0xf] }
  0xa3   :  { %v1332_v20 = vmax.f32 %v1088_v14, 0.0 }
  0xa6   :  { %v835_v13 = vpop.f32.mrf.mxu0 }
  0xa7   :  { %v836_v15 = vadd.f32 %v4656_v10, %v835_v13  ;;  %v1094_v16 = vpop.f32.mrf.mxu1  ;;  %v3442_v13 = vor.u32 %v4237_v6, %v3441_v5  ;;  %v4326_v6 = vld [vmem:[%s6266_s6 + $0x10] sm:$0xff] }
  0xa9   :  { %v1090_v17 = vadd.f32 %v1089_v2, %v836_v15 }
  0xab   :  { %v1333_v21 = vmax.f32 %v1090_v17, 0.0 }
  0xad   :  { %v1430_v24 = vpack.c.bf16 %v1333_v21, %v1332_v20 }
  0xae   :  { %v838_v26 = vpop.f32.mrf.mxu0 }
  0xaf   :  { %3840 = vmatmul.msk.bf16.vlgmr.msra.gmra.mxu2 %vm1499_vm1, %v1430_v24  ;;  %v1097_v28 = vpop.f32.mrf.mxu1  ;;  %v839_v29 = vadd.f32 %v4656_v10, %v838_v26  ;;  %v4239_v24 = vld [vmem:[%s6260_s0 + $0xd4] sm:$0xf0] }
  0xb1   :  { %877 = vmatmul.bf16.gmra.mxu0 %v3418_v25  ;;  %v1093_v31 = vadd.f32 %v1092_v11, %v839_v29  ;;  %v3451_v11 = vld [vmem:[%s6260_s0 + $0xd8] sm:$0xf0] }
  0xb2   :  { %3793 = vmatmul.msk.bf16.gmra.mxu1 %vm676_vm0, %v3430_v27  ;;  %v3454_v15 = vor.u32 %v4238_v9, %v3451_v11  ;;  %v4240_v27 = vld [vmem:[%s6260_s0 + $0xe4] sm:$0xf] }
  0xb3   :  { %v1334_v37 = vmax.f32 %v1093_v31, 0.0 }
  0xb6   :  { %v840_v30 = vpop.f32.mrf.mxu0 }
  0xb7   :  { %v841_v32 = vadd.f32 %v4656_v10, %v840_v30  ;;  %v1099_v33 = vpop.f32.mrf.mxu1  ;;  %v3450_v30 = vor.u32 %v4239_v24, %v3449_v23 }
  0xb9   :  { %v1095_v34 = vadd.f32 %v1094_v16, %v841_v32 }
  0xbb   :  { %v1335_v38 = vmax.f32 %v1095_v34, 0.0 }
  0xbd   :  { %v1431_v41 = vpack.c.bf16 %v1335_v38, %v1334_v37 }
  0xbe   :  { %v843_v43 = vpop.f32.mrf.mxu0 }
  0xbf   :  { %3841 = vmatmul.msk.bf16.gmra.mxu2 %vm1499_vm1, %v1431_v41  ;;  %v1102_v45 = vpop.f32.mrf.mxu1  ;;  %v844_v46 = vadd.f32 %v4656_v10, %v843_v43  ;;  %v4241_v41 = vld [vmem:[%s6260_s0 + $0xe4] sm:$0xf0] }
  0xc1   :  { %882 = vmatmul.bf16.gmra.mxu0 %v3426_v42  ;;  %v1098_v48 = vadd.f32 %v1097_v28, %v844_v46  ;;  %v3459_v28 = vld [vmem:[%s6260_s0 + $0xe8] sm:$0xf0] }
  0xc2   :  { %3794 = vmatmul.msk.bf16.gmra.mxu1 %vm676_vm0, %v3438_v44  ;;  %v3462_v32 = vor.u32 %v4240_v27, %v3459_v28  ;;  %v4242_v44 = vld [vmem:[%s6260_s0 + $0xf4] sm:$0xf] }
  0xc3   :  { %v1336_v54 = vmax.f32 %v1098_v48, 0.0 }
  0xc6   :  { %v845_v47 = vpop.f32.mrf.mxu0 }
  0xc7   :  { %v846_v49 = vadd.f32 %v4656_v10, %v845_v47  ;;  %v1104_v50 = vpop.f32.mrf.mxu1  ;;  %v3458_v47 = vor.u32 %v4241_v41, %v3457_v40 }
  0xc9   :  { %v1100_v51 = vadd.f32 %v1099_v33, %v846_v49 }
  0xcb   :  { %v1337_v55 = vmax.f32 %v1100_v51, 0.0 }
  0xcd   :  { %v1432_v58 = vpack.c.bf16 %v1337_v55, %v1336_v54 }
  0xce   :  { %v848_v60 = vpop.f32.mrf.mxu0 }
  0xcf   :  { %3842 = vmatmul.msk.bf16.gmra.mxu2 %vm1499_vm1, %v1432_v58  ;;  %v1107_v62 = vpop.f32.mrf.mxu1  ;;  %v849_v63 = vadd.f32 %v4656_v10, %v848_v60  ;;  %v4243_v58 = vld [vmem:[%s6260_s0 + $0xf4] sm:$0xf0] }
  0xd1   :  { %887 = vmatmul.bf16.gmra.mxu0 %v3434_v59  ;;  %v1103_v1 = vadd.f32 %v1102_v45, %v849_v63  ;;  %v3467_v45 = vld [vmem:[%s6260_s0 + $0xf8] sm:$0xf0] }
  0xd2   :  { %3795 = vmatmul.msk.bf16.gmra.mxu1 %vm676_vm0, %v3446_v61  ;;  %v3470_v49 = vor.u32 %v4242_v44, %v3467_v45  ;;  %v4244_v61 = vld [vmem:[%s6260_s0 + $0x104] sm:$0xf]  ;;  %v4819_v45 = vld [vmem:[%s6265_s5] ss:$0 sm:$0xff] }
  0xd3   :  { %v1338_v7 = vmax.f32 %v1103_v1, 0.0 }
  0xd6   :  { %v850_v0 = vpop.f32.mrf.mxu0 }
  0xd7   :  { %v851_v2 = vadd.f32 %v4656_v10, %v850_v0  ;;  %v1109_v3 = vpop.f32.mrf.mxu1  ;;  %v3466_v0 = vor.u32 %v4243_v58, %v3465_v57  ;;  %v4250_v58 = vld [vmem:[%s6260_s0 + $0x134] sm:$0xf] }
  0xd9   :  { %v1105_v4 = vadd.f32 %v1104_v50, %v851_v2 }
  0xdb   :  { %v1339_v8 = vmax.f32 %v1105_v4, 0.0  ;;  %v4327_v4 = vld [vmem:[%s6266_s6 + $0x18] sm:$0xff] }
  0xdc   :  { %2235 = vmatpush.bf16.msra.mxu3 %v4327_v4 }
  0xdd   :  { %v1433_v12 = vpack.c.bf16 %v1339_v8, %v1338_v7 }
  0xde   :  { %v853_v14 = vpop.f32.mrf.mxu0 }
  0xdf   :  { %3843 = vmatmul.msk.bf16.gmra.mxu2 %vm1499_vm1, %v1433_v12  ;;  %v1112_v16 = vpop.f32.mrf.mxu1  ;;  %v854_v17 = vadd.f32 %v4656_v10, %v853_v14  ;;  %v4325_v12 = vld [vmem:[%s6266_s6 + $0x8] sm:$0xff]  ;;  %v3473_v14 = vld [vmem:[%s6260_s0 + $0x100] sm:$0xf] }
  0xe0   :  { %2236 = vmatpush.bf16.msra.mxu3 %v4326_v6 }
  0xe1   :  { %892 = vmatmul.bf16.gmra.mxu0 %v3442_v13  ;;  %v1108_v19 = vadd.f32 %v1107_v62, %v854_v17  ;;  %v3475_v62 = vld [vmem:[%s6260_s0 + $0x108] sm:$0xf0] }
  0xe2   :  { %3796 = vmatmul.msk.bf16.gmra.mxu1 %vm676_vm0, %v3454_v15  ;;  %v3478_v2 = vor.u32 %v4244_v61, %v3475_v62  ;;  %v4245_v15 = vld [vmem:[%s6260_s0 + $0x104] sm:$0xf0] }
  0xe3   :  { %v1340_v25 = vmax.f32 %v1108_v19, 0.0  ;;  %v3483_v19 = vld [vmem:[%s6260_s0 + $0x118] sm:$0xf0] }
  0xe4   :  { %2237 = vmatpush.bf16.msra.mxu3 %v4325_v12 }
  0xe6   :  { %v855_v18 = vpop.f32.mrf.mxu0 }
  0xe7   :  { %v856_v20 = vadd.f32 %v4656_v10, %v855_v18  ;;  %v1114_v21 = vpop.f32.mrf.mxu1  ;;  %v4246_v18 = vld [vmem:[%s6260_s0 + $0x114] sm:$0xf] }
  0xe8   :  { %v3486_v24 = vor.u32 %v4246_v18, %v3483_v19  ;;  %v4252_v19 = vld [vmem:[%s6260_s0 + $0x144] sm:$0xf] }
  0xe9   :  { %v1110_v22 = vadd.f32 %v1109_v3, %v856_v20  ;;  %v4324_v20 = vld [vmem:[%s6266_s6] sm:$0xff]  ;;  %s4432_s6 = smov 64  }
  0xea   :  { %2238 = vmatpush.bf16.msra.mxu3 %v4324_v20  ;;  %v3507_v20 = vld [vmem:[%s6260_s0 + $0x148] sm:$0xf0] }
  0xeb   :  { %v1341_v26 = vmax.f32 %v1110_v22, 0.0  ;;  %v3474_v22 = vor.u32 %v4245_v15, %v3473_v14  ;;  %v3497_v14 = vld [vmem:[%s6260_s0 + $0x130] sm:$0xf]  ;;  %v4251_v15 = vld [vmem:[%s6260_s0 + $0x134] sm:$0xf0] }
  0xed   :  { %v1434_v29 = vpack.c.bf16 %v1341_v26, %v1340_v25 }
  0xee   :  { %v858_v31 = vpop.f32.mrf.mxu0 }
  0xef   :  { %3844 = vmatmul.msk.bf16.gmra.mxu2 %vm1499_vm1, %v1434_v29  ;;  %v1117_v33 = vpop.f32.mrf.mxu1  ;;  %v859_v34 = vadd.f32 %v4656_v10, %v858_v31 }
  0xf1   :  { %897 = vmatmul.bf16.gmra.mxu0 %v3450_v30  ;;  %v1113_v36 = vadd.f32 %v1112_v16, %v859_v34 }
  0xf2   :  { %3797 = vmatmul.msk.bf16.gmra.mxu1 %vm676_vm0, %v3462_v32  ;;  %v3481_v32 = vld [vmem:[%s6260_s0 + $0x110] sm:$0xf] }
  0xf3   :  { %v1342_v42 = vmax.f32 %v1113_v36, 0.0  ;;  %v4248_v36 = vld [vmem:[%s6260_s0 + $0x124] sm:$0xf] }
  0xf6   :  { %v860_v35 = vpop.f32.mrf.mxu0 }
  0xf7   :  { %v861_v37 = vadd.f32 %v4656_v10, %v860_v35  ;;  %v1119_v38 = vpop.f32.mrf.mxu1 }
  0xf9   :  { %v1115_v39 = vadd.f32 %v1114_v21, %v861_v37  ;;  %v3491_v37 = vld [vmem:[%s6260_s0 + $0x128] sm:$0xf0] }
  0xfa   :  { %v3494_v41 = vor.u32 %v4248_v36, %v3491_v37 }
  0xfb   :  { %v1343_v43 = vmax.f32 %v1115_v39, 0.0 }
  0xfd   :  { %v1435_v46 = vpack.c.bf16 %v1343_v43, %v1342_v42 }
  0xfe   :  { %v863_v48 = vpop.f32.mrf.mxu0 }
  0xff   :  { %3845 = vmatmul.msk.bf16.gmra.mxu2 %vm1499_vm1, %v1435_v46  ;;  %v1122_v50 = vpop.f32.mrf.mxu1  ;;  %v864_v51 = vadd.f32 %v4656_v10, %v863_v48 }
 0x101   :  { %902 = vmatmul.bf16.gmra.mxu0 %v3458_v47  ;;  %v1118_v53 = vadd.f32 %v1117_v33, %v864_v51  ;;  %v4247_v33 = vld [vmem:[%s6260_s0 + $0x114] sm:$0xf0] }
 0x102   :  { %3798 = vmatmul.msk.bf16.gmra.mxu1 %vm676_vm0, %v3470_v49  ;;  %v3482_v39 = vor.u32 %v4247_v33, %v3481_v32 }
 0x103   :  { %v1344_v59 = vmax.f32 %v1118_v53, 0.0  ;;  %v3489_v53 = vld [vmem:[%s6260_s0 + $0x120] sm:$0xf] }
 0x106   :  { %v865_v52 = vpop.f32.mrf.mxu0 }
 0x107   :  { %v866_v54 = vadd.f32 %v4656_v10, %v865_v52  ;;  %v1124_v55 = vpop.f32.mrf.mxu1 }
 0x109   :  { %v1120_v56 = vadd.f32 %v1119_v38, %v866_v54  ;;  %v4249_v54 = vld [vmem:[%s6260_s0 + $0x124] sm:$0xf0] }
 0x10b   :  { %v1345_v60 = vmax.f32 %v1120_v56, 0.0 }
 0x10d   :  { %v1436_v63 = vpack.c.bf16 %v1345_v60, %v1344_v59  ;;  %v3499_v59 = vld [vmem:[%s6260_s0 + $0x138] sm:$0xf0] }
 0x10e   :  { %v868_v1 = vpop.f32.mrf.mxu0 }
 0x10f   :  { %3846 = vmatmul.msk.bf16.gmra.mxu2 %vm1499_vm1, %v1436_v63  ;;  %v1127_v3 = vpop.f32.mrf.mxu1  ;;  %v869_v5 = vadd.f32 %v4656_v10, %v868_v1  ;;  %v3490_v63 = vor.u32 %v4249_v54, %v3489_v53  ;;  %v3502_v1 = vor.u32 %v4250_v58, %v3499_v59 }
 0x111   :  { %907 = vmatmul.bf16.gmra.mxu0 %v3466_v0  ;;  %v1123_v8 = vadd.f32 %v1122_v50, %v869_v5 }
 0x112   :  { %3799 = vmatmul.msk.bf16.gmra.mxu1 %vm676_vm0, %v3478_v2 }
 0x113   :  { %v1346_v16 = vmax.f32 %v1123_v8, 0.0 }
 0x116   :  { %v870_v7 = vpop.f32.mrf.mxu0 }
 0x117   :  { %v871_v9 = vadd.f32 %v4656_v10, %v870_v7  ;;  %v1129_v11 = vpop.f32.mrf.mxu1 }
 0x119   :  { %v1125_v13 = vadd.f32 %v1124_v55, %v871_v9 }
 0x11b   :  { %v1347_v17 = vmax.f32 %v1125_v13, 0.0 }
 0x11d   :  { %v1437_v21 = vpack.c.bf16 %v1347_v17, %v1346_v16 }
 0x11e   :  { %v873_v23 = vpop.f32.mrf.mxu0 }
 0x11f   :  { %3847 = vmatmul.msk.bf16.gmra.mxu2 %vm1499_vm1, %v1437_v21  ;;  %v1132_v25 = vpop.f32.mrf.mxu1  ;;  %v874_v26 = vadd.f32 %v4656_v10, %v873_v23 }
 0x121   :  { %912 = vmatmul.bf16.gmra.mxu0 %v3474_v22  ;;  %v1128_v28 = vadd.f32 %v1127_v3, %v874_v26  ;;  %v3510_v26 = vor.u32 %v4252_v19, %v3507_v20 }
 0x122   :  { %3800 = vmatmul.msk.bf16.gmra.mxu1 %vm676_vm0, %v3486_v24  ;;  %v3498_v24 = vor.u32 %v4251_v15, %v3497_v14 }
 0x123   :  { %v1348_v34 = vmax.f32 %v1128_v28, 0.0 }
 0x126   :  { %v875_v27 = vpop.f32.mrf.mxu0 }
 0x127   :  { %v876_v29 = vadd.f32 %v4656_v10, %v875_v27  ;;  %v1134_v30 = vpop.f32.mrf.mxu1 }
 0x129   :  { %v1130_v31 = vadd.f32 %v1129_v11, %v876_v29 }
 0x12b   :  { %v1349_v35 = vmax.f32 %v1130_v31, 0.0 }
 0x12d   :  { %v1438_v38 = vpack.c.bf16 %v1349_v35, %v1348_v34 }
 0x12e   :  { %v878_v40 = vpop.f32.mrf.mxu0 }
 0x12f   :  { %3848 = vmatmul.msk.bf16.gmra.mxu2 %vm1499_vm1, %v1438_v38  ;;  %v1137_v42 = vpop.f32.mrf.mxu1  ;;  %v879_v44 = vadd.f32 %v4656_v10, %v878_v40  ;;  %v3505_v38 = vld [vmem:[%s6260_s0 + $0x140] sm:$0xf] }
 0x131   :  { %917 = vmatmul.bf16.gmra.mxu0 %v3482_v39  ;;  %v1133_v47 = vadd.f32 %v1132_v25, %v879_v44  ;;  %v4253_v39 = vld [vmem:[%s6260_s0 + $0x144] sm:$0xf0]  ;;  %v3515_v44 = vld [vmem:[%s6260_s0 + $0x158] sm:$0xf0] }
 0x132   :  { %v1656_v43 = vpop.f32.mrf.mxu2  ;;  %3801 = vmatmul.msk.bf16.gmra.mxu1 %vm676_vm0, %v3494_v41 }
 0x133   :  { %v1657_v50 = vadd.f32 %v4819_v45, %v1656_v43  ;;  %v1350_v55 = vmax.f32 %v1133_v47, 0.0  ;;  %v4254_v43 = vld [vmem:[%s6260_s0 + $0x154] sm:$0xf] }
 0x135   :  { %v1901_v60 = vmax.f32 %v1657_v50, 0.0 }
 0x136   :  { %v880_v46 = vpop.f32.mrf.mxu0 }
 0x137   :  { %v881_v48 = vadd.f32 %v4656_v10, %v880_v46  ;;  %v1139_v49 = vpop.f32.mrf.mxu1 }
 0x139   :  { %v1135_v51 = vadd.f32 %v1134_v30, %v881_v48 }
 0x13a   :  { %v1658_v52 = vpop.f32.mrf.mxu2 }
 0x13b   :  { %v1351_v56 = vmax.f32 %v1135_v51, 0.0  ;;  %v1659_v57 = vadd.f32 %v4819_v45, %v1658_v52  ;;  %v3518_v51 = vor.u32 %v4254_v43, %v3515_v44 }
 0x13d   :  { %v1902_v61 = vmax.f32 %v1659_v57, 0.0  ;;  %v1439_v62 = vpack.c.bf16 %v1351_v56, %v1350_v55 }
 0x13e   :  { %v883_v0 = vpop.f32.mrf.mxu0 }
 0x13f   :  { %3849 = vmatmul.msk.bf16.gmra.mxu2 %vm1499_vm1, %v1439_v62  ;;  %v1999_v2 = vpack.c.bf16 %v1902_v61, %v1901_v60  ;;  %v1142_v3 = vpop.f32.mrf.mxu1  ;;  %v884_v5 = vadd.f32 %v4656_v10, %v883_v0  ;;  %v4255_v0 = vld [vmem:[%s6260_s0 + $0x154] sm:$0xf0] }
 0x141   :  { %922 = vmatmul.bf16.gmra.mxu0 %v3490_v63  ;;  %3905 = vmatmul.msk.bf16.vlgmr.msra.gmra.mxu3 %vm676_vm0, %v1999_v2  ;;  %v1138_v7 = vadd.f32 %v1137_v42, %v884_v5  ;;  %v3513_v63 = vld [vmem:[%s6260_s0 + $0x150] sm:$0xf]  ;;  %v3523_v5 = vld [vmem:[%s6260_s0 + $0x168] sm:$0xf0] }
 0x142   :  { %v1661_v4 = vpop.f32.mrf.mxu2  ;;  %3802 = vmatmul.msk.bf16.gmra.mxu1 %vm676_vm0, %v3502_v1 }
 0x143   :  { %v1662_v11 = vadd.f32 %v4819_v45, %v1661_v4  ;;  %v1352_v16 = vmax.f32 %v1138_v7, 0.0  ;;  %v4256_v4 = vld [vmem:[%s6260_s0 + $0x164] sm:$0xf] }
 0x145   :  { %v1903_v21 = vmax.f32 %v1662_v11, 0.0 }
 0x146   :  { %v885_v6 = vpop.f32.mrf.mxu0 }
 0x147   :  { %v886_v8 = vadd.f32 %v4656_v10, %v885_v6  ;;  %v1144_v9 = vpop.f32.mrf.mxu1 }
 0x149   :  { %v1140_v12 = vadd.f32 %v1139_v49, %v886_v8  ;;  %v3506_v49 = vor.u32 %v4253_v39, %v3505_v38 }
 0x14a   :  { %v1663_v13 = vpop.f32.mrf.mxu2 }
 0x14b   :  { %v1353_v17 = vmax.f32 %v1140_v12, 0.0  ;;  %v1664_v18 = vadd.f32 %v4819_v45, %v1663_v13  ;;  %v3526_v12 = vor.u32 %v4256_v4, %v3523_v5 }
 0x14d   :  { %v1904_v22 = vmax.f32 %v1664_v18, 0.0  ;;  %v1440_v23 = vpack.c.bf16 %v1353_v17, %v1352_v16 }
 0x14e   :  { %v888_v25 = vpop.f32.mrf.mxu0 }
 0x14f   :  { %3850 = vmatmul.msk.bf16.gmra.mxu2 %vm1499_vm1, %v1440_v23  ;;  %v2000_v27 = vpack.c.bf16 %v1904_v22, %v1903_v21  ;;  %v1147_v28 = vpop.f32.mrf.mxu1  ;;  %v889_v30 = vadd.f32 %v4656_v10, %v888_v25  ;;  %v4257_v25 = vld [vmem:[%s6260_s0 + $0x164] sm:$0xf0] }
 0x151   :  { %927 = vmatmul.bf16.gmra.mxu0 %v3498_v24  ;;  %3906 = vmatmul.msk.bf16.gmra.mxu3 %vm676_vm0, %v2000_v27  ;;  %v1143_v32 = vadd.f32 %v1142_v3, %v889_v30  ;;  %v3521_v24 = vld [vmem:[%s6260_s0 + $0x160] sm:$0xf]  ;;  %v3531_v30 = vld [vmem:[%s6260_s0 + $0x178] sm:$0xf0] }
 0x152   :  { %v1666_v29 = vpop.f32.mrf.mxu2  ;;  %3803 = vmatmul.msk.bf16.gmra.mxu1 %vm676_vm0, %v3510_v26 }
 0x153   :  { %v1667_v35 = vadd.f32 %v4819_v45, %v1666_v29  ;;  %v1354_v40 = vmax.f32 %v1143_v32, 0.0  ;;  %v4258_v29 = vld [vmem:[%s6260_s0 + $0x174] sm:$0xf] }
 0x155   :  { %v1905_v46 = vmax.f32 %v1667_v35, 0.0 }
 0x156   :  { %v890_v31 = vpop.f32.mrf.mxu0 }
 0x157   :  { %v891_v33 = vadd.f32 %v4656_v10, %v890_v31  ;;  %v1149_v34 = vpop.f32.mrf.mxu1 }
 0x159   :  { %v1145_v36 = vadd.f32 %v1144_v9, %v891_v33  ;;  %v3514_v9 = vor.u32 %v4255_v0, %v3513_v63 }
 0x15a   :  { %v1668_v37 = vpop.f32.mrf.mxu2 }
 0x15b   :  { %v1355_v41 = vmax.f32 %v1145_v36, 0.0  ;;  %v1669_v42 = vadd.f32 %v4819_v45, %v1668_v37  ;;  %v3534_v36 = vor.u32 %v4258_v29, %v3531_v30 }
 0x15d   :  { %v1906_v47 = vmax.f32 %v1669_v42, 0.0  ;;  %v1441_v48 = vpack.c.bf16 %v1355_v41, %v1354_v40 }
 0x15e   :  { %v893_v50 = vpop.f32.mrf.mxu0 }
 0x15f   :  { %3851 = vmatmul.msk.bf16.gmra.mxu2 %vm1499_vm1, %v1441_v48  ;;  %v2001_v52 = vpack.c.bf16 %v1906_v47, %v1905_v46  ;;  %v1152_v53 = vpop.f32.mrf.mxu1  ;;  %v894_v55 = vadd.f32 %v4656_v10, %v893_v50  ;;  %v4259_v50 = vld [vmem:[%s6260_s0 + $0x174] sm:$0xf0] }
 0x161   :  { %932 = vmatmul.bf16.gmra.mxu0 %v3506_v49  ;;  %3907 = vmatmul.msk.bf16.gmra.mxu3 %vm676_vm0, %v2001_v52  ;;  %v1148_v57 = vadd.f32 %v1147_v28, %v894_v55  ;;  %v3529_v49 = vld [vmem:[%s6260_s0 + $0x170] sm:$0xf]  ;;  %v3539_v55 = vld [vmem:[%s6260_s0 + $0x188] sm:$0xf0] }
 0x162   :  { %v1671_v54 = vpop.f32.mrf.mxu2  ;;  %3804 = vmatmul.msk.bf16.gmra.mxu1 %vm676_vm0, %v3518_v51 }
 0x163   :  { %v1672_v60 = vadd.f32 %v4819_v45, %v1671_v54  ;;  %v1356_v1 = vmax.f32 %v1148_v57, 0.0  ;;  %v4260_v54 = vld [vmem:[%s6260_s0 + $0x184] sm:$0xf] }
 0x165   :  { %v1907_v6 = vmax.f32 %v1672_v60, 0.0 }
 0x166   :  { %v895_v56 = vpop.f32.mrf.mxu0 }
 0x167   :  { %v896_v58 = vadd.f32 %v4656_v10, %v895_v56  ;;  %v1154_v59 = vpop.f32.mrf.mxu1 }
 0x169   :  { %v1150_v61 = vadd.f32 %v1149_v34, %v896_v58  ;;  %v3522_v34 = vor.u32 %v4257_v25, %v3521_v24 }
 0x16a   :  { %v1673_v62 = vpop.f32.mrf.mxu2 }
 0x16b   :  { %v1357_v2 = vmax.f32 %v1150_v61, 0.0  ;;  %v1674_v3 = vadd.f32 %v4819_v45, %v1673_v62  ;;  %v3542_v61 = vor.u32 %v4260_v54, %v3539_v55 }
 0x16d   :  { %v1442_v7 = vpack.c.bf16 %v1357_v2, %v1356_v1  ;;  %v1908_v8 = vmax.f32 %v1674_v3, 0.0 }
 0x16e   :  { %v898_v11 = vpop.f32.mrf.mxu0 }
 0x16f   :  { %3852 = vmatmul.msk.bf16.gmra.mxu2 %vm1499_vm1, %v1442_v7  ;;  %v2002_v13 = vpack.c.bf16 %v1908_v8, %v1907_v6  ;;  %v1157_v14 = vpop.f32.mrf.mxu1  ;;  %v899_v16 = vadd.f32 %v4656_v10, %v898_v11  ;;  %v4261_v11 = vld [vmem:[%s6260_s0 + $0x184] sm:$0xf0] }
 0x171   :  { %937 = vmatmul.bf16.gmra.mxu0 %v3514_v9  ;;  %3908 = vmatmul.msk.bf16.gmra.mxu3 %vm676_vm0, %v2002_v13  ;;  %v1153_v18 = vadd.f32 %v1152_v53, %v899_v16  ;;  %v3537_v9 = vld [vmem:[%s6260_s0 + $0x180] sm:$0xf]  ;;  %v3547_v16 = vld [vmem:[%s6260_s0 + $0x198] sm:$0xf0] }
 0x172   :  { %v1676_v15 = vpop.f32.mrf.mxu2  ;;  %3805 = vmatmul.msk.bf16.gmra.mxu1 %vm676_vm0, %v3526_v12 }
 0x173   :  { %v1677_v21 = vadd.f32 %v4819_v45, %v1676_v15  ;;  %v1358_v26 = vmax.f32 %v1153_v18, 0.0  ;;  %v4262_v15 = vld [vmem:[%s6260_s0 + $0x194] sm:$0xf] }
 0x175   :  { %v1909_v31 = vmax.f32 %v1677_v21, 0.0 }
 0x176   :  { %v900_v17 = vpop.f32.mrf.mxu0 }
 0x177   :  { %v901_v19 = vadd.f32 %v4656_v10, %v900_v17  ;;  %v1159_v20 = vpop.f32.mrf.mxu1 }
 0x179   :  { %v1155_v22 = vadd.f32 %v1154_v59, %v901_v19  ;;  %v3530_v59 = vor.u32 %v4259_v50, %v3529_v49 }
 0x17a   :  { %v1678_v23 = vpop.f32.mrf.mxu2 }
 0x17b   :  { %v1359_v27 = vmax.f32 %v1155_v22, 0.0  ;;  %v1679_v28 = vadd.f32 %v4819_v45, %v1678_v23  ;;  %v3550_v22 = vor.u32 %v4262_v15, %v3547_v16 }
 0x17d   :  { %v1443_v32 = vpack.c.bf16 %v1359_v27, %v1358_v26  ;;  %v1910_v33 = vmax.f32 %v1679_v28, 0.0 }
 0x17e   :  { %v903_v35 = vpop.f32.mrf.mxu0 }
 0x17f   :  { %3853 = vmatmul.msk.bf16.gmra.mxu2 %vm1499_vm1, %v1443_v32  ;;  %v2003_v37 = vpack.c.bf16 %v1910_v33, %v1909_v31  ;;  %v1162_v38 = vpop.f32.mrf.mxu1  ;;  %v904_v40 = vadd.f32 %v4656_v10, %v903_v35  ;;  %v4263_v35 = vld [vmem:[%s6260_s0 + $0x194] sm:$0xf0] }
 0x181   :  { %942 = vmatmul.bf16.gmra.mxu0 %v3522_v34  ;;  %3909 = vmatmul.msk.bf16.gmra.mxu3 %vm676_vm0, %v2003_v37  ;;  %v1158_v42 = vadd.f32 %v1157_v14, %v904_v40  ;;  %v3545_v34 = vld [vmem:[%s6260_s0 + $0x190] sm:$0xf]  ;;  %v3555_v40 = vld [vmem:[%s6260_s0 + $0x1a8] sm:$0xf0] }
 0x182   :  { %v1681_v39 = vpop.f32.mrf.mxu2  ;;  %3806 = vmatmul.msk.bf16.gmra.mxu1 %vm676_vm0, %v3534_v36 }
 0x183   :  { %v1682_v46 = vadd.f32 %v4819_v45, %v1681_v39  ;;  %v1360_v51 = vmax.f32 %v1158_v42, 0.0  ;;  %v4264_v39 = vld [vmem:[%s6260_s0 + $0x1a4] sm:$0xf] }
 0x185   :  { %v1911_v56 = vmax.f32 %v1682_v46, 0.0 }
 0x186   :  { %v905_v41 = vpop.f32.mrf.mxu0 }
 0x187   :  { %v906_v43 = vadd.f32 %v4656_v10, %v905_v41  ;;  %v1164_v44 = vpop.f32.mrf.mxu1 }
 0x189   :  { %v1160_v47 = vadd.f32 %v1159_v20, %v906_v43  ;;  %v3538_v20 = vor.u32 %v4261_v11, %v3537_v9 }
 0x18a   :  { %v1683_v48 = vpop.f32.mrf.mxu2 }
 0x18b   :  { %v1361_v52 = vmax.f32 %v1160_v47, 0.0  ;;  %v1684_v53 = vadd.f32 %v4819_v45, %v1683_v48  ;;  %v3558_v47 = vor.u32 %v4264_v39, %v3555_v40 }
 0x18d   :  { %v1444_v57 = vpack.c.bf16 %v1361_v52, %v1360_v51  ;;  %v1912_v58 = vmax.f32 %v1684_v53, 0.0 }
 0x18e   :  { %v908_v60 = vpop.f32.mrf.mxu0 }
 0x18f   :  { %3854 = vmatmul.msk.bf16.gmra.mxu2 %vm1499_vm1, %v1444_v57  ;;  %v2004_v62 = vpack.c.bf16 %v1912_v58, %v1911_v56  ;;  %v1167_v63 = vpop.f32.mrf.mxu1  ;;  %v909_v1 = vadd.f32 %v4656_v10, %v908_v60  ;;  %v4265_v60 = vld [vmem:[%s6260_s0 + $0x1a4] sm:$0xf0] }
 0x191   :  { %947 = vmatmul.bf16.gmra.mxu0 %v3530_v59  ;;  %3910 = vmatmul.msk.bf16.gmra.mxu3 %vm676_vm0, %v2004_v62  ;;  %v1163_v3 = vadd.f32 %v1162_v38, %v909_v1  ;;  %v3553_v59 = vld [vmem:[%s6260_s0 + $0x1a0] sm:$0xf]  ;;  %v3563_v1 = vld [vmem:[%s6260_s0 + $0x1b8] sm:$0xf0] }
 0x192   :  { %v1686_v0 = vpop.f32.mrf.mxu2  ;;  %3807 = vmatmul.msk.bf16.gmra.mxu1 %vm676_vm0, %v3542_v61 }
 0x193   :  { %v1687_v6 = vadd.f32 %v4819_v45, %v1686_v0  ;;  %v1362_v12 = vmax.f32 %v1163_v3, 0.0  ;;  %v4266_v0 = vld [vmem:[%s6260_s0 + $0x1b4] sm:$0xf] }
 0x195   :  { %v1913_v17 = vmax.f32 %v1687_v6, 0.0 }
 0x196   :  { %v910_v2 = vpop.f32.mrf.mxu0 }
 0x197   :  { %v911_v4 = vadd.f32 %v4656_v10, %v910_v2  ;;  %v1169_v5 = vpop.f32.mrf.mxu1 }
 0x199   :  { %v1165_v7 = vadd.f32 %v1164_v44, %v911_v4  ;;  %v3546_v44 = vor.u32 %v4263_v35, %v3545_v34 }
 0x19a   :  { %v1688_v8 = vpop.f32.mrf.mxu2 }
 0x19b   :  { %v1363_v13 = vmax.f32 %v1165_v7, 0.0  ;;  %v1689_v14 = vadd.f32 %v4819_v45, %v1688_v8  ;;  %v3566_v7 = vor.u32 %v4266_v0, %v3563_v1 }
 0x19d   :  { %v1445_v18 = vpack.c.bf16 %v1363_v13, %v1362_v12  ;;  %v1914_v19 = vmax.f32 %v1689_v14, 0.0 }
 0x19e   :  { %v913_v21 = vpop.f32.mrf.mxu0 }
 0x19f   :  { %3855 = vmatmul.msk.bf16.gmra.mxu2 %vm1499_vm1, %v1445_v18  ;;  %v2005_v23 = vpack.c.bf16 %v1914_v19, %v1913_v17  ;;  %v1172_v24 = vpop.f32.mrf.mxu1  ;;  %v914_v26 = vadd.f32 %v4656_v10, %v913_v21  ;;  %v3561_v21 = vld [vmem:[%s6260_s0 + $0x1b0] sm:$0xf] }
 0x1a1   :  { %952 = vmatmul.bf16.gmra.mxu0 %v3538_v20  ;;  %3911 = vmatmul.msk.bf16.gmra.mxu3 %vm676_vm0, %v2005_v23  ;;  %v1168_v28 = vadd.f32 %v1167_v63, %v914_v26  ;;  %v4268_v26 = vld [vmem:[%s6260_s0 + $0x1c4] sm:$0xf] }
 0x1a2   :  { %v1691_v25 = vpop.f32.mrf.mxu2  ;;  %3808 = vmatmul.msk.bf16.gmra.mxu1 %vm676_vm0, %v3550_v22  ;;  %v4267_v22 = vld [vmem:[%s6260_s0 + $0x1b4] sm:$0xf0] }
 0x1a3   :  { %v1692_v31 = vadd.f32 %v4819_v45, %v1691_v25  ;;  %v1364_v36 = vmax.f32 %v1168_v28, 0.0 }
 0x1a5   :  { %v1915_v41 = vmax.f32 %v1692_v31, 0.0 }
 0x1a6   :  { %v915_v27 = vpop.f32.mrf.mxu0 }
 0x1a7   :  { %v916_v29 = vadd.f32 %v4656_v10, %v915_v27  ;;  %v1174_v30 = vpop.f32.mrf.mxu1  ;;  %v3571_v27 = vld [vmem:[%s6260_s0 + $0x1c8] sm:$0xf0] }
 0x1a8   :  { %v3574_v34 = vor.u32 %v4268_v26, %v3571_v27 }
 0x1a9   :  { %v1170_v32 = vadd.f32 %v1169_v5, %v916_v29  ;;  %v3554_v5 = vor.u32 %v4265_v60, %v3553_v59 }
 0x1aa   :  { %v1693_v33 = vpop.f32.mrf.mxu2 }
 0x1ab   :  { %v1365_v37 = vmax.f32 %v1170_v32, 0.0  ;;  %v1694_v38 = vadd.f32 %v4819_v45, %v1693_v33  ;;  %v3562_v32 = vor.u32 %v4267_v22, %v3561_v21 }
 0x1ad   :  { %v1446_v42 = vpack.c.bf16 %v1365_v37, %v1364_v36  ;;  %v1916_v43 = vmax.f32 %v1694_v38, 0.0 }
 0x1ae   :  { %v918_v46 = vpop.f32.mrf.mxu0 }
 0x1af   :  { %3856 = vmatmul.msk.bf16.gmra.mxu2 %vm1499_vm1, %v1446_v42  ;;  %v2006_v48 = vpack.c.bf16 %v1916_v43, %v1915_v41  ;;  %v1177_v49 = vpop.f32.mrf.mxu1  ;;  %v919_v51 = vadd.f32 %v4656_v10, %v918_v46 }
 0x1b1   :  { %957 = vmatmul.bf16.gmra.mxu0 %v3546_v44  ;;  %3912 = vmatmul.msk.bf16.gmra.mxu3 %vm676_vm0, %v2006_v48  ;;  %v1173_v53 = vadd.f32 %v1172_v24, %v919_v51  ;;  %v3569_v48 = vld [vmem:[%s6260_s0 + $0x1c0] sm:$0xf] }
 0x1b2   :  { %v1696_v50 = vpop.f32.mrf.mxu2  ;;  %3809 = vmatmul.msk.bf16.gmra.mxu1 %vm676_vm0, %v3558_v47 }
 0x1b3   :  { %v1697_v56 = vadd.f32 %v4819_v45, %v1696_v50  ;;  %v1366_v61 = vmax.f32 %v1173_v53, 0.0  ;;  %v4270_v53 = vld [vmem:[%s6260_s0 + $0x1d4] sm:$0xf] }
 0x1b5   :  { %v1917_v2 = vmax.f32 %v1697_v56, 0.0 }
 0x1b6   :  { %v920_v52 = vpop.f32.mrf.mxu0 }
 0x1b7   :  { %v921_v54 = vadd.f32 %v4656_v10, %v920_v52  ;;  %v1179_v55 = vpop.f32.mrf.mxu1 }
 0x1b9   :  { %v1175_v57 = vadd.f32 %v1174_v30, %v921_v54  ;;  %v3579_v54 = vld [vmem:[%s6260_s0 + $0x1d8] sm:$0xf0] }
 0x1ba   :  { %v1698_v58 = vpop.f32.mrf.mxu2 }
 0x1bb   :  { %v1367_v62 = vmax.f32 %v1175_v57, 0.0  ;;  %v1699_v63 = vadd.f32 %v4819_v45, %v1698_v58 }
 0x1bd   :  { %v1447_v3 = vpack.c.bf16 %v1367_v62, %v1366_v61  ;;  %v1918_v4 = vmax.f32 %v1699_v63, 0.0  ;;  %v3582_v61 = vor.u32 %v4270_v53, %v3579_v54 }
 0x1be   :  { %v923_v6 = vpop.f32.mrf.mxu0 }
 0x1bf   :  { %3857 = vmatmul.msk.bf16.gmra.mxu2 %vm1499_vm1, %v1447_v3  ;;  %v2007_v8 = vpack.c.bf16 %v1918_v4, %v1917_v2  ;;  %v1182_v9 = vpop.f32.mrf.mxu1  ;;  %v924_v12 = vadd.f32 %v4656_v10, %v923_v6 }
 0x1c1   :  { %962 = vmatmul.bf16.gmra.mxu0 %v3554_v5  ;;  %3913 = vmatmul.msk.bf16.gmra.mxu3 %vm676_vm0, %v2007_v8  ;;  %v1178_v15 = vadd.f32 %v1177_v49, %v924_v12  ;;  %v4269_v49 = vld [vmem:[%s6260_s0 + $0x1c4] sm:$0xf0]  ;;  %v4271_v12 = vld [vmem:[%s6260_s0 + $0x1d4] sm:$0xf0] }
 0x1c2   :  { %v1701_v11 = vpop.f32.mrf.mxu2  ;;  %3810 = vmatmul.msk.bf16.gmra.mxu1 %vm676_vm0, %v3566_v7  ;;  %v3570_v59 = vor.u32 %v4269_v49, %v3569_v48 }
 0x1c3   :  { %v1702_v18 = vadd.f32 %v4819_v45, %v1701_v11  ;;  %v1368_v23 = vmax.f32 %v1178_v15, 0.0  ;;  %v3577_v11 = vld [vmem:[%s6260_s0 + $0x1d0] sm:$0xf] }
 0x1c4   :  { %v4992_v13 = vpop.f32.mrf.mxu3  ;;  %v3578_v22 = vor.u32 %v4271_v12, %v3577_v11  ;;  %v4276_v11 = vld [vmem:[%s6260_s0 + $0x204] sm:$0xf]  ;;  %v3603_v12 = vld [vmem:[%s6260_s0 + $0x208] sm:$0xf0] }
 0x1c5   :  { %v1919_v29 = vmax.f32 %v1702_v18, 0.0 }
 0x1c6   :  { %v925_v14 = vpop.f32.mrf.mxu0 }
 0x1c7   :  { %v926_v16 = vadd.f32 %v4656_v10, %v925_v14  ;;  %v1184_v17 = vpop.f32.mrf.mxu1 }
 0x1c9   :  { %v1180_v19 = vadd.f32 %v1179_v55, %v926_v16 }
 0x1ca   :  { %v1703_v20 = vpop.f32.mrf.mxu2 }
 0x1cb   :  { %v1369_v24 = vmax.f32 %v1180_v19, 0.0  ;;  %v1704_v25 = vadd.f32 %v4819_v45, %v1703_v20 }
 0x1cc   :  { %v5009_v28 = vpop.f32.mrf.mxu3 }
 0x1cd   :  { %v1448_v30 = vpack.c.bf16 %v1369_v24, %v1368_v23  ;;  %v1920_v31 = vmax.f32 %v1704_v25, 0.0 }
 0x1ce   :  { %v928_v33 = vpop.f32.mrf.mxu0 }
 0x1cf   :  { %3858 = vmatmul.msk.bf16.gmra.mxu2 %vm1499_vm1, %v1448_v30  ;;  %v2008_v35 = vpack.c.bf16 %v1920_v31, %v1919_v29  ;;  %v1187_v36 = vpop.f32.mrf.mxu1  ;;  %v929_v38 = vadd.f32 %v4656_v10, %v928_v33  ;;  %v5063_v29 = vld [vmem:[%s6263_s3] ss:$0 sm:$0xff] }
 0x1d1   :  { %967 = vmatmul.bf16.gmra.mxu0 %v3562_v32  ;;  %3914 = vmatmul.msk.bf16.gmra.mxu3 %vm676_vm0, %v2008_v35  ;;  %v1183_v41 = vadd.f32 %v1182_v9, %v929_v38 }
 0x1d2   :  { %v1706_v37 = vpop.f32.mrf.mxu2  ;;  %3811 = vmatmul.msk.bf16.gmra.mxu1 %vm676_vm0, %v3574_v34 }
 0x1d3   :  { %v1707_v44 = vadd.f32 %v4819_v45, %v1706_v37  ;;  %v1370_v50 = vmax.f32 %v1183_v41, 0.0  ;;  %v4273_v41 = vld [vmem:[%s6260_s0 + $0x1e4] sm:$0xf0] }
 0x1d4   :  { %v5015_v39 = vpop.f32.mrf.mxu3 }
 0x1d5   :  { %v1921_v56 = vmax.f32 %v1707_v44, 0.0 }
 0x1d6   :  { %v930_v40 = vpop.f32.mrf.mxu0 }
 0x1d7   :  { %v931_v42 = vadd.f32 %v4656_v10, %v930_v40  ;;  %v1189_v43 = vpop.f32.mrf.mxu1  ;;  %v3585_v40 = vld [vmem:[%s6260_s0 + $0x1e0] sm:$0xf] }
 0x1d9   :  { %v1185_v46 = vadd.f32 %v1184_v17, %v931_v42  ;;  %v3587_v17 = vld [vmem:[%s6260_s0 + $0x1e8] sm:$0xf0] }
 0x1da   :  { %v1708_v47 = vpop.f32.mrf.mxu2 }
 0x1db   :  { %v1371_v51 = vmax.f32 %v1185_v46, 0.0  ;;  %v1709_v52 = vadd.f32 %v4819_v45, %v1708_v47  ;;  %v4274_v46 = vld [vmem:[%s6260_s0 + $0x1f4] sm:$0xf]  ;;  %v3595_v47 = vld [vmem:[%s6260_s0 + $0x1f8] sm:$0xf0] }
 0x1dc   :  { %v5032_v55 = vpop.f32.mrf.mxu3  ;;  %v3598_v54 = vor.u32 %v4274_v46, %v3595_v47 }
 0x1dd   :  { %v1449_v57 = vpack.c.bf16 %v1371_v51, %v1370_v50  ;;  %v1922_v58 = vmax.f32 %v1709_v52, 0.0  ;;  %v3586_v52 = vor.u32 %v4273_v41, %v3585_v40 }
 0x1de   :  { %v933_v60 = vpop.f32.mrf.mxu0 }
 0x1df   :  { %3859 = vmatmul.msk.bf16.gmra.mxu2 %vm1499_vm1, %v1449_v57  ;;  %v2009_v62 = vpack.c.bf16 %v1922_v58, %v1921_v56  ;;  %v1192_v63 = vpop.f32.mrf.mxu1  ;;  %v934_v1 = vadd.f32 %v4656_v10, %v933_v60 }
 0x1e1   :  { %972 = vmatmul.bf16.gmra.mxu0 %v3570_v59  ;;  %3915 = vmatmul.msk.bf16.gmra.mxu3 %vm676_vm0, %v2009_v62  ;;  %v1188_v4 = vadd.f32 %v1187_v36, %v934_v1 }
 0x1e2   :  { %v1711_v0 = vpop.f32.mrf.mxu2  ;;  %3812 = vmatmul.msk.bf16.gmra.mxu1 %vm676_vm0, %v3582_v61 }
 0x1e3   :  { %v1712_v7 = vadd.f32 %v4819_v45, %v1711_v0  ;;  %v1372_v14 = vmax.f32 %v1188_v4, 0.0 }
 0x1e4   :  { %v5038_v2 = vpop.f32.mrf.mxu3 }
 0x1e5   :  { %v1923_v19 = vmax.f32 %v1712_v7, 0.0 }
 0x1e6   :  { %v935_v3 = vpop.f32.mrf.mxu0 }
 0x1e7   :  { %v936_v5 = vadd.f32 %v4656_v10, %v935_v3  ;;  %v1194_v6 = vpop.f32.mrf.mxu1  ;;  %v4272_v10 = vld [vmem:[%s6260_s0 + $0x1e4] sm:$0xf] }
 0x1e8   :  { %v3590_v24 = vor.u32 %v4272_v10, %v3587_v17 }
 0x1e9   :  { %v1190_v8 = vadd.f32 %v1189_v43, %v936_v5  ;;  %v3593_v5 = vld [vmem:[%s6260_s0 + $0x1f0] sm:$0xf] }
 0x1ea   :  { %v1713_v9 = vpop.f32.mrf.mxu2 }
 0x1eb   :  { %v1373_v15 = vmax.f32 %v1190_v8, 0.0  ;;  %v1714_v16 = vadd.f32 %v4819_v45, %v1713_v9 }
 0x1ec   :  { %v5055_v18 = vpop.f32.mrf.mxu3 }
 0x1ed   :  { %v1450_v20 = vpack.c.bf16 %v1373_v15, %v1372_v14  ;;  %v1924_v21 = vmax.f32 %v1714_v16, 0.0 }
 0x1ee   :  { %v938_v23 = vpop.f32.mrf.mxu0 }
 0x1ef   :  { %3860 = vmatmul.msk.bf16.gmra.mxu2 %vm1499_vm1, %v1450_v20  ;;  %v2010_v25 = vpack.c.bf16 %v1924_v21, %v1923_v19  ;;  %v1197_v26 = vpop.f32.mrf.mxu1  ;;  %v939_v30 = vadd.f32 %v5063_v29, %v938_v23  ;;  %v3606_v20 = vor.u32 %v4276_v11, %v3603_v12  ;;  %v3619_v11 = vld [vmem:[%s6260_s0 + $0x228] sm:$0xf0] }
 0x1f1   :  { %977 = vmatmul.bf16.gmra.mxu0 %v3578_v22  ;;  %3916 = vmatmul.msk.bf16.gmra.mxu3 %vm676_vm0, %v2010_v25  ;;  %v1193_v33 = vadd.f32 %v1192_v63, %v939_v30 }
 0x1f2   :  { %v1716_v27 = vpop.f32.mrf.mxu2  ;;  %3813 = vmatmul.msk.bf16.gmra.mxu1 %vm676_vm0, %v3590_v24 }
 0x1f3   :  { %v1717_v36 = vadd.f32 %v4819_v45, %v1716_v27  ;;  %v1374_v42 = vmax.f32 %v1193_v33, 0.0 }
 0x1f4   :  { %v5066_v31 = vpop.f32.mrf.mxu3 }
 0x1f5   :  { %v1925_v49 = vmax.f32 %v1717_v36, 0.0  ;;  %v3601_v36 = vld [vmem:[%s6260_s0 + $0x200] sm:$0xf] }
 0x1f6   :  { %v940_v32 = vpop.f32.mrf.mxu0 }
 0x1f7   :  { %v941_v34 = vadd.f32 %v5063_v29, %v940_v32  ;;  %v1199_v35 = vpop.f32.mrf.mxu1 }
 0x1f9   :  { %v1195_v37 = vadd.f32 %v1194_v6, %v941_v34  ;;  %v4275_v6 = vld [vmem:[%s6260_s0 + $0x1f4] sm:$0xf0] }
 0x1fa   :  { %v1718_v38 = vpop.f32.mrf.mxu2  ;;  %v3594_v17 = vor.u32 %v4275_v6, %v3593_v5  ;;  %v4279_v5 = vld [vmem:[%s6260_s0 + $0x214] sm:$0xf0] }
 0x1fb   :  { %v1375_v43 = vmax.f32 %v1195_v37, 0.0  ;;  %v1719_v44 = vadd.f32 %v4819_v45, %v1718_v38  ;;  %v4277_v37 = vld [vmem:[%s6260_s0 + $0x204] sm:$0xf0] }
 0x1fc   :  { %v5083_v48 = vpop.f32.mrf.mxu3 }
 0x1fd   :  { %v1451_v50 = vpack.c.bf16 %v1375_v43, %v1374_v42  ;;  %v1926_v51 = vmax.f32 %v1719_v44, 0.0  ;;  %v4278_v42 = vld [vmem:[%s6260_s0 + $0x214] sm:$0xf]  ;;  %v3611_v43 = vld [vmem:[%s6260_s0 + $0x218] sm:$0xf0] }
 0x1fe   :  { %v943_v53 = vpop.f32.mrf.mxu0 }
 0x1ff   :  { %v2011_v56 = vpack.c.bf16 %v1926_v51, %v1925_v49  ;;  %3861 = vmatmul.msk.bf16.gmra.mxu2 %vm1499_vm1, %v1451_v50  ;;  %v1202_v57 = vpop.f32.mrf.mxu1  ;;  %v944_v59 = vadd.f32 %v5063_v29, %v943_v53  ;;  %v3602_v50 = vor.u32 %v4277_v37, %v3601_v36  ;;  %v5159_v36 = vld [vmem:[%s6267_s7] ss:$0 sm:$0xff] }
 0x201   :  { %982 = vmatmul.bf16.gmra.mxu0 %v3586_v52  ;;  %3917 = vmatmul.msk.bf16.gmra.mxu3 %vm676_vm0, %v2011_v56  ;;  %v1198_v62 = vadd.f32 %v1197_v26, %v944_v59  ;;  %v3614_v52 = vor.u32 %v4278_v42, %v3611_v43 }
 0x202   :  { %v1721_v58 = vpop.f32.mrf.mxu2  ;;  %3814 = vmatmul.msk.bf16.gmra.mxu1 %vm676_vm0, %v3598_v54 }
 0x203   :  { %v1722_v1 = vadd.f32 %v4819_v45, %v1721_v58  ;;  %v1376_v7 = vmax.f32 %v1198_v62, 0.0 }
 0x204   :  { %v5089_v60 = vpop.f32.mrf.mxu3 }
 0x205   :  { %v1927_v15 = vmax.f32 %v1722_v1, 0.0 }
 0x206   :  { %v945_v61 = vpop.f32.mrf.mxu0 }
 0x207   :  { %v946_v63 = vadd.f32 %v5063_v29, %v945_v61  ;;  %v1204_v0 = vpop.f32.mrf.mxu1 }
 0x209   :  { %v1200_v3 = vadd.f32 %v1199_v35, %v946_v63 }
 0x20a   :  { %v1723_v4 = vpop.f32.mrf.mxu2 }
 0x20b   :  { %v1377_v8 = vmax.f32 %v1200_v3, 0.0  ;;  %v1724_v9 = vadd.f32 %v4819_v45, %v1723_v4  ;;  %v3609_v4 = vld [vmem:[%s6260_s0 + $0x210] sm:$0xf] }
 0x20c   :  { %v5106_v14 = vpop.f32.mrf.mxu3 }
 0x20d   :  { %v1452_v16 = vpack.c.bf16 %v1377_v8, %v1376_v7  ;;  %v1928_v10 = vmax.f32 %v1724_v9, 0.0  ;;  %v4280_v9 = vld [vmem:[%s6260_s0 + $0x224] sm:$0xf] }
 0x20e   :  { %v948_v19 = vpop.f32.mrf.mxu0 }
 0x20f   :  { %v2012_v21 = vpack.c.bf16 %v1928_v10, %v1927_v15  ;;  %3862 = vmatmul.msk.bf16.gmra.mxu2 %vm1499_vm1, %v1452_v16  ;;  %v1207_v22 = vpop.f32.mrf.mxu1  ;;  %v949_v24 = vadd.f32 %v5063_v29, %v948_v19 }
 0x211   :  { %987 = vmatmul.bf16.gmra.mxu0 %v3594_v17  ;;  %3918 = vmatmul.msk.bf16.gmra.mxu3 %vm676_vm0, %v2012_v21  ;;  %v1203_v27 = vadd.f32 %v1202_v57, %v949_v24  ;;  %v3610_v17 = vor.u32 %v4279_v5, %v3609_v4 }
 0x212   :  { %v1726_v23 = vpop.f32.mrf.mxu2  ;;  %3815 = vmatmul.msk.bf16.gmra.mxu1 %vm676_vm0, %v3606_v20  ;;  %v3622_v20 = vor.u32 %v4280_v9, %v3619_v11  ;;  %v2263_v9 = vadd.f32 %v5159_v36, %v5106_v14  ;;  %v2261_v14 = vadd.f32 %v5159_v36, %v5089_v60  ;;  %v4284_v60 = vld [vmem:[%s6260_s0 + $0x244] sm:$0xf] }
 0x213   :  { %v1727_v33 = vadd.f32 %v4819_v45, %v1726_v23  ;;  %v1378_v38 = vmax.f32 %v1203_v27, 0.0 }
 0x214   :  { %v5112_v25 = vpop.f32.mrf.mxu3 }
 0x215   :  { %v1929_v46 = vmax.f32 %v1727_v33, 0.0 }
 0x216   :  { %v950_v26 = vpop.f32.mrf.mxu0 }
 0x217   :  { %v951_v30 = vadd.f32 %v5063_v29, %v950_v26  ;;  %v1209_v32 = vpop.f32.mrf.mxu1 }
 0x219   :  { %v1205_v34 = vadd.f32 %v1204_v0, %v951_v30 }
 0x21a   :  { %v1728_v35 = vpop.f32.mrf.mxu2 }
 0x21b   :  { %v1379_v40 = vmax.f32 %v1205_v34, 0.0  ;;  %v1729_v41 = vadd.f32 %v4819_v45, %v1728_v35 }
 0x21c   :  { %v5129_v44 = vpop.f32.mrf.mxu3 }
 0x21d   :  { %v1453_v47 = vpack.c.bf16 %v1379_v40, %v1378_v38  ;;  %v1930_v49 = vmax.f32 %v1729_v41, 0.0  ;;  %v3617_v38 = vld [vmem:[%s6260_s0 + $0x220] sm:$0xf]  ;;  %v4281_v40 = vld [vmem:[%s6260_s0 + $0x224] sm:$0xf0]  ;;  %v2268_v4 = vadd.f32 %v5159_v36, %v5129_v44 }
 0x21e   :  { %v953_v51 = vpop.f32.mrf.mxu0 }
 0x21f   :  { %v2013_v53 = vpack.c.bf16 %v1930_v49, %v1929_v46  ;;  %3863 = vmatmul.msk.bf16.gmra.mxu2 %vm1499_vm1, %v1453_v47  ;;  %v1212_v54 = vpop.f32.mrf.mxu1  ;;  %v954_v57 = vadd.f32 %v5063_v29, %v953_v51  ;;  %v4282_v46 = vld [vmem:[%s6260_s0 + $0x234] sm:$0xf]  ;;  %v3627_v47 = vld [vmem:[%s6260_s0 + $0x238] sm:$0xf0]  ;;  %v2496_v44 = vmax.f32 %v2268_v4, 0.0 }
 0x221   :  { %3919 = vmatmul.msk.bf16.gmra.mxu3 %vm676_vm0, %v2013_v53  ;;  %992 = vmatmul.bf16.gmra.mxu0 %v3602_v50  ;;  %v1208_v61 = vadd.f32 %v1207_v22, %v954_v57  ;;  %v3618_v57 = vor.u32 %v4281_v40, %v3617_v38  ;;  %v2256_v38 = vadd.f32 %v5159_v36, %v5066_v31  ;;  %v2493_v40 = vmax.f32 %v2261_v14, 0.0 }
 0x222   :  { %v1731_v56 = vpop.f32.mrf.mxu2  ;;  %3816 = vmatmul.msk.bf16.gmra.mxu1 %vm676_vm0, %v3614_v52 }
 0x223   :  { %v1732_v0 = vadd.f32 %v4819_v45, %v1731_v56  ;;  %v1380_v6 = vmax.f32 %v1208_v61, 0.0 }
 0x224   :  { %v2270_v58 = vpop.f32.mrf.mxu3 }
 0x225   :  { %v1931_v15 = vmax.f32 %v1732_v0, 0.0  ;;  %v2271_v0 = vadd.f32 %v5159_v36, %v2270_v58  ;;  %v2266_v58 = vadd.f32 %v5159_v36, %v5112_v25 }
 0x226   :  { %v955_v59 = vpop.f32.mrf.mxu0 }
 0x227   :  { %v956_v62 = vadd.f32 %v5063_v29, %v955_v59  ;;  %v1214_v63 = vpop.f32.mrf.mxu1  ;;  %v3630_v59 = vor.u32 %v4282_v46, %v3627_v47  ;;  %v2253_v47 = vadd.f32 %v5159_v36, %v5055_v18 }
 0x229   :  { %v1210_v1 = vadd.f32 %v1209_v32, %v956_v62 }
 0x22a   :  { %v1733_v3 = vpop.f32.mrf.mxu2 }
 0x22b   :  { %v1381_v7 = vmax.f32 %v1210_v1, 0.0  ;;  %v1734_v8 = vadd.f32 %v4819_v45, %v1733_v3 }
 0x22c   :  { %v2272_v12 = vpop.f32.mrf.mxu3 }
 0x22d   :  { %v1454_v16 = vpack.c.bf16 %v1381_v7, %v1380_v6  ;;  %v1932_v10 = vmax.f32 %v1734_v8, 0.0  ;;  %v2497_v8 = vmax.f32 %v2271_v0, 0.0 }
 0x22e   :  { %v958_v19 = vpop.f32.mrf.mxu0 }
 0x22f   :  { %v2014_v21 = vpack.c.bf16 %v1932_v10, %v1931_v15  ;;  %3864 = vmatmul.msk.bf16.gmra.mxu2 %vm1499_vm1, %v1454_v16  ;;  %v1217_v22 = vpop.f32.mrf.mxu1  ;;  %v959_v24 = vadd.f32 %v5063_v29, %v958_v19  ;;  %v2495_v10 = vmax.f32 %v2266_v58, 0.0  ;;  %v3633_v58 = vld [vmem:[%s6260_s0 + $0x240] sm:$0xf] }
 0x231   :  { %3920 = vmatmul.msk.bf16.gmra.mxu3 %vm676_vm0, %v2014_v21  ;;  %997 = vmatmul.bf16.gmra.mxu0 %v3610_v17  ;;  %v1213_v30 = vadd.f32 %v1212_v54, %v959_v24  ;;  %v5196_v17 = vld [vmem:[%s6265_s5] ss:$0 sm:$0xff]  ;;  %v2494_v21 = vmax.f32 %v2263_v9, 0.0 }
 0x232   :  { %v1736_v23 = vpop.f32.mrf.mxu2  ;;  %3817 = vmatmul.msk.bf16.gmra.mxu1 %vm676_vm0, %v3622_v20 }
 0x233   :  { %v1737_v34 = vadd.f32 %v4819_v45, %v1736_v23  ;;  %v1382_v41 = vmax.f32 %v1213_v30, 0.0  ;;  %v2258_v30 = vadd.f32 %v5159_v36, %v5083_v48 }
 0x234   :  { %v2275_v26 = vpop.f32.mrf.mxu3 }
 0x235   :  { %v1933_v49 = vmax.f32 %v1737_v34, 0.0  ;;  %v2276_v51 = vadd.f32 %v5159_v36, %v2275_v26  ;;  %v3625_v26 = vld [vmem:[%s6260_s0 + $0x230] sm:$0xf] }
 0x236   :  { %v960_v27 = vpop.f32.mrf.mxu0 }
 0x237   :  { %v961_v32 = vadd.f32 %v5063_v29, %v960_v27  ;;  %v1219_v33 = vpop.f32.mrf.mxu1  ;;  %v2499_v1 = vmax.f32 %v2276_v51, 0.0  ;;  %v4283_v27 = vld [vmem:[%s6260_s0 + $0x234] sm:$0xf0]  ;;  %v2491_v51 = vmax.f32 %v2256_v38, 0.0 }
 0x238   :  { %v3626_v48 = vor.u32 %v4283_v27, %v3625_v26 }
 0x239   :  { %v1215_v35 = vadd.f32 %v1214_v63, %v961_v32 }
 0x23a   :  { %v1738_v37 = vpop.f32.mrf.mxu2 }
 0x23b   :  { %v1383_v42 = vmax.f32 %v1215_v35, 0.0  ;;  %v1739_v43 = vadd.f32 %v4819_v45, %v1738_v37  ;;  %v2273_v45 = vadd.f32 %v5159_v36, %v2272_v12 }
 0x23c   :  { %v2277_v50 = vpop.f32.mrf.mxu3 }
 0x23d   :  { %v1455_v52 = vpack.c.bf16 %v1383_v42, %v1382_v41  ;;  %v1934_v53 = vmax.f32 %v1739_v43, 0.0  ;;  %v2278_v54 = vadd.f32 %v5159_v36, %v2277_v50  ;;  %v2498_v6 = vmax.f32 %v2273_v45, 0.0 }
 0x23e   :  { %v963_v56 = vpop.f32.mrf.mxu0  ;;  %v2251_v50 = vadd.f32 %v5159_v36, %v5038_v2 }
 0x23f   :  { %v2015_v61 = vpack.c.bf16 %v1934_v53, %v1933_v49  ;;  %3865 = vmatmul.msk.bf16.gmra.mxu2 %vm1499_vm1, %v1455_v52  ;;  %v2500_v62 = vmax.f32 %v2278_v54, 0.0  ;;  %v5178_v63 = vpop.f32.mrf.mxu1  ;;  %v964_v5 = vadd.f32 %v5063_v29, %v963_v56  ;;  %v2492_v49 = vmax.f32 %v2258_v30, 0.0 }
 0x240   :  { %v2248_v53 = vadd.f32 %v5159_v36, %v5032_v55  ;;  %v2490_v54 = vmax.f32 %v2253_v47, 0.0  ;;  %v2246_v56 = vadd.f32 %v5159_v36, %v5015_v39 }
 0x241   :  { %3921 = vmatmul.msk.bf16.gmra.mxu3 %vm676_vm0, %v2015_v61  ;;  %2604 = vmatpush.msrb.mxu2 %v2500_v62  ;;  %v1218_v12 = vadd.f32 %v1217_v22, %v964_v5  ;;  %v2243_v62 = vadd.f32 %v5159_v36, %v5009_v28  ;;  %v4285_v28 = vld [vmem:[%s6260_s0 + $0x244] sm:$0xf0] }
 0x242   :  { %v1741_v3 = vpop.f32.mrf.mxu2  ;;  %1002 = vmatmul.bf16.gmra.mxu0 %v3618_v57  ;;  %3818 = vmatmul.msk.bf16.gmra.mxu1 %vm676_vm0, %v3630_v59  ;;  %v2489_v57 = vmax.f32 %v2251_v50, 0.0  ;;  %v2488_v55 = vmax.f32 %v2248_v53, 0.0  ;;  %v2487_v39 = vmax.f32 %v2246_v56, 0.0 }
 0x243   :  { %2605 = vmatpush.msrb.mxu2 %v2499_v1  ;;  %v1742_v25 = vadd.f32 %v5196_v17, %v1741_v3  ;;  %v1384_v22 = vmax.f32 %v1218_v12, 0.0  ;;  %v2241_v3 = vadd.f32 %v5159_v36, %v4992_v13  ;;  %v2486_v9 = vmax.f32 %v2243_v62, 0.0  ;;  %v4286_v13 = vld [vmem:[%s6260_s0 + $0x254] sm:$0xf] }
 0x244   :  { %v5186_v7 = vpop.f32.mrf.mxu3 }
 0x245   :  { %2606 = vmatpush.msrb.mxu2 %v2498_v6  ;;  %v1935_v34 = vmax.f32 %v1742_v25, 0.0  ;;  %v3634_v25 = vor.u32 %v4285_v28, %v3633_v58  ;;  %v3659_v58 = vld [vmem:[%s6260_s0 + $0x278] sm:$0xf0] }
 0x246   :  { %v965_v11 = vpop.f32.mrf.mxu0 }
 0x247   :  { %v966_v15 = vadd.f32 %v5063_v29, %v965_v11  ;;  %2607 = vmatpush.msrb.mxu2 %v2497_v8  ;;  %v1224_v16 = vpop.f32.mrf.mxu1  ;;  %v3643_v11 = vld [vmem:[%s6260_s0 + $0x258] sm:$0xf0] }
 0x249   :  { %v1220_v19 = vadd.f32 %v1219_v33, %v966_v15  ;;  %2608 = vmatpush.msrb.mxu2 %v2496_v44  ;;  %v3635_v33 = vld [vmem:[%s6260_s0 + $0x248] sm:$0xf0] }
 0x24a   :  { %v1743_v20 = vpop.f32.mrf.mxu2  ;;  %v3638_v46 = vor.u32 %v4284_v60, %v3635_v33 }
 0x24b   :  { %v1385_v23 = vmax.f32 %v1220_v19, 0.0  ;;  %v1744_v24 = vadd.f32 %v5196_v17, %v1743_v20  ;;  %2609 = vmatpush.msrb.mxu2 %v2495_v10  ;;  %v3646_v20 = vor.u32 %v4286_v13, %v3643_v11 }
 0x24c   :  { %v5210_v32 = vpop.f32.mrf.mxu3 }
 0x24d   :  { %v1456_v35 = vpack.c.bf16 %v1385_v23, %v1384_v22  ;;  %v1936_v37 = vmax.f32 %v1744_v24, 0.0  ;;  %2610 = vmatpush.msrb.mxu2 %v2494_v21 }
 0x24e   :  { %v968_v41 = vpop.f32.mrf.mxu0 }
 0x24f   :  { %v2016_v42 = vpack.c.bf16 %v1936_v37, %v1935_v34  ;;  %3866 = vmatmul.msk.bf16.gmra.mxu2 %vm1499_vm1, %v1456_v35  ;;  %v1227_v43 = vpop.f32.mrf.mxu1  ;;  %v969_v52 = vadd.f32 %v5063_v29, %v968_v41  ;;  %v4287_v41 = vld [vmem:[%s6260_s0 + $0x254] sm:$0xf0] }
 0x250   :  { %2611 = vmatpush.msrb.mxu2 %v2493_v40  ;;  %v3641_v40 = vld [vmem:[%s6260_s0 + $0x250] sm:$0xf] }
 0x251   :  { %3922 = vmatmul.msk.bf16.gmra.mxu3 %vm676_vm0, %v2016_v42  ;;  %v1223_v59 = vadd.f32 %v5178_v63, %v969_v52  ;;  %v4288_v42 = vld [vmem:[%s6260_s0 + $0x264] sm:$0xf] }
 0x252   :  { %2612 = vmatpush.msrb.mxu2 %v2492_v49  ;;  %v1746_v31 = vpop.f32.mrf.mxu2  ;;  %1007 = vmatmul.bf16.gmra.mxu0 %v3626_v48 }
 0x253   :  { %3819 = vmatmul.msk.bf16.gmra.mxu1 %vm676_vm0, %v3638_v46  ;;  %v1747_v0 = vadd.f32 %v5196_v17, %v1746_v31  ;;  %v1386_v5 = vmax.f32 %v1223_v59, 0.0 }
 0x254   :  { %2613 = vmatpush.msrb.mxu2 %v2491_v51  ;;  %v5230_v18 = vpop.f32.mrf.mxu3  ;;  %v3642_v51 = vor.u32 %v4287_v41, %v3641_v40  ;;  %v3667_v40 = vld [vmem:[%s6260_s0 + $0x288] sm:$0xf0] }
 0x255   :  { %v1937_v12 = vmax.f32 %v1747_v0, 0.0 }
 0x256   :  { %2614 = vmatpush.msrb.mxu2 %v2490_v54  ;;  %v970_v2 = vpop.f32.mrf.mxu0 }
 0x257   :  { %v971_v45 = vadd.f32 %v5063_v29, %v970_v2  ;;  %v1229_v61 = vpop.f32.mrf.mxu1 }
 0x258   :  { %2615 = vmatpush.msrb.mxu2 %v2489_v57 }
 0x259   :  { %v1225_v1 = vadd.f32 %v1224_v16, %v971_v45  ;;  %v2485_v16 = vmax.f32 %v2241_v3, 0.0 }
 0x25a   :  { %2616 = vmatpush.msrb.mxu2 %v2488_v55  ;;  %v1748_v4 = vpop.f32.mrf.mxu2 }
 0x25b   :  { %v1387_v6 = vmax.f32 %v1225_v1, 0.0  ;;  %v1749_v63 = vadd.f32 %v5196_v17, %v1748_v4  ;;  %v3649_v4 = vld [vmem:[%s6260_s0 + $0x260] sm:$0xf] }
 0x25c   :  { %2617 = vmatpush.msrb.mxu2 %v2487_v39  ;;  %v5248_v8 = vpop.f32.mrf.mxu3 }
 0x25d   :  { %v1457_v15 = vpack.c.bf16 %v1387_v6, %v1386_v5  ;;  %v1938_v44 = vmax.f32 %v1749_v63, 0.0  ;;  %v4289_v5 = vld [vmem:[%s6260_s0 + $0x264] sm:$0xf0]  ;;  %v4290_v63 = vld [vmem:[%s6260_s0 + $0x274] sm:$0xf] }
 0x25e   :  { %2618 = vmatpush.msrb.mxu2 %v2486_v9  ;;  %v973_v10 = vpop.f32.mrf.mxu0 }
 0x25f   :  { %v2017_v19 = vpack.c.bf16 %v1938_v44, %v1937_v12  ;;  %3867 = vmatmul.msk.bf16.gmra.mxu2 %vm1499_vm1, %v1457_v15  ;;  %v1232_v14 = vpop.f32.mrf.mxu1  ;;  %v974_v22 = vadd.f32 %v5063_v29, %v973_v10  ;;  %v3650_v12 = vor.u32 %v4289_v5, %v3649_v4  ;;  %v4294_v5 = vld [vmem:[%s6260_s0 + $0x294] sm:$0xf] }
 0x260   :  { %2619 = vmatpush.msrb.mxu2 %v2485_v16  ;;  %v3662_v16 = vor.u32 %v4290_v63, %v3659_v58  ;;  %v3675_v63 = vld [vmem:[%s6260_s0 + $0x298] sm:$0xf0] }
 0x261   :  { %3923 = vmatmul.msk.bf16.gmra.mxu3 %vm676_vm0, %v2017_v19  ;;  %v1228_v26 = vadd.f32 %v1227_v43, %v974_v22  ;;  %v3651_v43 = vld [vmem:[%s6260_s0 + $0x268] sm:$0xf0] }
 0x262   :  { %v1751_v21 = vpop.f32.mrf.mxu2  ;;  %1012 = vmatmul.bf16.gmra.mxu0 %v3634_v25  ;;  %v3654_v53 = vor.u32 %v4288_v42, %v3651_v43 }
 0x263   :  { %3820 = vmatmul.msk.bf16.gmra.mxu1 %vm676_vm0, %v3646_v20  ;;  %v1752_v60 = vadd.f32 %v5196_v17, %v1751_v21  ;;  %v1388_v35 = vmax.f32 %v1228_v26, 0.0 }
 0x264   :  { %v5260_v23 = vpop.f32.mrf.mxu3 }
 0x265   :  { %v1939_v46 = vmax.f32 %v1752_v60, 0.0 }
 0x266   :  { %v975_v24 = vpop.f32.mrf.mxu0 }
 0x267   :  { %v976_v27 = vadd.f32 %v5063_v29, %v975_v24  ;;  %v1234_v30 = vpop.f32.mrf.mxu1 }
 0x269   :  { %v1230_v33 = vadd.f32 %v1229_v61, %v976_v27 }
 0x26a   :  { %v1753_v34 = vpop.f32.mrf.mxu2 }
 0x26b   :  { %v1389_v37 = vmax.f32 %v1230_v33, 0.0  ;;  %v1754_v38 = vadd.f32 %v5196_v17, %v1753_v34  ;;  %v3657_v34 = vld [vmem:[%s6260_s0 + $0x270] sm:$0xf] }
 0x26c   :  { %v5271_v48 = vpop.f32.mrf.mxu3 }
 0x26d   :  { %v1458_v47 = vpack.c.bf16 %v1389_v37, %v1388_v35  ;;  %v1940_v49 = vmax.f32 %v1754_v38, 0.0  ;;  %v4291_v35 = vld [vmem:[%s6260_s0 + $0x274] sm:$0xf0]  ;;  %v4292_v38 = vld [vmem:[%s6260_s0 + $0x284] sm:$0xf] }
 0x26e   :  { %v978_v50 = vpop.f32.mrf.mxu0 }
 0x26f   :  { %v2018_v31 = vpack.c.bf16 %v1940_v49, %v1939_v46  ;;  %3868 = vmatmul.msk.bf16.gmra.mxu2 %vm1499_vm1, %v1458_v47  ;;  %v1237_v52 = vpop.f32.mrf.mxu1  ;;  %v979_v56 = vadd.f32 %v5063_v29, %v978_v50  ;;  %v3658_v47 = vor.u32 %v4291_v35, %v3657_v34  ;;  %v3673_v34 = vld [vmem:[%s6260_s0 + $0x290] sm:$0xf]  ;;  %v4295_v35 = vld [vmem:[%s6260_s0 + $0x294] sm:$0xf0] }
 0x271   :  { %3924 = vmatmul.msk.bf16.gmra.mxu3 %vm676_vm0, %v2018_v31  ;;  %v1233_v59 = vadd.f32 %v1232_v14, %v979_v56 }
 0x272   :  { %v1756_v54 = vpop.f32.mrf.mxu2  ;;  %1017 = vmatmul.bf16.gmra.mxu0 %v3642_v51  ;;  %v3670_v51 = vor.u32 %v4292_v38, %v3667_v40  ;;  %v4296_v40 = vld [vmem:[%s6260_s0 + $0x2a4] sm:$0xf] }
 0x273   :  { %3821 = vmatmul.msk.bf16.gmra.mxu1 %vm676_vm0, %v3654_v53  ;;  %v1757_v62 = vadd.f32 %v5196_v17, %v1756_v54  ;;  %v1390_v1 = vmax.f32 %v1233_v59, 0.0 }
 0x274   :  { %v5283_v57 = vpop.f32.mrf.mxu3 }
 0x275   :  { %v1941_v28 = vmax.f32 %v1757_v62, 0.0 }
 0x276   :  { %v980_v2 = vpop.f32.mrf.mxu0 }
 0x277   :  { %v981_v45 = vadd.f32 %v5063_v29, %v980_v2  ;;  %v1239_v61 = vpop.f32.mrf.mxu1 }
 0x279   :  { %v1235_v55 = vadd.f32 %v1234_v30, %v981_v45 }
 0x27a   :  { %v1758_v0 = vpop.f32.mrf.mxu2 }
 0x27b   :  { %v1391_v3 = vmax.f32 %v1235_v55, 0.0  ;;  %v1759_v39 = vadd.f32 %v5196_v17, %v1758_v0 }
 0x27c   :  { %v5294_v6 = vpop.f32.mrf.mxu3 }
 0x27d   :  { %v1459_v9 = vpack.c.bf16 %v1391_v3, %v1390_v1  ;;  %v1942_v13 = vmax.f32 %v1759_v39, 0.0  ;;  %v3665_v3 = vld [vmem:[%s6260_s0 + $0x280] sm:$0xf]  ;;  %v4293_v39 = vld [vmem:[%s6260_s0 + $0x284] sm:$0xf0] }
 0x27e   :  { %v983_v11 = vpop.f32.mrf.mxu0 }
 0x27f   :  { %v2019_v15 = vpack.c.bf16 %v1942_v13, %v1941_v28  ;;  %3869 = vmatmul.msk.bf16.gmra.mxu2 %vm1499_vm1, %v1459_v9  ;;  %v1242_v44 = vpop.f32.mrf.mxu1  ;;  %v984_v25 = vadd.f32 %v5063_v29, %v983_v11  ;;  %v3666_v11 = vor.u32 %v4293_v39, %v3665_v3 }
 0x281   :  { %3925 = vmatmul.msk.bf16.gmra.mxu3 %vm676_vm0, %v2019_v15  ;;  %v1238_v20 = vadd.f32 %v1237_v52, %v984_v25 }
 0x282   :  { %v1761_v10 = vpop.f32.mrf.mxu2  ;;  %1022 = vmatmul.bf16.gmra.mxu0 %v3650_v12 }
 0x283   :  { %3822 = vmatmul.msk.bf16.gmra.mxu1 %vm676_vm0, %v3662_v16  ;;  %v1762_v24 = vadd.f32 %v5196_v17, %v1761_v10  ;;  %v1392_v30 = vmax.f32 %v1238_v20, 0.0 }
 0x284   :  { %v5306_v19 = vpop.f32.mrf.mxu3 }
 0x285   :  { %v1943_v41 = vmax.f32 %v1762_v24, 0.0 }
 0x286   :  { %v985_v14 = vpop.f32.mrf.mxu0 }
 0x287   :  { %v986_v21 = vadd.f32 %v5063_v29, %v985_v14  ;;  %v1244_v22 = vpop.f32.mrf.mxu1 }
 0x289   :  { %v1240_v26 = vadd.f32 %v1239_v61, %v986_v21 }
 0x28a   :  { %v1763_v27 = vpop.f32.mrf.mxu2 }
 0x28b   :  { %v1393_v60 = vmax.f32 %v1240_v26, 0.0  ;;  %v1764_v33 = vadd.f32 %v5196_v17, %v1763_v27 }
 0x28c   :  { %v5317_v37 = vpop.f32.mrf.mxu3 }
 0x28d   :  { %v1460_v42 = vpack.c.bf16 %v1393_v60, %v1392_v30  ;;  %v1944_v43 = vmax.f32 %v1764_v33, 0.0 }
 0x28e   :  { %v988_v46 = vpop.f32.mrf.mxu0 }
 0x28f   :  { %v2020_v49 = vpack.c.bf16 %v1944_v43, %v1943_v41  ;;  %3870 = vmatmul.msk.bf16.gmra.mxu2 %vm1499_vm1, %v1460_v42  ;;  %v1247_v50 = vpop.f32.mrf.mxu1  ;;  %v989_v52 = vadd.f32 %v5063_v29, %v988_v46  ;;  %v3683_v41 = vld [vmem:[%s6260_s0 + $0x2a8] sm:$0xf0] }
 0x291   :  { %3926 = vmatmul.msk.bf16.gmra.mxu3 %vm676_vm0, %v2020_v49  ;;  %v1243_v56 = vadd.f32 %v1242_v44, %v989_v52  ;;  %v3678_v44 = vor.u32 %v4294_v5, %v3675_v63  ;;  %v3674_v49 = vor.u32 %v4295_v35, %v3673_v34  ;;  %v3681_v5 = vld [vmem:[%s6260_s0 + $0x2a0] sm:$0xf]  ;;  %v4297_v63 = vld [vmem:[%s6260_s0 + $0x2a4] sm:$0xf0] }
 0x292   :  { %v1766_v31 = vpop.f32.mrf.mxu2  ;;  %1027 = vmatmul.bf16.gmra.mxu0 %v3658_v47 }
 0x293   :  { %3823 = vmatmul.msk.bf16.gmra.mxu1 %vm676_vm0, %v3670_v51  ;;  %v1767_v45 = vadd.f32 %v5196_v17, %v1766_v31  ;;  %v1394_v55 = vmax.f32 %v1243_v56, 0.0  ;;  %v3686_v31 = vor.u32 %v4296_v40, %v3683_v41  ;;  %v2303_v40 = vadd.f32 %v5159_v36, %v5317_v37 }
 0x294   :  { %v5329_v53 = vpop.f32.mrf.mxu3  ;;  %v2298_v37 = vadd.f32 %v5159_v36, %v5294_v6  ;;  %v2296_v6 = vadd.f32 %v5159_v36, %v5283_v57 }
 0x295   :  { %v1945_v58 = vmax.f32 %v1767_v45, 0.0 }
 0x296   :  { %v990_v54 = vpop.f32.mrf.mxu0 }
 0x297   :  { %v991_v2 = vadd.f32 %v5063_v29, %v990_v54  ;;  %v1249_v59 = vpop.f32.mrf.mxu1 }
 0x299   :  { %v1245_v61 = vadd.f32 %v1244_v22, %v991_v2 }
 0x29a   :  { %v1768_v62 = vpop.f32.mrf.mxu2 }
 0x29b   :  { %v1395_v0 = vmax.f32 %v1245_v61, 0.0  ;;  %v1769_v1 = vadd.f32 %v5196_v17, %v1768_v62 }
 0x29c   :  { %v5340_v4 = vpop.f32.mrf.mxu3 }
 0x29d   :  { %v1461_v28 = vpack.c.bf16 %v1395_v0, %v1394_v55  ;;  %v1946_v9 = vmax.f32 %v1769_v1, 0.0 }
 0x29e   :  { %v993_v13 = vpop.f32.mrf.mxu0 }
 0x29f   :  { %v2021_v12 = vpack.c.bf16 %v1946_v9, %v1945_v58  ;;  %3871 = vmatmul.msk.bf16.gmra.mxu2 %vm1499_vm1, %v1461_v28  ;;  %v1252_v15 = vpop.f32.mrf.mxu1  ;;  %v994_v10 = vadd.f32 %v5063_v29, %v993_v13 }
 0x2a1   :  { %3927 = vmatmul.msk.bf16.gmra.mxu3 %vm676_vm0, %v2021_v12  ;;  %v1248_v20 = vadd.f32 %v1247_v50, %v994_v10 }
 0x2a2   :  { %v1771_v16 = vpop.f32.mrf.mxu2  ;;  %1032 = vmatmul.bf16.gmra.mxu0 %v3666_v11 }
 0x2a3   :  { %3824 = vmatmul.msk.bf16.gmra.mxu1 %vm676_vm0, %v3678_v44  ;;  %v1772_v24 = vadd.f32 %v5196_v17, %v1771_v16  ;;  %v1396_v60 = vmax.f32 %v1248_v20, 0.0  ;;  %v3691_v44 = vld [vmem:[%s6260_s0 + $0x2b8] sm:$0xf0]  ;;  %v3682_v16 = vor.u32 %v4297_v63, %v3681_v5  ;;  %v2508_v63 = vmax.f32 %v2298_v37, 0.0 }
 0x2a4   :  { %v2310_v25 = vpop.f32.mrf.mxu3 }
 0x2a5   :  { %v1947_v42 = vmax.f32 %v1772_v24, 0.0 }
 0x2a6   :  { %v995_v14 = vpop.f32.mrf.mxu0 }
 0x2a7   :  { %v996_v21 = vadd.f32 %v5063_v29, %v995_v14  ;;  %v1254_v22 = vpop.f32.mrf.mxu1 }
 0x2a9   :  { %v1250_v26 = vadd.f32 %v1249_v59, %v996_v21 }
 0x2aa   :  { %v1773_v27 = vpop.f32.mrf.mxu2 }
 0x2ab   :  { %v1774_v30 = vadd.f32 %v5196_v17, %v1773_v27  ;;  %v1397_v33 = vmax.f32 %v1250_v26, 0.0  ;;  %v2311_v26 = vadd.f32 %v5159_v36, %v2310_v25  ;;  %v2306_v25 = vadd.f32 %v5159_v36, %v5329_v53 }
 0x2ac   :  { %v2312_v38 = vpop.f32.mrf.mxu3 }
 0x2ad   :  { %v1948_v43 = vmax.f32 %v1774_v30, 0.0  ;;  %v1462_v46 = vpack.c.bf16 %v1397_v33, %v1396_v60  ;;  %v2313_v10 = vadd.f32 %v5159_v36, %v2312_v38  ;;  %v2308_v60 = vadd.f32 %v5159_v36, %v5340_v4 }
 0x2ae   :  { %v998_v47 = vpop.f32.mrf.mxu0  ;;  %v2513_v38 = vmax.f32 %v2311_v26, 0.0 }
 0x2af   :  { %v2022_v50 = vpack.c.bf16 %v1948_v43, %v1947_v42  ;;  %3872 = vmatmul.msk.bf16.gmra.mxu2 %vm1499_vm1, %v1462_v46  ;;  %v1257_v51 = vpop.f32.mrf.mxu1  ;;  %v999_v54 = vadd.f32 %v5063_v29, %v998_v47  ;;  %v2514_v33 = vmax.f32 %v2313_v10, 0.0  ;;  %v2512_v41 = vmax.f32 %v2308_v60, 0.0 }
 0x2b0   :  { %v2301_v43 = vadd.f32 %v5159_v36, %v5306_v19  ;;  %v3689_v19 = vld [vmem:[%s6260_s0 + $0x2b0] sm:$0xf]  ;;  %v2283_v10 = vadd.f32 %v5159_v36, %v5210_v32 }
 0x2b1   :  { %3928 = vmatmul.msk.bf16.gmra.mxu3 %vm676_vm0, %v2022_v50  ;;  %v1253_v59 = vadd.f32 %v1252_v15, %v999_v54  ;;  %v4298_v15 = vld [vmem:[%s6260_s0 + $0x2b4] sm:$0xf]  ;;  %v2510_v54 = vmax.f32 %v2303_v40, 0.0 }
 0x2b2   :  { %v1776_v52 = vpop.f32.mrf.mxu2  ;;  %1037 = vmatmul.bf16.gmra.mxu0 %v3674_v49  ;;  %v3694_v24 = vor.u32 %v4298_v15, %v3691_v44  ;;  %v2511_v49 = vmax.f32 %v2306_v25, 0.0 }
 0x2b3   :  { %3825 = vmatmul.msk.bf16.gmra.mxu1 %vm676_vm0, %v3686_v31  ;;  %v1777_v62 = vadd.f32 %v5196_v17, %v1776_v52  ;;  %v1398_v3 = vmax.f32 %v1253_v59, 0.0 }
 0x2b4   :  { %v2315_v56 = vpop.f32.mrf.mxu3 }
 0x2b5   :  { %v1949_v58 = vmax.f32 %v1777_v62, 0.0  ;;  %v2316_v9 = vadd.f32 %v5159_v36, %v2315_v56  ;;  %v2509_v56 = vmax.f32 %v2301_v43, 0.0 }
 0x2b6   :  { %v1000_v2 = vpop.f32.mrf.mxu0 }
 0x2b7   :  { %v1001_v45 = vadd.f32 %v5063_v29, %v1000_v2  ;;  %v1259_v61 = vpop.f32.mrf.mxu1  ;;  %v2515_v27 = vmax.f32 %v2316_v9, 0.0  ;;  %v2291_v9 = vadd.f32 %v5159_v36, %v5260_v23  ;;  %v2286_v23 = vadd.f32 %v5159_v36, %v5230_v18 }
 0x2b9   :  { %v1255_v55 = vadd.f32 %v1254_v22, %v1001_v45  ;;  %v2503_v26 = vmax.f32 %v2286_v23, 0.0 }
 0x2ba   :  { %v1778_v0 = vpop.f32.mrf.mxu2 }
 0x2bb   :  { %v1779_v1 = vadd.f32 %v5196_v17, %v1778_v0  ;;  %v1399_v39 = vmax.f32 %v1255_v55, 0.0  ;;  %v4300_v55 = vld [vmem:[%s6260_s0 + $0x2c4] sm:$0xf]  ;;  %v3699_v0 = vld [vmem:[%s6260_s0 + $0x2c8] sm:$0xf0] }
 0x2bc   :  { %v2317_v28 = vpop.f32.mrf.mxu3 }
 0x2bd   :  { %v1950_v13 = vmax.f32 %v1779_v1, 0.0  ;;  %v2318_v11 = vadd.f32 %v5159_v36, %v2317_v28  ;;  %v1463_v12 = vpack.c.bf16 %v1399_v39, %v1398_v3  ;;  %v2293_v39 = vadd.f32 %v5159_v36, %v5271_v48 }
 0x2be   :  { %v3702_v28 = vor.u32 %v4300_v55, %v3699_v0  ;;  %v2288_v48 = vadd.f32 %v5159_v36, %v5248_v8  ;;  %v2281_v8 = vadd.f32 %v5159_v36, %v5186_v7  ;;  %v2502_v36 = vmax.f32 %v2283_v10, 0.0  ;;  %v3697_v7 = vld [vmem:[%s6260_s0 + $0x2c0] sm:$0xf]  ;;  %v4303_v55 = vld [vmem:[%s6260_s0 + $0x2d4] sm:$0xf0] }
 0x2bf   :  { %v2023_v14 = vpack.c.bf16 %v1950_v13, %v1949_v58  ;;  %v2516_v20 = vmax.f32 %v2318_v11, 0.0  ;;  %v1003_v21 = vpop.f32.mrf.mxu0  ;;  %3873 = vmatmul.msk.bf16.gmra.mxu2 %vm1499_vm1, %v1463_v12  ;;  %v5390_v22 = vpop.f32.mrf.mxu1  ;;  %v2507_v13 = vmax.f32 %v2296_v6, 0.0  ;;  %v2506_v12 = vmax.f32 %v2293_v39, 0.0 }
 0x2c0   :  { %v1004_v35 = vadd.f32 %v5063_v29, %v1003_v21 }
 0x2c1   :  { %3929 = vmatmul.msk.bf16.gmra.mxu3 %vm676_vm0, %v2023_v14  ;;  %2627 = vmatpush.msrb.mxu1 %v2516_v20  ;;  %v2504_v14 = vmax.f32 %v2288_v48, 0.0 }
 0x2c2   :  { %v1781_v30 = vpop.f32.mrf.mxu2  ;;  %1042 = vmatmul.bf16.gmra.mxu0 %v3682_v16  ;;  %v1258_v46 = vadd.f32 %v1257_v51, %v1004_v35  ;;  %v4299_v51 = vld [vmem:[%s6260_s0 + $0x2b4] sm:$0xf0]  ;;  %v2505_v16 = vmax.f32 %v2291_v9, 0.0 }
 0x2c3   :  { %2628 = vmatpush.msrb.mxu1 %v2515_v27  ;;  %v1782_v50 = vadd.f32 %v5196_v17, %v1781_v30  ;;  %v3690_v3 = vor.u32 %v4299_v51, %v3689_v19 }
 0x2c4   :  { %v5396_v34 = vpop.f32.mrf.mxu3  ;;  %3826 = vmatmul.msk.bf16.gmra.mxu1 %vm676_vm0, %v3694_v24  ;;  %v1400_v59 = vmax.f32 %v1258_v46, 0.0 }
 0x2c5   :  { %2629 = vmatpush.msrb.mxu1 %v2514_v33  ;;  %v2501_v33 = vmax.f32 %v2281_v8, 0.0 }
 0x2c7   :  { %2630 = vmatpush.msrb.mxu1 %v2513_v38  ;;  %v1005_v42 = vpop.f32.mrf.mxu0  ;;  %v5404_v4 = vpop.f32.mrf.mxu1 }
 0x2c8   :  { %v1006_v47 = vadd.f32 %v5063_v29, %v1005_v42  ;;  %v4302_v42 = vld [vmem:[%s6260_s0 + $0x2d4] sm:$0xf] }
 0x2c9   :  { %2631 = vmatpush.msrb.mxu1 %v2512_v41 }
 0x2ca   :  { %v1783_v53 = vpop.f32.mrf.mxu2  ;;  %v1260_v31 = vadd.f32 %v1259_v61, %v1006_v47  ;;  %v1951_v61 = vmax.f32 %v1782_v50, 0.0 }
 0x2cb   :  { %v1784_v52 = vadd.f32 %v5196_v17, %v1783_v53  ;;  %2632 = vmatpush.msrb.mxu1 %v2511_v49 }
 0x2cc   :  { %v5419_v2 = vpop.f32.mrf.mxu3  ;;  %v1401_v45 = vmax.f32 %v1260_v31, 0.0 }
 0x2cd   :  { %v1952_v62 = vmax.f32 %v1784_v52, 0.0  ;;  %2633 = vmatpush.msrb.mxu1 %v2510_v54 }
 0x2ce   :  { %v1464_v1 = vpack.c.bf16 %v1401_v45, %v1400_v59 }
 0x2cf   :  { %v2024_v5 = vpack.c.bf16 %v1952_v62, %v1951_v61  ;;  %2634 = vmatpush.msrb.mxu1 %v2509_v56  ;;  %v1008_v57 = vpop.f32.mrf.mxu0  ;;  %v3705_v62 = vld [vmem:[%s6260_s0 + $0x2d0] sm:$0xf] }
 0x2d0   :  { %3874 = vmatmul.msk.bf16.gmra.mxu2 %vm1499_vm1, %v1464_v1  ;;  %v1267_v58 = vpop.f32.mrf.mxu1  ;;  %v1009_v44 = vadd.f32 %v5063_v29, %v1008_v57  ;;  %v5451_v29 = vld [vmem:[%s6263_s3] ss:$0 sm:$0xff]  ;;  %v3715_v57 = vld [vmem:[%s6260_s0 + $0x2e8] sm:$0xf0] }
 0x2d1   :  { %3930 = vmatmul.msk.bf16.gmra.mxu3 %vm676_vm0, %v2024_v5  ;;  %2635 = vmatpush.msrb.mxu1 %v2508_v63  ;;  %v4304_v63 = vld [vmem:[%s6260_s0 + $0x2e4] sm:$0xf] }
 0x2d2   :  { %v1786_v11 = vpop.f32.mrf.mxu2  ;;  %1047 = vmatmul.bf16.gmra.mxu0 %v3690_v3  ;;  %v1263_v21 = vadd.f32 %v5390_v22, %v1009_v44  ;;  %v4301_v22 = vld [vmem:[%s6260_s0 + $0x2c4] sm:$0xf0]  ;;  %v3718_v48 = vor.u32 %v4304_v63, %v3715_v57 }
 0x2d3   :  { %2636 = vmatpush.msrb.mxu1 %v2507_v13  ;;  %v1787_v27 = vadd.f32 %v5196_v17, %v1786_v11  ;;  %v3698_v46 = vor.u32 %v4301_v22, %v3697_v7  ;;  %v4306_v22 = vld [vmem:[%s6260_s0 + $0x2f4] sm:$0xf] }
 0x2d4   :  { %v5437_v15 = vpop.f32.mrf.mxu3  ;;  %3827 = vmatmul.msk.bf16.gmra.mxu1 %vm676_vm0, %v3702_v28  ;;  %v1402_v25 = vmax.f32 %v1263_v21, 0.0  ;;  %v3706_v28 = vor.u32 %v4303_v55, %v3705_v62 }
 0x2d5   :  { %2637 = vmatpush.msrb.mxu1 %v2506_v12  ;;  %v1953_v40 = vmax.f32 %v1787_v27, 0.0  ;;  %v4305_v27 = vld [vmem:[%s6260_s0 + $0x2e4] sm:$0xf0] }
 0x2d7   :  { %2638 = vmatpush.msrb.mxu1 %v2505_v16  ;;  %v1010_v20 = vpop.f32.mrf.mxu0 }
 0x2d8   :  { %v1011_v18 = vadd.f32 %v5451_v29, %v1010_v20  ;;  %v1269_v24 = vpop.f32.mrf.mxu1 }
 0x2d9   :  { %2639 = vmatpush.msrb.mxu1 %v2504_v14 }
 0x2da   :  { %v1788_v32 = vpop.f32.mrf.mxu2  ;;  %v1265_v30 = vadd.f32 %v5404_v4, %v1011_v18  ;;  %v3707_v4 = vld [vmem:[%s6260_s0 + $0x2d8] sm:$0xf0] }
 0x2db   :  { %v1789_v60 = vadd.f32 %v5196_v17, %v1788_v32  ;;  %2640 = vmatpush.msrb.mxu1 %v2503_v26  ;;  %v3710_v53 = vor.u32 %v4302_v42, %v3707_v4  ;;  %v3713_v26 = vld [vmem:[%s6260_s0 + $0x2e0] sm:$0xf] }
 0x2dc   :  { %v5463_v35 = vpop.f32.mrf.mxu3  ;;  %v1403_v38 = vmax.f32 %v1265_v30, 0.0 }
 0x2dd   :  { %v1954_v41 = vmax.f32 %v1789_v60, 0.0  ;;  %2641 = vmatpush.msrb.mxu1 %v2502_v36 }
 0x2de   :  { %v1465_v43 = vpack.c.bf16 %v1403_v38, %v1402_v25  ;;  %v3714_v38 = vor.u32 %v4305_v27, %v3713_v26 }
 0x2df   :  { %v2025_v47 = vpack.c.bf16 %v1954_v41, %v1953_v40  ;;  %2642 = vmatpush.msrb.mxu1 %v2501_v33  ;;  %v1013_v49 = vpop.f32.mrf.mxu0  ;;  %v3723_v33 = vld [vmem:[%s6260_s0 + $0x2f8] sm:$0xf0] }
 0x2e0   :  { %3875 = vmatmul.msk.bf16.gmra.mxu2 %vm1499_vm1, %v1465_v43  ;;  %v1272_v50 = vpop.f32.mrf.mxu1  ;;  %v1014_v52 = vadd.f32 %v5451_v29, %v1013_v49  ;;  %v3726_v4 = vor.u32 %v4306_v22, %v3723_v33 }
 0x2e1   :  { %3931 = vmatmul.msk.bf16.gmra.mxu3 %vm676_vm0, %v2025_v47 }
 0x2e2   :  { %v1791_v31 = vpop.f32.mrf.mxu2  ;;  %1052 = vmatmul.bf16.gmra.mxu0 %v3698_v46  ;;  %v1268_v19 = vadd.f32 %v1267_v58, %v1014_v52 }
 0x2e3   :  { %v1792_v59 = vadd.f32 %v5196_v17, %v1791_v31 }
 0x2e4   :  { %v5473_v37 = vpop.f32.mrf.mxu3  ;;  %3828 = vmatmul.msk.bf16.gmra.mxu1 %vm676_vm0, %v3710_v53  ;;  %v1404_v1 = vmax.f32 %v1268_v19, 0.0 }
 0x2e5   :  { %v1955_v39 = vmax.f32 %v1792_v59, 0.0  ;;  %v4307_v59 = vld [vmem:[%s6260_s0 + $0x2f4] sm:$0xf0] }
 0x2e7   :  { %v1015_v54 = vpop.f32.mrf.mxu0 }
 0x2e8   :  { %v1016_v51 = vadd.f32 %v5451_v29, %v1015_v54  ;;  %v1274_v56 = vpop.f32.mrf.mxu1 }
 0x2ea   :  { %v1793_v45 = vpop.f32.mrf.mxu2  ;;  %v1270_v6 = vadd.f32 %v1269_v24, %v1016_v51 }
 0x2eb   :  { %v1794_v61 = vadd.f32 %v5196_v17, %v1793_v45 }
 0x2ec   :  { %v5486_v0 = vpop.f32.mrf.mxu3  ;;  %v1405_v3 = vmax.f32 %v1270_v6, 0.0 }
 0x2ed   :  { %v1956_v5 = vmax.f32 %v1794_v61, 0.0 }
 0x2ee   :  { %v1466_v58 = vpack.c.bf16 %v1405_v3, %v1404_v1  ;;  %v4308_v1 = vld [vmem:[%s6260_s0 + $0x304] sm:$0xf]  ;;  %v3731_v3 = vld [vmem:[%s6260_s0 + $0x308] sm:$0xf0] }
 0x2ef   :  { %v2026_v9 = vpack.c.bf16 %v1956_v5, %v1955_v39  ;;  %v1018_v13 = vpop.f32.mrf.mxu0 }
 0x2f0   :  { %3876 = vmatmul.msk.bf16.gmra.mxu2 %vm1499_vm1, %v1466_v58  ;;  %v1277_v11 = vpop.f32.mrf.mxu1  ;;  %v1019_v23 = vadd.f32 %v5451_v29, %v1018_v13 }
 0x2f1   :  { %3932 = vmatmul.msk.bf16.gmra.mxu3 %vm676_vm0, %v2026_v9 }
 0x2f2   :  { %v1796_v12 = vpop.f32.mrf.mxu2  ;;  %1057 = vmatmul.bf16.gmra.mxu0 %v3706_v28  ;;  %v1273_v10 = vadd.f32 %v1272_v50, %v1019_v23  ;;  %v3734_v28 = vor.u32 %v4308_v1, %v3731_v3 }
 0x2f3   :  { %v1797_v8 = vadd.f32 %v5196_v17, %v1796_v12 }
 0x2f4   :  { %v5496_v44 = vpop.f32.mrf.mxu3  ;;  %3829 = vmatmul.msk.bf16.gmra.mxu1 %vm676_vm0, %v3718_v48  ;;  %v1406_v30 = vmax.f32 %v1273_v10, 0.0 }
 0x2f5   :  { %v1957_v36 = vmax.f32 %v1797_v8, 0.0 }
 0x2f7   :  { %v1020_v16 = vpop.f32.mrf.mxu0 }
 0x2f8   :  { %v1021_v14 = vadd.f32 %v5451_v29, %v1020_v16  ;;  %v1279_v20 = vpop.f32.mrf.mxu1 }
 0x2fa   :  { %v1798_v21 = vpop.f32.mrf.mxu2  ;;  %v1275_v18 = vadd.f32 %v1274_v56, %v1021_v14  ;;  %v3721_v56 = vld [vmem:[%s6260_s0 + $0x2f0] sm:$0xf] }
 0x2fb   :  { %v1799_v24 = vadd.f32 %v5196_v17, %v1798_v21  ;;  %v3722_v5 = vor.u32 %v4307_v59, %v3721_v56  ;;  %v3729_v21 = vld [vmem:[%s6260_s0 + $0x300] sm:$0xf] }
 0x2fc   :  { %v5509_v32 = vpop.f32.mrf.mxu3  ;;  %v1407_v60 = vmax.f32 %v1275_v18, 0.0  ;;  %v4309_v18 = vld [vmem:[%s6260_s0 + $0x304] sm:$0xf0] }
 0x2fd   :  { %v1958_v7 = vmax.f32 %v1799_v24, 0.0 }
 0x2fe   :  { %v1467_v25 = vpack.c.bf16 %v1407_v60, %v1406_v30 }
 0x2ff   :  { %v2027_v40 = vpack.c.bf16 %v1958_v7, %v1957_v36  ;;  %v1023_v41 = vpop.f32.mrf.mxu0  ;;  %v3730_v7 = vor.u32 %v4309_v18, %v3729_v21 }
 0x300   :  { %3877 = vmatmul.msk.bf16.gmra.mxu2 %vm1499_vm1, %v1467_v25  ;;  %v1282_v42 = vpop.f32.mrf.mxu1  ;;  %v1024_v47 = vadd.f32 %v5451_v29, %v1023_v41 }
 0x301   :  { %3933 = vmatmul.msk.bf16.gmra.mxu3 %vm676_vm0, %v2027_v40 }
 0x302   :  { %v1801_v43 = vpop.f32.mrf.mxu2  ;;  %1062 = vmatmul.bf16.gmra.mxu0 %v3714_v38  ;;  %v1278_v50 = vadd.f32 %v1277_v11, %v1024_v47 }
 0x303   :  { %v1802_v52 = vadd.f32 %v5196_v17, %v1801_v43 }
 0x304   :  { %v5519_v46 = vpop.f32.mrf.mxu3  ;;  %3830 = vmatmul.msk.bf16.gmra.mxu1 %vm676_vm0, %v3726_v4  ;;  %v1408_v6 = vmax.f32 %v1278_v50, 0.0 }
 0x305   :  { %v1959_v62 = vmax.f32 %v1802_v52, 0.0 }
 0x307   :  { %v1025_v49 = vpop.f32.mrf.mxu0 }
 0x308   :  { %v1026_v53 = vadd.f32 %v5451_v29, %v1025_v49  ;;  %v1284_v31 = vpop.f32.mrf.mxu1 }
 0x30a   :  { %v1803_v54 = vpop.f32.mrf.mxu2  ;;  %v1280_v19 = vadd.f32 %v1279_v20, %v1026_v53 }
 0x30b   :  { %v1804_v51 = vadd.f32 %v5196_v17, %v1803_v54 }
 0x30c   :  { %v5532_v45 = vpop.f32.mrf.mxu3  ;;  %v1409_v61 = vmax.f32 %v1280_v19, 0.0 }
 0x30d   :  { %v1960_v55 = vmax.f32 %v1804_v51, 0.0 }
 0x30e   :  { %v1468_v39 = vpack.c.bf16 %v1409_v61, %v1408_v6 }
 0x30f   :  { %v2028_v63 = vpack.c.bf16 %v1960_v55, %v1959_v62  ;;  %v1028_v57 = vpop.f32.mrf.mxu0 }
 0x310   :  { %3878 = vmatmul.msk.bf16.gmra.mxu2 %vm1499_vm1, %v1468_v39  ;;  %v1287_v58 = vpop.f32.mrf.mxu1  ;;  %v1029_v11 = vadd.f32 %v5451_v29, %v1028_v57  ;;  %v5570_v57 = vld [vmem:[%s6265_s5] ss:$0 sm:$0xff] }
 0x311   :  { %3934 = vmatmul.msk.bf16.gmra.mxu3 %vm676_vm0, %v2028_v63 }
 0x312   :  { %v1806_v9 = vpop.f32.mrf.mxu2  ;;  %1067 = vmatmul.bf16.gmra.mxu0 %v3722_v5  ;;  %v1283_v12 = vadd.f32 %v1282_v42, %v1029_v11 }
 0x313   :  { %v1807_v10 = vadd.f32 %v5196_v17, %v1806_v9 }
 0x314   :  { %v5542_v13 = vpop.f32.mrf.mxu3  ;;  %3831 = vmatmul.msk.bf16.gmra.mxu1 %vm676_vm0, %v3734_v28  ;;  %v1410_v26 = vmax.f32 %v1283_v12, 0.0 }
 0x315   :  { %v1961_v30 = vmax.f32 %v1807_v10, 0.0 }
 0x317   :  { %v1030_v48 = vpop.f32.mrf.mxu0 }
 0x318   :  { %v1031_v23 = vadd.f32 %v5451_v29, %v1030_v48  ;;  %v1289_v16 = vpop.f32.mrf.mxu1 }
 0x31a   :  { %v1808_v14 = vpop.f32.mrf.mxu2  ;;  %v1285_v20 = vadd.f32 %v1284_v31, %v1031_v23 }
 0x31b   :  { %v1809_v8 = vadd.f32 %v5196_v17, %v1808_v14 }
 0x31c   :  { %v5555_v24 = vpop.f32.mrf.mxu3  ;;  %v1411_v27 = vmax.f32 %v1285_v20, 0.0 }
 0x31d   :  { %v1962_v60 = vmax.f32 %v1809_v8, 0.0 }
 0x31e   :  { %v1469_v36 = vpack.c.bf16 %v1411_v27, %v1410_v26 }
 0x31f   :  { %v2029_v22 = vpack.c.bf16 %v1962_v60, %v1961_v30  ;;  %v1033_v33 = vpop.f32.mrf.mxu0 }
 0x320   :  { %3879 = vmatmul.msk.bf16.gmra.mxu2 %vm1499_vm1, %v1469_v36  ;;  %v1292_v25 = vpop.f32.mrf.mxu1  ;;  %v1034_v41 = vadd.f32 %v5451_v29, %v1033_v33 }
 0x321   :  { %3935 = vmatmul.msk.bf16.gmra.mxu3 %vm676_vm0, %v2029_v22 }
 0x322   :  { %v1811_v38 = vpop.f32.mrf.mxu2  ;;  %1072 = vmatmul.bf16.gmra.mxu0 %v3730_v7  ;;  %v1288_v4 = vadd.f32 %v1287_v58, %v1034_v41 }
 0x323   :  { %v1812_v49 = vadd.f32 %v5196_v17, %v1811_v38 }
 0x324   :  { %v2350_v40 = vpop.f32.mrf.mxu3  ;;  %v1412_v54 = vmax.f32 %v1288_v4, 0.0 }
 0x325   :  { %v1963_v51 = vmax.f32 %v1812_v49, 0.0 }
 0x327   :  { %v1035_v42 = vpop.f32.mrf.mxu0 }
 0x328   :  { %v1036_v43 = vadd.f32 %v5451_v29, %v1035_v42  ;;  %v1294_v47 = vpop.f32.mrf.mxu1 }
 0x32a   :  { %v1813_v50 = vpop.f32.mrf.mxu2  ;;  %v1290_v53 = vadd.f32 %v1289_v16, %v1036_v43  ;;  %v5577_v16 = vld [vmem:[%s6267_s7] ss:$0 sm:$0xff] }
 0x32b   :  { %v1814_v31 = vadd.f32 %v5196_v17, %v1813_v50  ;;  %v2351_v60 = vadd.f32 %v5577_v16, %v2350_v40  ;;  %v2348_v33 = vadd.f32 %v5577_v16, %v5555_v24  ;;  %v2346_v42 = vadd.f32 %v5577_v16, %v5542_v13 }
 0x32c   :  { %v2352_v52 = vpop.f32.mrf.mxu3  ;;  %v1413_v19 = vmax.f32 %v1290_v53, 0.0  ;;  %v2343_v40 = vadd.f32 %v5577_v16, %v5532_v45  ;;  %v2341_v50 = vadd.f32 %v5577_v16, %v5519_v46  ;;  %v2336_v46 = vadd.f32 %v5577_v16, %v5496_v44 }
 0x32d   :  { %v1964_v56 = vmax.f32 %v1814_v31, 0.0  ;;  %v2353_v18 = vadd.f32 %v5577_v16, %v2352_v52  ;;  %v2529_v4 = vmax.f32 %v2351_v60, 0.0  ;;  %v2528_v43 = vmax.f32 %v2348_v33, 0.0 }
 0x32e   :  { %v1470_v59 = vpack.c.bf16 %v1413_v19, %v1412_v54  ;;  %v2527_v53 = vmax.f32 %v2346_v42, 0.0  ;;  %v2338_v19 = vadd.f32 %v5577_v16, %v5509_v32  ;;  %v2526_v45 = vmax.f32 %v2343_v40, 0.0 }
 0x32f   :  { %v2030_v6 = vpack.c.bf16 %v1964_v56, %v1963_v51  ;;  %v1038_v61 = vpop.f32.mrf.mxu0 }
 0x330   :  { %3880 = vmatmul.msk.bf16.gmra.mxu2 %vm1499_vm1, %v1470_v59  ;;  %v1297_v62 = vpop.f32.mrf.mxu1  ;;  %v1039_v3 = vadd.f32 %v5451_v29, %v1038_v61  ;;  %v2525_v61 = vmax.f32 %v2341_v50, 0.0  ;;  %v2524_v32 = vmax.f32 %v2338_v19, 0.0 }
 0x331   :  { %3936 = vmatmul.msk.bf16.gmra.mxu3 %vm676_vm0, %v2030_v6 }
 0x332   :  { %v1816_v55 = vpop.f32.mrf.mxu2  ;;  %v1293_v5 = vadd.f32 %v1292_v25, %v1039_v3  ;;  %v2530_v25 = vmax.f32 %v2353_v18, 0.0  ;;  %v2333_v3 = vadd.f32 %v5577_v16, %v5486_v0 }
 0x333   :  { %v1817_v58 = vadd.f32 %v5570_v57, %v1816_v55 }
 0x334   :  { %v2355_v1 = vpop.f32.mrf.mxu3  ;;  %v1414_v12 = vmax.f32 %v1293_v5, 0.0 }
 0x335   :  { %v2356_v10 = vadd.f32 %v5577_v16, %v2355_v1  ;;  %v1965_v20 = vmax.f32 %v1817_v58, 0.0  ;;  %v2328_v58 = vadd.f32 %v5577_v16, %v5463_v35 }
 0x337   :  { %v1040_v39 = vpop.f32.mrf.mxu0  ;;  %v2531_v36 = vmax.f32 %v2356_v10, 0.0 }
 0x338   :  { %v1041_v17 = vadd.f32 %v5451_v29, %v1040_v39  ;;  %v1299_v63 = vpop.f32.mrf.mxu1 }
 0x33a   :  { %v1295_v28 = vadd.f32 %v1294_v47, %v1041_v17  ;;  %v1818_v9 = vpop.f32.mrf.mxu2  ;;  %v2331_v17 = vadd.f32 %v5577_v16, %v5473_v37  ;;  %v2323_v37 = vadd.f32 %v5577_v16, %v5419_v2 }
 0x33b   :  { %v1819_v11 = vadd.f32 %v5570_v57, %v1818_v9 }
 0x33c   :  { %v2357_v48 = vpop.f32.mrf.mxu3  ;;  %v1415_v23 = vmax.f32 %v1295_v28, 0.0  ;;  %v2522_v28 = vmax.f32 %v2333_v3, 0.0 }
 0x33d   :  { %v2358_v14 = vadd.f32 %v5577_v16, %v2357_v48  ;;  %v1966_v8 = vmax.f32 %v1819_v11, 0.0  ;;  %v2326_v48 = vadd.f32 %v5577_v16, %v5437_v15 }
 0x33e   :  { %v1471_v21 = vpack.c.bf16 %v1415_v23, %v1414_v12  ;;  %v2521_v12 = vmax.f32 %v2331_v17, 0.0  ;;  %v2520_v23 = vmax.f32 %v2328_v58, 0.0 }
 0x33f   :  { %v2532_v26 = vmax.f32 %v2358_v14, 0.0  ;;  %v2031_v27 = vpack.c.bf16 %v1966_v8, %v1965_v20  ;;  %v1043_v30 = vpop.f32.mrf.mxu0  ;;  %v2321_v20 = vadd.f32 %v5577_v16, %v5396_v34  ;;  %v2519_v8 = vmax.f32 %v2326_v48, 0.0 }
 0x340   :  { %3881 = vmatmul.msk.bf16.gmra.mxu2 %vm1499_vm1, %v1471_v21  ;;  %v1044_v41 = vadd.f32 %v5451_v29, %v1043_v30 }
 0x341   :  { %2650 = vmatpush.msrb.mxu3 %v2532_v26  ;;  %v1302_v7 = vpop.f32.mrf.mxu1  ;;  %v2518_v26 = vmax.f32 %v2323_v37, 0.0 }
 0x342   :  { %3937 = vmatmul.msk.bf16.gmra.mxu3 %vm676_vm0, %v2031_v27  ;;  %v1821_v22 = vpop.f32.mrf.mxu2  ;;  %v1298_v49 = vadd.f32 %v1297_v62, %v1044_v41 }
 0x343   :  { %2651 = vmatpush.msrb.mxu3 %v2531_v36  ;;  %v1822_v31 = vadd.f32 %v5570_v57, %v1821_v22 }
 0x344   :  { %v5587_v38 = vpop.f32.mrf.mxu3  ;;  %v1416_v59 = vmax.f32 %v1298_v49, 0.0 }
 0x345   :  { %2652 = vmatpush.msrb.mxu3 %v2530_v25  ;;  %v1967_v62 = vmax.f32 %v1822_v31, 0.0 }
 0x347   :  { %2653 = vmatpush.msrb.mxu3 %v2529_v4  ;;  %v1045_v47 = vpop.f32.mrf.mxu0 }
 0x348   :  { %v1046_v24 = vadd.f32 %v5451_v29, %v1045_v47 }
 0x349   :  { %2654 = vmatpush.msrb.mxu3 %v2528_v43  ;;  %v1304_v52 = vpop.f32.mrf.mxu1 }
 0x34a   :  { %v1300_v13 = vadd.f32 %v1299_v63, %v1046_v24  ;;  %v1823_v54 = vpop.f32.mrf.mxu2  ;;  %v2523_v63 = vmax.f32 %v2336_v46, 0.0 }
 0x34b   :  { %2655 = vmatpush.msrb.mxu3 %v2527_v53  ;;  %v1824_v51 = vadd.f32 %v5570_v57, %v1823_v54 }
 0x34c   :  { %v5601_v56 = vpop.f32.mrf.mxu3  ;;  %v1417_v6 = vmax.f32 %v1300_v13, 0.0 }
 0x34d   :  { %2656 = vmatpush.msrb.mxu3 %v2526_v45  ;;  %v1968_v55 = vmax.f32 %v1824_v51, 0.0 }
 0x34e   :  { %v1472_v1 = vpack.c.bf16 %v1417_v6, %v1416_v59 }
 0x34f   :  { %2657 = vmatpush.msrb.mxu3 %v2525_v61  ;;  %v2032_v39 = vpack.c.bf16 %v1968_v55, %v1967_v62  ;;  %v1048_v5 = vpop.f32.mrf.mxu0 }
 0x350   :  { %3882 = vmatmul.msk.bf16.gmra.mxu2 %vm1499_vm1, %v1472_v1  ;;  %v1049_v11 = vadd.f32 %v5451_v29, %v1048_v5 }
 0x351   :  { %2658 = vmatpush.msrb.mxu3 %v2524_v32  ;;  %v1307_v44 = vpop.f32.mrf.mxu1 }
 0x352   :  { %3938 = vmatmul.msk.bf16.gmra.mxu3 %vm676_vm0, %v2032_v39  ;;  %v1303_v14 = vadd.f32 %v1302_v7, %v1049_v11  ;;  %v2517_v7 = vmax.f32 %v2321_v20, 0.0 }
 0x353   :  { %2659 = vmatpush.msrb.mxu3 %v2523_v63  ;;  %v1826_v0 = vpop.f32.mrf.mxu2 }
 0x354   :  { %v5613_v9 = vpop.f32.mrf.mxu3  ;;  %v1827_v18 = vadd.f32 %v5570_v57, %v1826_v0  ;;  %v1418_v2 = vmax.f32 %v1303_v14, 0.0 }
 0x355   :  { %2660 = vmatpush.msrb.mxu3 %v2522_v28 }
 0x356   :  { %v1969_v22 = vmax.f32 %v1827_v18, 0.0 }
 0x357   :  { %2661 = vmatpush.msrb.mxu3 %v2521_v12  ;;  %v1050_v10 = vpop.f32.mrf.mxu0 }
 0x358   :  { %v1051_v35 = vadd.f32 %v5451_v29, %v1050_v10 }
 0x359   :  { %2662 = vmatpush.msrb.mxu3 %v2520_v23  ;;  %v1309_v21 = vpop.f32.mrf.mxu1 }
 0x35a   :  { %v1305_v15 = vadd.f32 %v1304_v52, %v1051_v35 }
 0x35b   :  { %2663 = vmatpush.msrb.mxu3 %v2519_v8  ;;  %v1828_v27 = vpop.f32.mrf.mxu2 }
 0x35c   :  { %v5624_v30 = vpop.f32.mrf.mxu3  ;;  %v1419_v60 = vmax.f32 %v1305_v15, 0.0  ;;  %v1829_v36 = vadd.f32 %v5570_v57, %v1828_v27 }
 0x35d   :  { %2664 = vmatpush.msrb.mxu3 %v2518_v26 }
 0x35e   :  { %v1473_v33 = vpack.c.bf16 %v1419_v60, %v1418_v2  ;;  %v1970_v34 = vmax.f32 %v1829_v36, 0.0 }
 0x35f   :  { %2665 = vmatpush.msrb.mxu3 %v2517_v7  ;;  %v1053_v25 = vpop.f32.mrf.mxu0 }
 0x360   :  { %v2033_v41 = vpack.c.bf16 %v1970_v34, %v1969_v22  ;;  %3883 = vmatmul.msk.bf16.gmra.mxu2 %vm1499_vm1, %v1473_v33  ;;  %v1054_v43 = vadd.f32 %v5451_v29, %v1053_v25 }
 0x361   :  { %v1312_v4 = vpop.f32.mrf.mxu1 }
 0x362   :  { %3939 = vmatmul.msk.bf16.gmra.mxu3 %vm676_vm0, %v2033_v41  ;;  %v1308_v49 = vadd.f32 %v1307_v44, %v1054_v43 }
 0x363   :  { %v1831_v42 = vpop.f32.mrf.mxu2 }
 0x364   :  { %v5629_v40 = vpop.f32.mrf.mxu3  ;;  %v1832_v50 = vadd.f32 %v5570_v57, %v1831_v42  ;;  %v1420_v13 = vmax.f32 %v1308_v49, 0.0 }
 0x366   :  { %v1971_v51 = vmax.f32 %v1832_v50, 0.0 }
 0x367   :  { %v1055_v47 = vpop.f32.mrf.mxu0 }
 0x368   :  { %v1056_v24 = vadd.f32 %v5451_v29, %v1055_v47 }
 0x369   :  { %v1314_v45 = vpop.f32.mrf.mxu1 }
 0x36a   :  { %v1310_v53 = vadd.f32 %v1309_v21, %v1056_v24 }
 0x36b   :  { %v1833_v31 = vpop.f32.mrf.mxu2 }
 0x36c   :  { %v5634_v52 = vpop.f32.mrf.mxu3  ;;  %v1421_v54 = vmax.f32 %v1310_v53, 0.0  ;;  %v1834_v19 = vadd.f32 %v5570_v57, %v1833_v31 }
 0x36e   :  { %v1474_v59 = vpack.c.bf16 %v1421_v54, %v1420_v13  ;;  %v1972_v6 = vmax.f32 %v1834_v19, 0.0 }
 0x36f   :  { %v1058_v46 = vpop.f32.mrf.mxu0 }
 0x370   :  { %v2034_v61 = vpack.c.bf16 %v1972_v6, %v1971_v51  ;;  %3884 = vmatmul.msk.bf16.gmra.mxu2 %vm1499_vm1, %v1474_v59  ;;  %v1059_v1 = vadd.f32 %v5451_v29, %v1058_v46 }
 0x371   :  { %v1317_v32 = vpop.f32.mrf.mxu1 }
 0x372   :  { %3940 = vmatmul.msk.bf16.gmra.mxu3 %vm676_vm0, %v2034_v61  ;;  %v1313_v39 = vadd.f32 %v1312_v4, %v1059_v1 }
 0x373   :  { %v1836_v62 = vpop.f32.mrf.mxu2 }
 0x374   :  { %v5639_v55 = vpop.f32.mrf.mxu3  ;;  %v1837_v17 = vadd.f32 %v5570_v57, %v1836_v62  ;;  %v1422_v28 = vmax.f32 %v1313_v39, 0.0 }
 0x376   :  { %v1973_v48 = vmax.f32 %v1837_v17, 0.0 }
 0x377   :  { %v1060_v3 = vpop.f32.mrf.mxu0 }
 0x378   :  { %v1061_v5 = vadd.f32 %v5451_v29, %v1060_v3 }
 0x379   :  { %v1319_v14 = vpop.f32.mrf.mxu1 }
 0x37a   :  { %v1315_v63 = vadd.f32 %v1314_v45, %v1061_v5 }
 0x37b   :  { %v1838_v44 = vpop.f32.mrf.mxu2 }
 0x37c   :  { %v5644_v58 = vpop.f32.mrf.mxu3  ;;  %v1423_v0 = vmax.f32 %v1315_v63, 0.0  ;;  %v1839_v11 = vadd.f32 %v5570_v57, %v1838_v44 }
 0x37e   :  { %v1475_v12 = vpack.c.bf16 %v1423_v0, %v1422_v28  ;;  %v1974_v37 = vmax.f32 %v1839_v11, 0.0 }
 0x37f   :  { %v1063_v23 = vpop.f32.mrf.mxu0 }
 0x380   :  { %v2035_v10 = vpack.c.bf16 %v1974_v37, %v1973_v48  ;;  %3885 = vmatmul.msk.bf16.gmra.mxu2 %vm1499_vm1, %v1475_v12  ;;  %v1064_v8 = vadd.f32 %v5451_v29, %v1063_v23 }
 0x381   :  { %v1322_v60 = vpop.f32.mrf.mxu1 }
 0x382   :  { %3941 = vmatmul.msk.bf16.gmra.mxu3 %vm676_vm0, %v2035_v10  ;;  %v1318_v18 = vadd.f32 %v1317_v32, %v1064_v8 }
 0x383   :  { %v1841_v35 = vpop.f32.mrf.mxu2 }
 0x384   :  { %v5649_v20 = vpop.f32.mrf.mxu3  ;;  %v1842_v26 = vadd.f32 %v5570_v57, %v1841_v35  ;;  %v1424_v7 = vmax.f32 %v1318_v18, 0.0 }
 0x386   :  { %v1975_v34 = vmax.f32 %v1842_v26, 0.0 }
 0x387   :  { %v1065_v21 = vpop.f32.mrf.mxu0 }
 0x388   :  { %v1066_v15 = vadd.f32 %v5451_v29, %v1065_v21 }
 0x389   :  { %v1324_v24 = vpop.f32.mrf.mxu1 }
 0x38a   :  { %v1320_v27 = vadd.f32 %v1319_v14, %v1066_v15 }
 0x38b   :  { %v1843_v2 = vpop.f32.mrf.mxu2 }
 0x38c   :  { %v5654_v36 = vpop.f32.mrf.mxu3  ;;  %v1425_v22 = vmax.f32 %v1320_v27, 0.0  ;;  %v1844_v33 = vadd.f32 %v5570_v57, %v1843_v2 }
 0x38e   :  { %v1476_v25 = vpack.c.bf16 %v1425_v22, %v1424_v7  ;;  %v1976_v41 = vmax.f32 %v1844_v33, 0.0 }
 0x38f   :  { %v1068_v42 = vpop.f32.mrf.mxu0 }
 0x390   :  { %v2036_v4 = vpack.c.bf16 %v1976_v41, %v1975_v34  ;;  %3886 = vmatmul.msk.bf16.gmra.mxu2 %vm1499_vm1, %v1476_v25  ;;  %v1069_v49 = vadd.f32 %v5451_v29, %v1068_v42 }
 0x391   :  { %v1327_v46 = vpop.f32.mrf.mxu1 }
 0x392   :  { %3942 = vmatmul.msk.bf16.gmra.mxu3 %vm676_vm0, %v2036_v4  ;;  %v1323_v53 = vadd.f32 %v1322_v60, %v1069_v49 }
 0x393   :  { %v1846_v43 = vpop.f32.mrf.mxu2 }
 0x394   :  { %v2385_v47 = vpop.f32.mrf.mxu3  ;;  %v1847_v13 = vadd.f32 %v5570_v57, %v1846_v43  ;;  %v1426_v51 = vmax.f32 %v1323_v53, 0.0 }
 0x395   :  { %v2386_v53 = vadd.f32 %v5577_v16, %v2385_v47 }
 0x396   :  { %v1977_v61 = vmax.f32 %v1847_v13, 0.0 }
 0x397   :  { %v1070_v50 = vpop.f32.mrf.mxu0 }
 0x398   :  { %v1071_v31 = vadd.f32 %v5451_v29, %v1070_v50 }
 0x399   :  { %v1329_v28 = vpop.f32.mrf.mxu1 }
 0x39a   :  { %v1325_v54 = vadd.f32 %v1324_v24, %v1071_v31 }
 0x39b   :  { %v1848_v19 = vpop.f32.mrf.mxu2 }
 0x39c   :  { %v2387_v45 = vpop.f32.mrf.mxu3  ;;  %v1427_v59 = vmax.f32 %v1325_v54, 0.0  ;;  %v1849_v6 = vadd.f32 %v5570_v57, %v1848_v19  ;;  %v2383_v54 = vadd.f32 %v5577_v16, %v5654_v36  ;;  %v2376_v36 = vadd.f32 %v5577_v16, %v5639_v55 }
 0x39d   :  { %v2388_v49 = vadd.f32 %v5577_v16, %v2387_v45  ;;  %v2368_v55 = vadd.f32 %v5577_v16, %v5624_v30 }
 0x39e   :  { %v1477_v62 = vpack.c.bf16 %v1427_v59, %v1426_v51  ;;  %v1978_v1 = vmax.f32 %v1849_v6, 0.0  ;;  %v2381_v51 = vadd.f32 %v5577_v16, %v5649_v20  ;;  %v2543_v59 = vmax.f32 %v2386_v53, 0.0 }
 0x39f   :  { %v1073_v3 = vpop.f32.mrf.mxu0  ;;  %v2544_v19 = vmax.f32 %v2388_v49, 0.0  ;;  %v2378_v6 = vadd.f32 %v5577_v16, %v5644_v58  ;;  %v2542_v47 = vmax.f32 %v2383_v54, 0.0 }
 0x3a0   :  { %v2037_v32 = vpack.c.bf16 %v1978_v1, %v1977_v61  ;;  %3887 = vmatmul.msk.bf16.gmra.mxu2 %vm1499_vm1, %v1477_v62  ;;  %v1074_v39 = vadd.f32 %v5451_v29, %v1073_v3  ;;  %v2541_v62 = vmax.f32 %v2381_v51, 0.0 }
 0x3a2   :  { %3943 = vmatmul.msk.bf16.gmra.mxu3 %vm676_vm0, %v2037_v32  ;;  %v1328_v63 = vadd.f32 %v1327_v46, %v1074_v39  ;;  %v2373_v32 = vadd.f32 %v5577_v16, %v5634_v52  ;;  %v2540_v39 = vmax.f32 %v2378_v6, 0.0 }
 0x3a3   :  { %v1851_v5 = vpop.f32.mrf.mxu2 }
 0x3a4   :  { %v2390_v17 = vpop.f32.mrf.mxu3  ;;  %v1852_v11 = vadd.f32 %v5570_v57, %v1851_v5  ;;  %v1428_v48 = vmax.f32 %v1328_v63, 0.0  ;;  %v2371_v5 = vadd.f32 %v5577_v16, %v5629_v40  ;;  %v2538_v63 = vmax.f32 %v2373_v32, 0.0 }
 0x3a5   :  { %v2391_v4 = vadd.f32 %v5577_v16, %v2390_v17  ;;  %v2539_v17 = vmax.f32 %v2376_v36, 0.0  ;;  %v2363_v40 = vadd.f32 %v5577_v16, %v5601_v56 }
 0x3a6   :  { %v1979_v35 = vmax.f32 %v1852_v11, 0.0  ;;  %v2537_v52 = vmax.f32 %v2371_v5, 0.0  ;;  %v2536_v11 = vmax.f32 %v2368_v55, 0.0 }
 0x3a7   :  { %v1075_v44 = vpop.f32.mrf.mxu0  ;;  %v2545_v31 = vmax.f32 %v2391_v4, 0.0 }
 0x3a8   :  { %v1076_v0 = vadd.f32 %v5451_v29, %v1075_v44 }
 0x3aa   :  { %v1330_v12 = vadd.f32 %v1329_v28, %v1076_v0  ;;  %v2366_v28 = vadd.f32 %v5577_v16, %v5613_v9 }
 0x3ab   :  { %v1853_v37 = vpop.f32.mrf.mxu2 }
 0x3ac   :  { %v2392_v23 = vpop.f32.mrf.mxu3  ;;  %v1854_v10 = vadd.f32 %v5570_v57, %v1853_v37  ;;  %v1429_v14 = vmax.f32 %v1330_v12, 0.0  ;;  %v2535_v12 = vmax.f32 %v2366_v28, 0.0  ;;  %v2534_v37 = vmax.f32 %v2363_v40, 0.0 }
 0x3ad   :  { %v2393_v25 = vadd.f32 %v5577_v16, %v2392_v23 }
 0x3ae   :  { %v1980_v8 = vmax.f32 %v1854_v10, 0.0  ;;  %v1478_v21 = vpack.c.bf16 %v1429_v14, %v1428_v48  ;;  %v2361_v48 = vadd.f32 %v5577_v16, %v5587_v38 }
 0x3af   :  { %v2546_v24 = vmax.f32 %v2393_v25, 0.0 }
 0x3b0   :  { %v2038_v18 = vpack.c.bf16 %v1980_v8, %v1979_v35  ;;  %3888 = vmatmul.msk.bf16.gmra.mxu2 %vm1499_vm1, %v1478_v21  ;;  %v2533_v10 = vmax.f32 %v2361_v48, 0.0 }
 0x3b2   :  { %3944 = vmatmul.msk.bf16.gmra.mxu3 %vm676_vm0, %v2038_v18 }
 0x3b3   :  { %v1856_v15 = vpop.f32.mrf.mxu2 }
 0x3b4   :  { %v2395_v26 = vpop.f32.mrf.mxu3  ;;  %v1857_v29 = vadd.f32 %v5570_v57, %v1856_v15 }
 0x3b5   :  { %v2396_v7 = vadd.f32 %v5577_v16, %v2395_v26 }
 0x3b6   :  { %v1981_v33 = vmax.f32 %v1857_v29, 0.0 }
 0x3b7   :  { %v2547_v43 = vmax.f32 %v2396_v7, 0.0 }
 0x3bb   :  { %v1858_v27 = vpop.f32.mrf.mxu2 }
 0x3bc   :  { %v2397_v2 = vpop.f32.mrf.mxu3  ;;  %v1859_v60 = vadd.f32 %v5570_v57, %v1858_v27 }
 0x3bd   :  { %v2398_v22 = vadd.f32 %v5577_v16, %v2397_v2 }
 0x3be   :  { %v1982_v34 = vmax.f32 %v1859_v60, 0.0 }
 0x3bf   :  { %v2548_v41 = vmax.f32 %v2398_v22, 0.0 }
 0x3c0   :  { %v2039_v42 = vpack.c.bf16 %v1982_v34, %v1981_v33 }
 0x3c1   :  { %2673 = vmatpush.msrb.mxu0 %v2548_v41 }
 0x3c2   :  { %3945 = vmatmul.msk.bf16.gmra.mxu3 %vm676_vm0, %v2039_v42 }
 0x3c3   :  { %2674 = vmatpush.msrb.mxu0 %v2547_v43  ;;  %v1861_v50 = vpop.f32.mrf.mxu2 }
 0x3c4   :  { %v1862_v45 = vadd.f32 %v5570_v57, %v1861_v50 }
 0x3c5   :  { %2675 = vmatpush.msrb.mxu0 %v2546_v24  ;;  %v5680_v13 = vpop.f32.mrf.mxu3 }
 0x3c6   :  { %v1983_v20 = vmax.f32 %v1862_v45, 0.0 }
 0x3c7   :  { %2676 = vmatpush.msrb.mxu0 %v2545_v31 }
 0x3c9   :  { %2677 = vmatpush.msrb.mxu0 %v2544_v19 }
 0x3cb   :  { %2678 = vmatpush.msrb.mxu0 %v2543_v59  ;;  %v1863_v46 = vpop.f32.mrf.mxu2 }
 0x3cc   :  { %v1864_v61 = vadd.f32 %v5570_v57, %v1863_v46 }
 0x3cd   :  { %2679 = vmatpush.msrb.mxu0 %v2542_v47  ;;  %v5692_v1 = vpop.f32.mrf.mxu3 }
 0x3ce   :  { %v1984_v3 = vmax.f32 %v1864_v61, 0.0 }
 0x3cf   :  { %2680 = vmatpush.msrb.mxu0 %v2541_v62 }
 0x3d0   :  { %v2040_v58 = vpack.c.bf16 %v1984_v3, %v1983_v20 }
 0x3d1   :  { %2681 = vmatpush.msrb.mxu0 %v2540_v39 }
 0x3d2   :  { %3946 = vmatmul.msk.bf16.gmra.mxu3 %vm676_vm0, %v2040_v58 }
 0x3d3   :  { %2682 = vmatpush.msrb.mxu0 %v2539_v17  ;;  %v1866_v44 = vpop.f32.mrf.mxu2 }
 0x3d4   :  { %v1867_v30 = vadd.f32 %v5570_v57, %v1866_v44 }
 0x3d5   :  { %2683 = vmatpush.msrb.mxu0 %v2538_v63  ;;  %v5703_v0 = vpop.f32.mrf.mxu3 }
 0x3d6   :  { %v1985_v35 = vmax.f32 %v1867_v30, 0.0 }
 0x3d7   :  { %2684 = vmatpush.msrb.mxu0 %v2537_v52 }
 0x3d9   :  { %2685 = vmatpush.msrb.mxu0 %v2536_v11 }
 0x3db   :  { %2686 = vmatpush.msrb.mxu0 %v2535_v12  ;;  %v1868_v23 = vpop.f32.mrf.mxu2 }
 0x3dc   :  { %v1869_v9 = vadd.f32 %v5570_v57, %v1868_v23 }
 0x3dd   :  { %2687 = vmatpush.msrb.mxu0 %v2534_v37  ;;  %v5711_v14 = vpop.f32.mrf.mxu3 }
 0x3de   :  { %v1986_v56 = vmax.f32 %v1869_v9, 0.0 }
 0x3df   :  { %2688 = vmatpush.msrb.mxu0 %v2533_v10 }
 0x3e0   :  { %v2041_v8 = vpack.c.bf16 %v1986_v56, %v1985_v35 }
 0x3e2   :  { %3947 = vmatmul.msk.bf16.gmra.mxu3 %vm676_vm0, %v2041_v8 }
 0x3e3   :  { %v1871_v38 = vpop.f32.mrf.mxu2 }
 0x3e4   :  { %v1872_v18 = vadd.f32 %v5570_v57, %v1871_v38 }
 0x3e5   :  { %v5714_v21 = vpop.f32.mrf.mxu3 }
 0x3e6   :  { %v1987_v27 = vmax.f32 %v1872_v18, 0.0 }
 0x3eb   :  { %v1873_v15 = vpop.f32.mrf.mxu2 }
 0x3ec   :  { %v1874_v26 = vadd.f32 %v5570_v57, %v1873_v15 }
 0x3ed   :  { %v5718_v29 = vpop.f32.mrf.mxu3 }
 0x3ee   :  { %v1988_v2 = vmax.f32 %v1874_v26, 0.0 }
 0x3f0   :  { %v2042_v60 = vpack.c.bf16 %v1988_v2, %v1987_v27 }
 0x3f2   :  { %3948 = vmatmul.msk.bf16.gmra.mxu3 %vm676_vm0, %v2042_v60 }
 0x3f3   :  { %v1876_v7 = vpop.f32.mrf.mxu2 }
 0x3f4   :  { %v1877_v33 = vadd.f32 %v5570_v57, %v1876_v7 }
 0x3f5   :  { %v5721_v22 = vpop.f32.mrf.mxu3 }
 0x3f6   :  { %v1989_v42 = vmax.f32 %v1877_v33, 0.0 }
 0x3fb   :  { %v1878_v34 = vpop.f32.mrf.mxu2 }
 0x3fc   :  { %v1879_v25 = vadd.f32 %v5570_v57, %v1878_v34 }
 0x3fd   :  { %v5725_v41 = vpop.f32.mrf.mxu3 }
 0x3fe   :  { %v1990_v4 = vmax.f32 %v1879_v25, 0.0  ;;  %v2418_v25 = vadd.f32 %v5577_v16, %v5725_v41  ;;  %v2408_v41 = vadd.f32 %v5577_v16, %v5711_v14 }
 0x400   :  { %v2043_v43 = vpack.c.bf16 %v1990_v4, %v1989_v42 }
 0x402   :  { %3949 = vmatmul.msk.bf16.gmra.mxu3 %vm676_vm0, %v2043_v43  ;;  %v2416_v43 = vadd.f32 %v5577_v16, %v5721_v22  ;;  %v2406_v22 = vadd.f32 %v5577_v16, %v5703_v0 }
 0x403   :  { %v1881_v49 = vpop.f32.mrf.mxu2 }
 0x404   :  { %v1882_v50 = vadd.f32 %v5570_v57, %v1881_v49 }
 0x405   :  { %v2420_v24 = vpop.f32.mrf.mxu3 }
 0x406   :  { %v1991_v19 = vmax.f32 %v1882_v50, 0.0  ;;  %v2421_v33 = vadd.f32 %v5577_v16, %v2420_v24  ;;  %v2413_v50 = vadd.f32 %v5577_v16, %v5718_v29  ;;  %v2411_v24 = vadd.f32 %v5577_v16, %v5714_v21 }
 0x407   :  { %v2403_v29 = vadd.f32 %v5577_v16, %v5692_v1  ;;  %v2401_v21 = vadd.f32 %v5577_v16, %v5680_v13  ;;  %v2583_v13 = vld [vmem:[%s6261_s1] sm:$0xff] }
 0x408   :  { %v2557_v49 = vmax.f32 %v2421_v33, 0.0  ;;  %2620 = vmatmul.f32.vlgmr.msrb.gmra.mxu2 %v2583_v13 }
 0x409   :  { %v2550_v14 = vmax.f32 %v2403_v29, 0.0 }
 0x40b   :  { %v1883_v53 = vpop.f32.mrf.mxu2 }
 0x40c   :  { %v1884_v31 = vadd.f32 %v5570_v57, %v1883_v53  ;;  %v2556_v53 = vmax.f32 %v2418_v25, 0.0  ;;  %v4389_v25 = vld [vmem:[%s6268_s8 + $0x1e4] sm:$0xf0] }
 0x40d   :  { %v2422_v54 = vpop.f32.mrf.mxu3 }
 0x40e   :  { %v1992_v51 = vmax.f32 %v1884_v31, 0.0  ;;  %v2423_v60 = vadd.f32 %v5577_v16, %v2422_v54  ;;  %v2555_v31 = vmax.f32 %v2416_v43, 0.0  ;;  %v2554_v54 = vmax.f32 %v2413_v50, 0.0  ;;  %v4150_v43 = vld [vmem:[%s6268_s8 + $0x180] sm:$0xf] }
 0x410   :  { %v2044_v59 = vpack.c.bf16 %v1992_v51, %v1991_v19  ;;  %v2558_v42 = vmax.f32 %v2423_v60, 0.0  ;;  %v2553_v51 = vmax.f32 %v2411_v24, 0.0 }
 0x412   :  { %3950 = vmatmul.msk.bf16.gmra.mxu3 %vm676_vm0, %v2044_v59  ;;  %v2552_v59 = vmax.f32 %v2408_v41, 0.0 }
 0x413   :  { %v1886_v45 = vpop.f32.mrf.mxu2 }
 0x414   :  { %v1887_v47 = vadd.f32 %v5570_v57, %v1886_v45  ;;  %v2551_v45 = vmax.f32 %v2406_v22, 0.0  ;;  %v4381_v22 = vld [vmem:[%s6268_s8 + $0x1a4] sm:$0xf0] }
 0x415   :  { %v2425_v6 = vpop.f32.mrf.mxu3 }
 0x416   :  { %v1993_v62 = vmax.f32 %v1887_v47, 0.0  ;;  %v2426_v27 = vadd.f32 %v5577_v16, %v2425_v6  ;;  %v2549_v47 = vmax.f32 %v2401_v21, 0.0 }
 0x418   :  { %v2559_v34 = vmax.f32 %v2426_v27, 0.0  ;;  %v4182_v27 = vld [vmem:[%s6268_s8 + $0x1c0] sm:$0xf] }
 0x41b   :  { %v1888_v46 = vpop.f32.mrf.mxu2 }
 0x41c   :  { %v1889_v61 = vadd.f32 %v5570_v57, %v1888_v46 }
 0x41d   :  { %v2427_v36 = vpop.f32.mrf.mxu3 }
 0x41e   :  { %v1994_v20 = vmax.f32 %v1889_v61, 0.0  ;;  %v2428_v15 = vadd.f32 %v5577_v16, %v2427_v36 }
 0x420   :  { %v2045_v3 = vpack.c.bf16 %v1994_v20, %v1993_v62  ;;  %v2560_v7 = vmax.f32 %v2428_v15, 0.0 }
 0x422   :  { %3951 = vmatmul.msk.bf16.gmra.mxu3 %vm676_vm0, %v2045_v3 }
 0x423   :  { %v1891_v32 = vpop.f32.mrf.mxu2 }
 0x424   :  { %v1892_v58 = vadd.f32 %v5570_v57, %v1891_v32 }
 0x425   :  { %v2430_v39 = vpop.f32.mrf.mxu3 }
 0x426   :  { %v1995_v63 = vmax.f32 %v1892_v58, 0.0  ;;  %v2431_v38 = vadd.f32 %v5577_v16, %v2430_v39  ;;  %v2590_v39 = vld [vmem:[%s6261_s1 + $0x38] sm:$0xff]  ;;  %v2585_v58 = vld [vmem:[%s6261_s1 + $0x10] sm:$0xff] }
 0x427   :  { %2623 = vmatmul.f32.gmra.mxu2 %v2590_v39 }
 0x428   :  { %v2561_v2 = vmax.f32 %v2431_v38, 0.0 }
 0x42b   :  { %v1893_v5 = vpop.f32.mrf.mxu2 }
 0x42c   :  { %v1894_v17 = vadd.f32 %v5570_v57, %v1893_v5 }
 0x42d   :  { %v2432_v55 = vpop.f32.mrf.mxu3 }
 0x42e   :  { %v1996_v44 = vmax.f32 %v1894_v17, 0.0  ;;  %v2433_v35 = vadd.f32 %v5577_v16, %v2432_v55  ;;  %v2584_v17 = vld [vmem:[%s6261_s1 + $0x8] sm:$0xff]  ;;  %v2587_v55 = vld [vmem:[%s6261_s1 + $0x20] sm:$0xff] }
 0x42f   :  { %2643 = vmatmul.f32.vlgmr.msrb.gmra.mxu1 %v2584_v17  ;;  %v4376_v17 = vld [vmem:[%s6268_s8 + $0x184] sm:$0xf] }
 0x430   :  { %v2046_v28 = vpack.c.bf16 %v1996_v44, %v1995_v63  ;;  %v2592_v63 = vld [vmem:[%s6261_s1 + $0x48] sm:$0xff]  ;;  %v2586_v44 = vld [vmem:[%s6261_s1 + $0x18] sm:$0xff] }
 0x431   :  { %2689 = vmatmul.f32.vlgmr.msrb.gmra.mxu0 %v2586_v44 }
 0x432   :  { %3952 = vmatmul.msk.bf16.gmra.mxu3 %vm676_vm0, %v2046_v28 }
 0x433   :  { %v1896_v52 = vpop.f32.mrf.mxu2 }
 0x434   :  { %v1897_v11 = vadd.f32 %v5570_v57, %v1896_v52  ;;  %v2591_v52 = vld [vmem:[%s6261_s1 + $0x40] sm:$0xff] }
 0x435   :  { %v2435_v40 = vpop.f32.mrf.mxu3 }
 0x436   :  { %v2436_v37 = vadd.f32 %v5577_v16, %v2435_v40  ;;  %v1997_v9 = vmax.f32 %v1897_v11, 0.0  ;;  %v2594_v40 = vld [vmem:[%s6261_s1 + $0x58] sm:$0xff]  ;;  %v2593_v11 = vld [vmem:[%s6261_s1 + $0x50] sm:$0xff] }
 0x437   :  { %2646 = vmatmul.f32.gmra.mxu1 %v2591_v52 }
 0x438   :  { %v2563_v18 = vmax.f32 %v2436_v37, 0.0 }
 0x439   :  { %2692 = vmatmul.f32.gmra.mxu0 %v2593_v11  ;;  %v4368_v11 = vld [vmem:[%s6268_s8 + $0x144] sm:$0xf] }
 0x43b   :  { %v1898_v48 = vpop.f32.mrf.mxu2 }
 0x43c   :  { %v1899_v12 = vadd.f32 %v5570_v57, %v1898_v48  ;;  %v2562_v57 = vmax.f32 %v2433_v35, 0.0 }
 0x43d   :  { %v2437_v30 = vpop.f32.mrf.mxu3 }
 0x43e   :  { %v2438_v23 = vadd.f32 %v5577_v16, %v2437_v30  ;;  %v1998_v10 = vmax.f32 %v1899_v12, 0.0 }
 0x440   :  { %v2564_v56 = vmax.f32 %v2438_v23, 0.0  ;;  %v2047_v8 = vpack.c.bf16 %v1998_v10, %v1997_v9 }
 0x442   :  { %2696 = vmatpush.msra.mxu2 %v2564_v56  ;;  %3953 = vmatmul.msk.bf16.gmra.mxu3 %vm676_vm0, %v2047_v8 }
 0x444   :  { %2697 = vmatpush.msra.mxu2 %v2563_v18 }
 0x445   :  { %v5745_v26 = vpop.f32.mrf.mxu3 }
 0x446   :  { %2698 = vmatpush.msra.mxu2 %v2562_v57 }
 0x448   :  { %2699 = vmatpush.msra.mxu2 %v2561_v2  ;;  %v4388_v2 = vld [vmem:[%s6268_s8 + $0x1dc] sm:$0xf0] }
 0x449   :  { %v4183_v33 = vor.u32 %v4388_v2, %v4182_v27  ;;  %v2595_v27 = vld [vmem:[%s6261_s1 + $0x60] sm:$0xff] }
 0x44a   :  { %2700 = vmatpush.msra.mxu2 %v2560_v7 }
 0x44b   :  { %3168 = vmatpush.bf16.msra.mxu0 %v4183_v33  ;;  %v4360_v33 = vld [vmem:[%s6268_s8 + $0x104] sm:$0xf] }
 0x44c   :  { %2701 = vmatpush.msra.mxu2 %v2559_v34  ;;  %v4190_v34 = vld [vmem:[%s6268_s8 + $0x1c8] sm:$0xf] }
 0x44d   :  { %v5752_v4 = vpop.f32.mrf.mxu3 }
 0x44e   :  { %2702 = vmatpush.msra.mxu2 %v2558_v42  ;;  %v4191_v42 = vor.u32 %v4389_v25, %v4190_v34  ;;  %v4088_v25 = vld [vmem:[%s6268_s8 + $0x120] sm:$0xf0] }
 0x450   :  { %2703 = vmatpush.msra.mxu2 %v2557_v49 }
 0x452   :  { %2704 = vmatpush.msra.mxu2 %v2556_v53  ;;  %2666 = vmatmul.f32.vlgmr.msrb.gmra.mxu3 %v2585_v58  ;;  %v4380_v53 = vld [vmem:[%s6268_s8 + $0x19c] sm:$0xf0]  ;;  %v2589_v58 = vld [vmem:[%s6261_s1 + $0x30] sm:$0xff] }
 0x453   :  { %v4151_v41 = vor.u32 %v4380_v53, %v4150_v43  ;;  %v4365_v43 = vld [vmem:[%s6268_s8 + $0x124] sm:$0xf0]  ;;  %v4361_v53 = vld [vmem:[%s6268_s8 + $0x10c] sm:$0xf] }
 0x454   :  { %2705 = vmatpush.msra.mxu2 %v2555_v31 }
 0x455   :  { %v5762_v19 = vpop.f32.mrf.mxu3  ;;  %3169 = vmatpush.bf16.msra.mxu0 %v4151_v41  ;;  %v4054_v41 = vld [vmem:[%s6268_s8 + $0xc0] sm:$0xf] }
 0x456   :  { %2706 = vmatpush.msra.mxu2 %v2554_v54  ;;  %v4158_v54 = vld [vmem:[%s6268_s8 + $0x188] sm:$0xf] }
 0x457   :  { %v4159_v21 = vor.u32 %v4381_v22, %v4158_v54  ;;  %v4356_v54 = vld [vmem:[%s6268_s8 + $0xdc] sm:$0xf0]  ;;  %v4352_v22 = vld [vmem:[%s6268_s8 + $0xc4] sm:$0xf] }
 0x458   :  { %2707 = vmatpush.msra.mxu2 %v2553_v51 }
 0x45a   :  { %2708 = vmatpush.msra.mxu2 %v2552_v59  ;;  %2669 = vmatmul.f32.gmra.mxu3 %v2592_v63 }
 0x45c   :  { %2709 = vmatpush.msra.mxu2 %v2551_v45  ;;  %v4118_v45 = vld [vmem:[%s6268_s8 + $0x140] sm:$0xf] }
 0x45d   :  { %v5770_v6 = vpop.f32.mrf.mxu3 }
 0x45e   :  { %2710 = vmatpush.msra.mxu2 %v2550_v14  ;;  %v4372_v14 = vld [vmem:[%s6268_s8 + $0x15c] sm:$0xf0]  ;;  %v2448_v63 = vadd.f32 %v5577_v16, %v5770_v6  ;;  %v4120_v6 = vld [vmem:[%s6268_s8 + $0x160] sm:$0xf0] }
 0x460   :  { %2711 = vmatpush.msra.mxu2 %v2549_v47  ;;  %v4384_v47 = vld [vmem:[%s6268_s8 + $0x1c4] sm:$0xf] }
 0x461   :  { %2712 = vmatmul.f32.vlgmr.msra.gmra.mxu2 %v2587_v55 }
 0x462   :  { %3196 = vmatpush.bf16.msrb.mxu2 %v4191_v42  ;;  %v4094_v42 = vld [vmem:[%s6268_s8 + $0x108] sm:$0xf] }
 0x465   :  { %v5772_v0 = vpop.f32.mrf.mxu3 }
 0x466   :  { %v2451_v13 = vadd.f32 %v5577_v16, %v5772_v0  ;;  %3197 = vmatpush.bf16.msrb.mxu2 %v4159_v21  ;;  %v4152_v0 = vld [vmem:[%s6268_s8 + $0x1a0] sm:$0xf0]  ;;  %v4357_v21 = vld [vmem:[%s6268_s8 + $0xe4] sm:$0xf0] }
 0x468   :  { %v2569_v52 = vmax.f32 %v2451_v13, 0.0 }
 0x469   :  { %2715 = vmatmul.f32.gmra.mxu2 %v2594_v40  ;;  %v4155_v40 = vor.u32 %v4376_v17, %v4152_v0  ;;  %v4032_v17 = vld [vmem:[%s6268_s8 + $0xa8] sm:$0xf0] }
 0x46d   :  { %v5774_v46 = vpop.f32.mrf.mxu3 }
 0x475   :  { %v2455_v61 = vpop.f32.mrf.mxu3 }
 0x476   :  { %v2456_v24 = vadd.f32 %v5577_v16, %v2455_v61  ;;  %v4184_v61 = vld [vmem:[%s6268_s8 + $0x1e0] sm:$0xf0] }
 0x478   :  { %v2571_v39 = vmax.f32 %v2456_v24, 0.0  ;;  %v4096_v24 = vld [vmem:[%s6268_s8 + $0x128] sm:$0xf0] }
 0x47d   :  { %v2457_v1 = vpop.f32.mrf.mxu3 }
 0x47e   :  { %v2458_v49 = vadd.f32 %v5577_v16, %v2457_v1  ;;  %v2453_v1 = vadd.f32 %v5577_v16, %v5774_v46 }
 0x480   :  { %v2570_v44 = vmax.f32 %v2453_v1, 0.0  ;;  %v4022_v1 = vld [vmem:[%s6268_s8 + $0x80] sm:$0xf] }
 0x485   :  { %v2460_v36 = vpop.f32.mrf.mxu3 }
 0x486   :  { %v2461_v60 = vadd.f32 %v5577_v16, %v2460_v36  ;;  %v2572_v36 = vmax.f32 %v2458_v49, 0.0  ;;  %v4091_v49 = vor.u32 %v4360_v33, %v4088_v25  ;;  %v4391_v33 = vld [vmem:[%s6268_s8 + $0x1f4] sm:$0xf0] }
 0x488   :  { %v2573_v51 = vmax.f32 %v2461_v60, 0.0  ;;  %v4086_v60 = vld [vmem:[%s6268_s8 + $0x100] sm:$0xf] }
 0x48d   :  { %v2462_v62 = vpop.f32.mrf.mxu3 }
 0x48e   :  { %v2463_v15 = vadd.f32 %v5577_v16, %v2462_v62 }
 0x490   :  { %v2574_v50 = vmax.f32 %v2463_v15, 0.0  ;;  %v4369_v15 = vld [vmem:[%s6268_s8 + $0x14c] sm:$0xf] }
 0x495   :  { %v2465_v20 = vpop.f32.mrf.mxu3 }
 0x496   :  { %v2466_v38 = vadd.f32 %v5577_v16, %v2465_v20  ;;  %v4126_v20 = vld [vmem:[%s6268_s8 + $0x148] sm:$0xf] }
 0x498   :  { %v2575_v7 = vmax.f32 %v2466_v38, 0.0  ;;  %v4160_v38 = vld [vmem:[%s6268_s8 + $0x1a8] sm:$0xf0] }
 0x49d   :  { %v2467_v3 = vpop.f32.mrf.mxu3 }
 0x49e   :  { %v2468_v35 = vadd.f32 %v5577_v16, %v2467_v3  ;;  %v4373_v3 = vld [vmem:[%s6268_s8 + $0x164] sm:$0xf0] }
 0x49f   :  { %v4127_v55 = vor.u32 %v4373_v3, %v4126_v20  ;;  %v4344_v20 = vld [vmem:[%s6268_s8 + $0x84] sm:$0xf] }
 0x4a0   :  { %v2576_v57 = vmax.f32 %v2468_v35, 0.0  ;;  %v2588_v35 = vld [vmem:[%s6261_s1 + $0x28] sm:$0xff]  ;;  %v4024_v3 = vld [vmem:[%s6268_s8 + $0xa0] sm:$0xf0] }
 0x4a1   :  { %3198 = vmatpush.bf16.msrb.mxu2 %v4127_v55  ;;  %v3990_v55 = vld [vmem:[%s6268_s8 + $0x40] sm:$0xf] }
 0x4a5   :  { %v2470_v32 = vpop.f32.mrf.mxu3 }
 0x4a6   :  { %v2471_v9 = vadd.f32 %v5577_v16, %v2470_v32  ;;  %v4119_v32 = vor.u32 %v4372_v14, %v4118_v45 }
 0x4a8   :  { %v2577_v18 = vmax.f32 %v2471_v9, 0.0  ;;  %3170 = vmatpush.bf16.msra.mxu0 %v4119_v32  ;;  %v4123_v9 = vor.u32 %v4368_v11, %v4120_v6  ;;  %v4027_v32 = vor.u32 %v4344_v20, %v4024_v3  ;;  %v4341_v11 = vld [vmem:[%s6268_s8 + $0x64] sm:$0xf0]  ;;  %v4142_v20 = vld [vmem:[%s6268_s8 + $0x158] sm:$0xf] }
 0x4a9   :  { %v4375_v3 = vld [vmem:[%s6268_s8 + $0x174] sm:$0xf0] }
 0x4ad   :  { %v2472_v5 = vpop.f32.mrf.mxu3 }
 0x4ae   :  { %v2473_v37 = vadd.f32 %v5577_v16, %v2472_v5  ;;  %v4187_v5 = vor.u32 %v4384_v47, %v4184_v61  ;;  %v4353_v47 = vld [vmem:[%s6268_s8 + $0xcc] sm:$0xf] }
 0x4af   :  { %v4064_v61 = vld [vmem:[%s6268_s8 + $0xe8] sm:$0xf0] }
 0x4b0   :  { %v2578_v56 = vmax.f32 %v2473_v37, 0.0 }
 0x4b5   :  { %v2475_v28 = vpop.f32.mrf.mxu3 }
 0x4b6   :  { %v2476_v12 = vadd.f32 %v5577_v16, %v2475_v28  ;;  %v2446_v28 = vadd.f32 %v5577_v16, %v5762_v19  ;;  %v4403_v19 = vld [vmem:[%s6267_s7] ss:$0 sm:$0xff]  ;;  %s3331_s7 = sshll.u32 %s6270_s10, 4  ;;  %s3332_s7 = int_to_ptr.hbm [resolvable:$true] %s3331_s7 }
 0x4b8   :  { %v2579_v10 = vmax.f32 %v2476_v12, 0.0  ;;  %v2568_v12 = vmax.f32 %v2448_v63, 0.0  ;;  %v2567_v37 = vmax.f32 %v2446_v28, 0.0  ;;  %v4340_v63 = vld [vmem:[%s6268_s8 + $0x5c] sm:$0xf0] }
 0x4b9   :  { %v3991_v28 = vor.u32 %v4340_v63, %v3990_v55  ;;  %v4104_v63 = vld [vmem:[%s6268_s8 + $0x130] sm:$0xf0] }
 0x4bd   :  { %v2477_v48 = vpop.f32.mrf.mxu3 }
 0x4be   :  { %v2478_v30 = vadd.f32 %v5577_v16, %v2477_v48  ;;  %v2443_v48 = vadd.f32 %v5577_v16, %v5752_v4  ;;  %v4192_v4 = vld [vmem:[%s6268_s8 + $0x1e8] sm:$0xf0] }
 0x4c0   :  { %v2580_v23 = vmax.f32 %v2478_v30, 0.0  ;;  %v2441_v30 = vadd.f32 %v4403_v19, %v5745_v26  ;;  %v4000_v19 = vld [vmem:[%s6268_s8 + $0x68] sm:$0xf0] }
 0x4c2   :  { %2719 = vmatpush.msra.mxu1 %v2580_v23  ;;  %v2596_v23 = vld [vmem:[%s6261_s1 + $0x68] sm:$0xff]  ;;  %v2565_v26 = vmax.f32 %v2441_v30, 0.0  ;;  %v3958_v30 = vld [vmem:[%s6268_s8] sm:$0xf] }
 0x4c4   :  { %2720 = vmatpush.msra.mxu1 %v2579_v10  ;;  %v2566_v10 = vmax.f32 %v2443_v48, 0.0 }
 0x4c5   :  { %v2480_v8 = vpop.f32.mrf.mxu3 }
 0x4c6   :  { %2721 = vmatpush.msra.mxu1 %v2578_v56  ;;  %v2481_v29 = vadd.f32 %v5577_v16, %v2480_v8  ;;  %v4377_v8 = vld [vmem:[%s6268_s8 + $0x18c] sm:$0xf] }
 0x4c8   :  { %2722 = vmatpush.msra.mxu1 %v2577_v18  ;;  %v2581_v46 = vmax.f32 %v2481_v29, 0.0  ;;  %v4163_v18 = vor.u32 %v4377_v8, %v4160_v38  ;;  %v4056_v29 = vld [vmem:[%s6268_s8 + $0xe0] sm:$0xf0]  ;;  %v3968_v38 = vld [vmem:[%s6268_s8 + $0x28] sm:$0xf0] }
 0x4c9   :  { %v4059_v45 = vor.u32 %v4352_v22, %v4056_v29  ;;  %v4383_v22 = vld [vmem:[%s6268_s8 + $0x1b4] sm:$0xf0] }
 0x4ca   :  { %2723 = vmatpush.msra.mxu1 %v2576_v57  ;;  %v4128_v57 = vld [vmem:[%s6268_s8 + $0x168] sm:$0xf0] }
 0x4cb   :  { %v4131_v2 = vor.u32 %v4369_v15, %v4128_v57  ;;  %v4198_v15 = vld [vmem:[%s6268_s8 + $0x1d0] sm:$0xf] }
 0x4cc   :  { %2724 = vmatpush.msra.mxu1 %v2575_v7  ;;  %v4364_v7 = vld [vmem:[%s6268_s8 + $0x11c] sm:$0xf0]  ;;  %v4390_v57 = vld [vmem:[%s6268_s8 + $0x1ec] sm:$0xf0] }
 0x4cd   :  { %v2482_v31 = vpop.f32.mrf.mxu3  ;;  %v4087_v34 = vor.u32 %v4364_v7, %v4086_v60  ;;  %v4200_v60 = vld [vmem:[%s6268_s8 + $0x1f0] sm:$0xf0]  ;;  %v4206_v7 = vld [vmem:[%s6268_s8 + $0x1d8] sm:$0xf] }
 0x4ce   :  { %2725 = vmatpush.msra.mxu1 %v2574_v50  ;;  %v2483_v59 = vadd.f32 %v5577_v16, %v2482_v31  ;;  %v4385_v16 = vld [vmem:[%s6268_s8 + $0x1cc] sm:$0xf]  ;;  %v4095_v50 = vor.u32 %v4365_v43, %v4094_v42  ;;  %v4099_v31 = vor.u32 %v4361_v53, %v4096_v24  ;;  %v4207_v25 = vor.u32 %v4391_v33, %v4206_v7  ;;  %v4387_v42 = vld [vmem:[%s6268_s8 + $0x1dc] sm:$0xf]  ;;  %v4382_v53 = vld [vmem:[%s6268_s8 + $0x1ac] sm:$0xf0] }
 0x4cf   :  { %v4195_v56 = vor.u32 %v4385_v16, %v4192_v4  ;;  %3171 = vmatpush.bf16.msra.mxu0 %v4087_v34  ;;  %v3960_v16 = vld [vmem:[%s6268_s8 + $0x20] sm:$0xf0]  ;;  %v4208_v43 = vld [vmem:[%s6268_s8 + $0x1f8] sm:$0xf0]  ;;  %v4378_v24 = vld [vmem:[%s6268_s8 + $0x194] sm:$0xf] }
 0x4d0   :  { %2726 = vmatpush.msra.mxu1 %v2573_v51  ;;  %v2582_v62 = vmax.f32 %v2483_v59, 0.0  ;;  %3199 = vmatpush.bf16.msrb.mxu2 %v4095_v50  ;;  %v4055_v51 = vor.u32 %v4356_v54, %v4054_v41  ;;  %v4062_v59 = vld [vmem:[%s6268_s8 + $0xc8] sm:$0xf]  ;;  %v4166_v50 = vld [vmem:[%s6268_s8 + $0x190] sm:$0xf] }
 0x4d1   :  { %v4063_v14 = vor.u32 %v4357_v21, %v4062_v59  ;;  %v4168_v41 = vld [vmem:[%s6268_s8 + $0x1b0] sm:$0xf0]  ;;  %v4174_v54 = vld [vmem:[%s6268_s8 + $0x198] sm:$0xf]  ;;  %v4379_v59 = vld [vmem:[%s6268_s8 + $0x19c] sm:$0xf] }
 0x4d2   :  { %2727 = vmatpush.msra.mxu1 %v2572_v36  ;;  %2756 = vmatpush.msra.mxu3 %v2582_v62  ;;  %v4067_v36 = vor.u32 %v4353_v47, %v4064_v61  ;;  %v4348_v62 = vld [vmem:[%s6268_s8 + $0x9c] sm:$0xf0]  ;;  %v4175_v29 = vor.u32 %v4383_v22, %v4174_v54  ;;  %v4176_v21 = vld [vmem:[%s6268_s8 + $0x1b8] sm:$0xf0]  ;;  %v4374_v47 = vld [vmem:[%s6268_s8 + $0x16c] sm:$0xf0] }
 0x4d3   :  { %3172 = vmatpush.bf16.msra.mxu0 %v4055_v51  ;;  %v4023_v13 = vor.u32 %v4348_v62, %v4022_v1  ;;  %v4171_v51 = vor.u32 %v4378_v24, %v4168_v41  ;;  %v4370_v61 = vld [vmem:[%s6268_s8 + $0x154] sm:$0xf]  ;;  %v6095_v1 = vpop.f32.mrf.mxu2  ;;  %v4046_v33 = vld [vmem:[%s6268_s8 + $0x98] sm:$0xf] }
 0x4d4   :  { %2728 = vmatpush.msra.mxu1 %v2571_v39  ;;  %2757 = vmatpush.msra.mxu3 %v2581_v46  ;;  %v4030_v39 = vld [vmem:[%s6268_s8 + $0x88] sm:$0xf]  ;;  %v4136_v62 = vld [vmem:[%s6268_s8 + $0x170] sm:$0xf0]  ;;  %v4014_v41 = vld [vmem:[%s6268_s8 + $0x58] sm:$0xf] }
 0x4d5   :  { %3954 = vmatmul.msk.f32.vlgmr.msra.gmra.mxu3 %vm2597_vm2, %v2589_v58  ;;  %3200 = vmatpush.bf16.msrb.mxu2 %v4063_v14  ;;  %v4349_v46 = vld [vmem:[%s6268_s8 + $0xa4] sm:$0xf0]  ;;  %v4345_v58 = vld [vmem:[%s6268_s8 + $0x8c] sm:$0xf]  ;;  %v4134_v14 = vld [vmem:[%s6268_s8 + $0x150] sm:$0xf] }
 0x4d6   :  { %2729 = vmatpush.msra.mxu1 %v2570_v44  ;;  %3182 = vmatpush.bf16.msrb.mxu3 %v4187_v5  ;;  %v4031_v5 = vor.u32 %v4349_v46, %v4030_v39  ;;  %v4035_v0 = vor.u32 %v4345_v58, %v4032_v17  ;;  %v4336_v44 = vld [vmem:[%s6268_s8 + $0x44] sm:$0xf]  ;;  %v4371_v39 = vld [vmem:[%s6268_s8 + $0x15c] sm:$0xf]  ;;  %v4366_v17 = vld [vmem:[%s6268_s8 + $0x12c] sm:$0xf0] }
 0x4d7   :  { %3173 = vmatpush.bf16.msra.mxu0 %v4023_v13  ;;  %v4139_v13 = vor.u32 %v4370_v61, %v4136_v62  ;;  %v4144_v46 = vld [vmem:[%s6268_s8 + $0x178] sm:$0xf0]  ;;  %v4338_v24 = vld [vmem:[%s6268_s8 + $0x54] sm:$0xf]  ;;  %v4343_v22 = vld [vmem:[%s6268_s8 + $0x74] sm:$0xf0] }
 0x4d8   :  { %2730 = vmatpush.msra.mxu1 %v2569_v52  ;;  %v3992_v52 = vld [vmem:[%s6268_s8 + $0x60] sm:$0xf0]  ;;  %v4147_v58 = vor.u32 %v4371_v39, %v4144_v46  ;;  %v4334_v61 = vld [vmem:[%s6268_s8 + $0x2c] sm:$0xf0]  ;;  %v4331_v39 = vld [vmem:[%s6268_s8 + $0x1c] sm:$0xf] }
 0x4d9   :  { %3201 = vmatpush.bf16.msrb.mxu2 %v4031_v5  ;;  %v3995_v6 = vor.u32 %v4336_v44, %v3992_v52  ;;  %v4102_v5 = vld [vmem:[%s6268_s8 + $0x110] sm:$0xf]  ;;  %v4110_v44 = vld [vmem:[%s6268_s8 + $0x118] sm:$0xf]  ;;  %v3984_v46 = vld [vmem:[%s6268_s8 + $0x38] sm:$0xf0] }
 0x4da   :  { %2731 = vmatpush.msra.mxu1 %v2568_v12  ;;  %3183 = vmatpush.bf16.msrb.mxu3 %v4155_v40  ;;  %v3998_v40 = vld [vmem:[%s6268_s8 + $0x48] sm:$0xf]  ;;  %v4337_v12 = vld [vmem:[%s6268_s8 + $0x4c] sm:$0xf]  ;;  %v4103_v55 = vor.u32 %v4366_v17, %v4102_v5 }
 0x4db   :  { %v3999_v48 = vor.u32 %v4341_v11, %v3998_v40  ;;  %3174 = vmatpush.bf16.msra.mxu0 %v3991_v28  ;;  %v4367_v28 = vld [vmem:[%s6268_s8 + $0x134] sm:$0xf0]  ;;  %v4363_v11 = vld [vmem:[%s6268_s8 + $0x11c] sm:$0xf] }
 0x4dc   :  { %2732 = vmatpush.msra.mxu1 %v2567_v37  ;;  %v4003_v37 = vor.u32 %v4337_v12, %v4000_v19  ;;  %v4111_v40 = vor.u32 %v4367_v28, %v4110_v44  ;;  %v2644_v19 = vpop.f32.mrf.mxu1  ;;  %v3987_v44 = vor.u32 %v4331_v39, %v3984_v46 }
 0x4dd   :  { %3955 = vmatmul.msk.f32.gmra.mxu3 %vm2597_vm2, %v2596_v23  ;;  %v4332_v23 = vld [vmem:[%s6268_s8 + $0x1c] sm:$0xf0]  ;;  %3202 = vmatpush.bf16.msrb.mxu2 %v3999_v48  ;;  %v6136_v48 = vpop.f32.mrf.mxu3 }
 0x4de   :  { %2733 = vmatpush.msra.mxu1 %v2566_v10  ;;  %3184 = vmatpush.bf16.msrb.mxu3 %v4123_v9  ;;  %v4328_v9 = vld [vmem:[%s6268_s8 + $0x4] sm:$0xf]  ;;  %v3959_v4 = vor.u32 %v4332_v23, %v3958_v30  ;;  %v4070_v30 = vld [vmem:[%s6268_s8 + $0xd0] sm:$0xf]  ;;  %v4354_v23 = vld [vmem:[%s6268_s8 + $0xd4] sm:$0xf] }
 0x4df   :  { %v3963_v10 = vor.u32 %v4328_v9, %v3960_v16  ;;  %v4072_v16 = vld [vmem:[%s6268_s8 + $0xf0] sm:$0xf0] }
 0x4e0   :  { %2734 = vmatpush.msra.mxu1 %v2565_v26  ;;  %v3966_v26 = vld [vmem:[%s6268_s8 + $0x8] sm:$0xf]  ;;  %3175 = vmatpush.bf16.msra.mxu0 %v3959_v4  ;;  %v4078_v4 = vld [vmem:[%s6268_s8 + $0xd8] sm:$0xf] }
 0x4e1   :  { %2735 = vmatmul.f32.vlgmr.msra.gmra.mxu1 %v2588_v35  ;;  %v4333_v35 = vld [vmem:[%s6268_s8 + $0x24] sm:$0xf0] }
 0x4e2   :  { %3210 = vmatpush.bf16.msrb.mxu1 %v4195_v56  ;;  %3185 = vmatpush.bf16.msrb.mxu3 %v4091_v49  ;;  %v4329_v56 = vld [vmem:[%s6268_s8 + $0xc] sm:$0xf]  ;;  %v3967_v8 = vor.u32 %v4333_v35, %v3966_v26  ;;  %v4211_v49 = vor.u32 %v4387_v42, %v4208_v43  ;;  %v2624_v26 = vpop.f32.mrf.mxu2  ;;  %v4075_v35 = vor.u32 %v4354_v23, %v4072_v16  ;;  %v4048_v43 = vld [vmem:[%s6268_s8 + $0xb8] sm:$0xf0] }
 0x4e4   :  { %3203 = vmatpush.bf16.msrb.mxu2 %v3967_v8  ;;  %v4355_v8 = vld [vmem:[%s6268_s8 + $0xdc] sm:$0xf] }
 0x4e6   :  { %3211 = vmatpush.bf16.msrb.mxu1 %v4163_v18  ;;  %3186 = vmatpush.bf16.msrb.mxu3 %v4059_v45  ;;  %v3971_v18 = vor.u32 %v4329_v56, %v3968_v38  ;;  %v4179_v45 = vor.u32 %v4379_v59, %v4176_v21  ;;  %v4080_v38 = vld [vmem:[%s6268_s8 + $0xf8] sm:$0xf0]  ;;  %v2670_v59 = vpop.f32.mrf.mxu3  ;;  %v2690_v21 = vpop.f32.mrf.mxu0 }
 0x4e8   :  { %3252 = vmatpush.bf16.msra.mxu2 %v4207_v25  ;;  %v4347_v25 = vld [vmem:[%s6268_s8 + $0x9c] sm:$0xf] }
 0x4e9   :  { %2738 = vmatmul.f32.gmra.mxu1 %v2595_v27  ;;  %v4386_v27 = vld [vmem:[%s6268_s8 + $0x1d4] sm:$0xf] }
 0x4ea   :  { %3212 = vmatpush.bf16.msrb.mxu1 %v4131_v2  ;;  %3187 = vmatpush.bf16.msrb.mxu3 %v4027_v32  ;;  %v4199_v2 = vor.u32 %v4390_v57, %v4198_v15  ;;  %v4203_v34 = vor.u32 %v4386_v27, %v4200_v60  ;;  %v4143_v32 = vor.u32 %v4375_v3, %v4142_v20  ;;  %v4350_v57 = vld [vmem:[%s6268_s8 + $0xac] sm:$0xf0]  ;;  %v4346_v27 = vld [vmem:[%s6268_s8 + $0x94] sm:$0xf]  ;;  %v3982_v3 = vld [vmem:[%s6268_s8 + $0x18] sm:$0xf]  ;;  %v2713_v17 = vpop.f32.mrf.mxu2 }
 0x4eb   :  { %v4083_v15 = vor.u32 %v4355_v8, %v4080_v38  ;;  %v3976_v20 = vld [vmem:[%s6268_s8 + $0x30] sm:$0xf0] }
 0x4ec   :  { %3224 = vmatpush.bf16.msrb.mxu0 %v4199_v2  ;;  %3253 = vmatpush.bf16.msra.mxu2 %v4175_v29  ;;  %v4040_v2 = vld [vmem:[%s6268_s8 + $0xb0] sm:$0xf0]  ;;  %v4016_v29 = vld [vmem:[%s6268_s8 + $0x78] sm:$0xf0] }
 0x4ed   :  { %v4043_v7 = vor.u32 %v4346_v27, %v4040_v2 }
 0x4ee   :  { %3213 = vmatpush.bf16.msrb.mxu1 %v4099_v31  ;;  %3188 = vmatpush.bf16.msrb.mxu3 %v3995_v6  ;;  %v4167_v31 = vor.u32 %v4382_v53, %v4166_v50  ;;  %v4112_v6 = vld [vmem:[%s6268_s8 + $0x138] sm:$0xf0]  ;;  %v4342_v50 = vld [vmem:[%s6268_s8 + $0x6c] sm:$0xf0]  ;;  %v4051_v53 = vor.u32 %v4347_v25, %v4048_v43 }
 0x4ef   :  { %v4115_v12 = vor.u32 %v4363_v11, %v4112_v6 }
 0x4f0   :  { %3225 = vmatpush.bf16.msrb.mxu0 %v4167_v31  ;;  %3254 = vmatpush.bf16.msra.mxu2 %v4143_v32  ;;  %v4008_v31 = vld [vmem:[%s6268_s8 + $0x70] sm:$0xf0]  ;;  %v2647_v32 = vpop.f32.mrf.mxu1 }
 0x4f2   :  { %3214 = vmatpush.bf16.msrb.mxu1 %v4067_v36  ;;  %3189 = vmatpush.bf16.msrb.mxu3 %v3963_v10  ;;  %v4135_v36 = vor.u32 %v4374_v47, %v4134_v14  ;;  %v4359_v10 = vld [vmem:[%s6268_s8 + $0xf4] sm:$0xf0]  ;;  %v4015_v14 = vor.u32 %v4343_v22, %v4014_v41  ;;  %v3974_v47 = vld [vmem:[%s6268_s8 + $0x10] sm:$0xf] }
 0x4f3   :  { %v4079_v56 = vor.u32 %v4359_v10, %v4078_v4  ;;  %v3975_v5 = vor.u32 %v4334_v61, %v3974_v47 }
 0x4f4   :  { %3226 = vmatpush.bf16.msrb.mxu0 %v4135_v36  ;;  %3255 = vmatpush.bf16.msra.mxu2 %v4111_v40  ;;  %v4330_v36 = vld [vmem:[%s6268_s8 + $0x14] sm:$0xf] }
 0x4f6   :  { %3215 = vmatpush.bf16.msrb.mxu1 %v4035_v0  ;;  %3238 = vmatpush.bf16.msra.mxu3 %v4203_v34  ;;  %v4362_v0 = vld [vmem:[%s6268_s8 + $0x114] sm:$0xf]  ;;  %v4351_v34 = vld [vmem:[%s6268_s8 + $0xb4] sm:$0xf0] }
 0x4f7   :  { %v4107_v52 = vor.u32 %v4362_v0, %v4104_v63  ;;  %v4047_v42 = vor.u32 %v4351_v34, %v4046_v33  ;;  %v3979_v0 = vor.u32 %v4330_v36, %v3976_v20  ;;  %v2648_v63 = vadd.f32 %v2647_v32, %v2624_v26 }
 0x4f8   :  { %3227 = vmatpush.bf16.msrb.mxu0 %v4103_v55  ;;  %3256 = vmatpush.bf16.msra.mxu2 %v4079_v56  ;;  %v3281_v56 = vlaneseq }
 0x4f9   :  { %v2671_v40 = vadd.f32 %v2670_v59, %v2648_v63 }
 0x4fa   :  { %3216 = vmatpush.bf16.msrb.mxu1 %v4003_v37  ;;  %3239 = vmatpush.bf16.msra.mxu3 %v4171_v51  ;;  %v4358_v37 = vld [vmem:[%s6268_s8 + $0xec] sm:$0xf0]  ;;  %v4339_v51 = vld [vmem:[%s6268_s8 + $0x5c] sm:$0xf] }
 0x4fb   :  { %v4071_v9 = vor.u32 %v4358_v37, %v4070_v30  ;;  %v4019_v62 = vor.u32 %v4339_v51, %v4016_v29 }
 0x4fc   :  { %3257 = vmatpush.bf16.msra.mxu2 %v4047_v42 }
 0x4fd   :  { %3228 = vmatpush.bf16.msrb.mxu0 %v4071_v9 }
 0x4fe   :  { %3217 = vmatpush.bf16.msrb.mxu1 %v3971_v18  ;;  %3240 = vmatpush.bf16.msra.mxu3 %v4139_v13  ;;  %v4038_v18 = vld [vmem:[%s6268_s8 + $0x90] sm:$0xf]  ;;  %v4335_v13 = vld [vmem:[%s6268_s8 + $0x34] sm:$0xf0] }
 0x4ff   :  { %v4039_v60 = vor.u32 %v4350_v57, %v4038_v18  ;;  %v3983_v55 = vor.u32 %v4335_v13, %v3982_v3 }
 0x500   :  { %3258 = vmatpush.bf16.msra.mxu2 %v4015_v14 }
 0x501   :  { %3229 = vmatpush.bf16.msrb.mxu0 %v4039_v60 }
 0x502   :  { %3266 = vmatpush.bf16.msra.mxu1 %v4211_v49  ;;  %3241 = vmatpush.bf16.msra.mxu3 %v4107_v52  ;;  %v4006_v49 = vld [vmem:[%s6268_s8 + $0x50] sm:$0xf] }
 0x503   :  { %v4007_v54 = vor.u32 %v4342_v50, %v4006_v49 }
 0x504   :  { %3259 = vmatpush.bf16.msra.mxu2 %v3983_v55 }
 0x505   :  { %3230 = vmatpush.bf16.msrb.mxu0 %v4007_v54 }
 0x506   :  { %3267 = vmatpush.bf16.msra.mxu1 %v4179_v45  ;;  %3242 = vmatpush.bf16.msra.mxu3 %v4075_v35  ;;  %v4011_v45 = vor.u32 %v4338_v24, %v4008_v31  ;;  %v6239_v35 = vld [vmem:[%s6269_s9] sm:$0xff]  ;;  %s4430_s9 = smov [#allocation2]  }
 0x507   :  { %v2832_v8 = vperm.slane %v6239_v35, 0  ;;  %v2835_v38 = vperm.slane %v6239_v35, 3  ;;  %v2833_v60 = vperm.slane %v6239_v35, 1  ;;  %v2836_v54 = vperm.slane %v6239_v35, 4  ;;  %s3329_s17 = sshll.u32 %s4430_s9, 4  ;;  %s3330_s17 = int_to_ptr.vmem [resolvable:$true] %s3329_s17 }
 0x508   :  { %v2839_v51 = vperm.slane %v6239_v35, 7  ;;  %v2837_v20 = vperm.slane %v6239_v35, 5  ;;  %v2838_v3 = vperm.slane %v6239_v35, 6 }
 0x509   :  { %3231 = vmatpush.bf16.msrb.mxu0 %v3975_v5 }
 0x50a   :  { %3268 = vmatpush.bf16.msra.mxu1 %v4147_v58  ;;  %3243 = vmatpush.bf16.msra.mxu3 %v4043_v7  ;;  %v2645_v58 = vadd.f32 %v2644_v19, %v6095_v1  ;;  %v2693_v1 = vpop.f32.mrf.mxu0  ;;  %v2716_v19 = vpop.f32.mrf.mxu2  ;;  %v2834_v7 = vperm.slane %v6239_v35, 2 }
 0x50c   :  { %v2668_v28 = vadd.f32 %v6136_v48, %v2645_v58 }
 0x50e   :  { %3269 = vmatpush.bf16.msra.mxu1 %v4115_v12  ;;  %3244 = vmatpush.bf16.msra.mxu3 %v4011_v45  ;;  %v2691_v6 = vadd.f32 %v2690_v21, %v2668_v28  ;;  %v2694_v12 = vadd.f32 %v2693_v1, %v2671_v40 }
 0x510   :  { %v2714_v30 = vadd.f32 %v2713_v17, %v2691_v6  ;;  %v2717_v23 = vadd.f32 %v2716_v19, %v2694_v12 }
 0x512   :  { %3270 = vmatpush.bf16.msra.mxu1 %v4083_v15  ;;  %3245 = vmatpush.bf16.msra.mxu3 %v3979_v0  ;;  %v3282_v15 = vshrl.u32 %v3281_v56, 7 }
 0x514   :  { %v3283_v33 = vadd.s32 8, %v3282_v15 }
 0x516   :  { %3271 = vmatpush.bf16.msra.mxu1 %v4051_v53  ;;  %vm3288_vm3 = vcmp.lt.s32.totalorder %v3283_v33, 12 }
 0x51a   :  { %3272 = vmatpush.bf16.msra.mxu1 %v4019_v62 }
 0x51e   :  { %3273 = vmatpush.bf16.msra.mxu1 %v3987_v44 }
 0x558   :  { %v2759_v52 = vpop.f32.mrf.mxu3 }
 0x55e   :  { %v2736_v11 = vpop.f32.mrf.mxu1 }
 0x55f   :  { %v2737_v37 = vadd.f32 %v2736_v11, %v2714_v30 }
 0x560   :  { %v2762_v16 = vpop.f32.mrf.mxu3 }
 0x561   :  { %v2760_v10 = vadd.f32 %v2759_v52, %v2737_v37 }
 0x566   :  { %v2739_v9 = vpop.f32.mrf.mxu1 }
 0x567   :  { %v2740_v4 = vadd.f32 %v2739_v9, %v2717_v23 }
 0x569   :  { %v2763_v26 = vadd.f32 %v2762_v16, %v2740_v4 }
 0x56b   :  { %v2765_v48 = vpack.c.bf16 %v2763_v26, %v2760_v10 }
 0x56d   :  { %3176 = vmatmul.bf16.vlgmr.msra.gmra.mxu0 %v2765_v48  ;;  %3190 = vmatmul.bf16.vlgmr.msrb.gmra.mxu3 %v2765_v48 }
 0x56e   :  { %3204 = vmatmul.bf16.vlgmr.msrb.gmra.mxu2 %v2765_v48  ;;  %3218 = vmatmul.bf16.vlgmr.msrb.gmra.mxu1 %v2765_v48 }
 0x57d   :  { %3232 = vmatmul.bf16.vlgmr.msrb.gmra.mxu0 %v2765_v48  ;;  %3246 = vmatmul.bf16.vlgmr.msra.gmra.mxu3 %v2765_v48 }
 0x57e   :  { %3260 = vmatmul.bf16.vlgmr.msra.gmra.mxu2 %v2765_v48  ;;  %3274 = vmatmul.bf16.vlgmr.msra.gmra.mxu1 %v2765_v48 }
 0x5ea   :  { %v3177_v18 = vpop.f32.mrf.mxu0 }
 0x5eb   :  { %v3178_v57 = vadd.f32 %v3177_v18, %v2832_v8  ;;  %v3219_v27 = vpop.f32.mrf.mxu1 }
 0x5ec   :  { %v3220_v2 = vadd.f32 %v3219_v27, %v2835_v38 }
 0x5ed   :  { %3309 = vst [vmem:[#allocation2] sm:$0xff] %v3178_v57 }
 0x5ee   :  { %3312 = vst [vmem:[#allocation2 + $0x18] sm:$0xff] %v3220_v2 }
 0x5f0   :  { %v3191_v34 = vpop.f32.mrf.mxu3 }
 0x5f1   :  { %v3192_v25 = vadd.f32 %v3191_v34, %v2833_v60  ;;  %v3205_v42 = vpop.f32.mrf.mxu2 }
 0x5f2   :  { %v3206_v43 = vadd.f32 %v3205_v42, %v2834_v7  ;;  %v3179_v49 = vpop.f32.mrf.mxu0 }
 0x5f3   :  { %3310 = vst [vmem:[#allocation2 + $0x8] sm:$0xff] %v3192_v25  ;;  %v3180_v50 = vadd.f32 %v3179_v49, %v2832_v8  ;;  %v3221_v53 = vpop.f32.mrf.mxu1 }
 0x5f4   :  { %3311 = vst [vmem:[#allocation2 + $0x10] sm:$0xff] %v3206_v43  ;;  %v3222_v24 = vadd.f32 %v3221_v53, %v2835_v38 }
 0x5f5   :  { %v3301_v31 = vsel %vm3288_vm3, %v3180_v50, -1e+30 }
 0x5f6   :  { %3317 = vst [vmem:[#allocation2 + $0x40] sm:$0xff] %v3301_v31  ;;  %v3304_v41 = vsel %vm3288_vm3, %v3222_v24, -1e+30 }
 0x5f7   :  { %3320 = vst [vmem:[#allocation2 + $0x58] sm:$0xff] %v3304_v41 }
 0x5f8   :  { %v3193_v22 = vpop.f32.mrf.mxu3 }
 0x5f9   :  { %v3194_v29 = vadd.f32 %v3193_v22, %v2833_v60  ;;  %v3207_v59 = vpop.f32.mrf.mxu2 }
 0x5fa   :  { %v3208_v21 = vadd.f32 %v3207_v59, %v2834_v7  ;;  %v3233_v45 = vpop.f32.mrf.mxu0 }
 0x5fb   :  { %v3302_v14 = vsel %vm3288_vm3, %v3194_v29, -1e+30  ;;  %v3234_v47 = vadd.f32 %v3233_v45, %v2836_v54  ;;  %v3275_v61 = vpop.f32.mrf.mxu1 }
 0x5fc   :  { %3318 = vst [vmem:[#allocation2 + $0x48] sm:$0xff] %v3302_v14  ;;  %v3303_v36 = vsel %vm3288_vm3, %v3208_v21, -1e+30  ;;  %v3276_v62 = vadd.f32 %v3275_v61, %v2839_v51 }
 0x5fd   :  { %3319 = vst [vmem:[#allocation2 + $0x50] sm:$0xff] %v3303_v36 }
 0x5fe   :  { %3313 = vst [vmem:[#allocation2 + $0x20] sm:$0xff] %v3234_v47 }
 0x5ff   :  { %3316 = vst [vmem:[#allocation2 + $0x38] sm:$0xff] %v3276_v62 }
 0x600   :  { %v3247_v13 = vpop.f32.mrf.mxu3 }
 0x601   :  { %v3248_v32 = vadd.f32 %v3247_v13, %v2837_v20  ;;  %v3261_v39 = vpop.f32.mrf.mxu2 }
 0x602   :  { %v3262_v46 = vadd.f32 %v3261_v39, %v2838_v3  ;;  %v3235_v58 = vpop.f32.mrf.mxu0 }
 0x603   :  { %3314 = vst [vmem:[#allocation2 + $0x28] sm:$0xff] %v3248_v32  ;;  %v3236_v5 = vadd.f32 %v3235_v58, %v2836_v54  ;;  %v3277_v17 = vpop.f32.mrf.mxu1 }
 0x604   :  { %3315 = vst [vmem:[#allocation2 + $0x30] sm:$0xff] %v3262_v46  ;;  %v3278_v0 = vadd.f32 %v3277_v17, %v2839_v51 }
 0x605   :  { %v3305_v55 = vsel %vm3288_vm3, %v3236_v5, -1e+30 }
 0x606   :  { %3321 = vst [vmem:[#allocation2 + $0x60] sm:$0xff] %v3305_v55  ;;  %v3308_v63 = vsel %vm3288_vm3, %v3278_v0, -1e+30 }
 0x607   :  { %3324 = vst [vmem:[#allocation2 + $0x78] sm:$0xff] %v3308_v63 }
 0x608   :  { %v3249_v44 = vpop.f32.mrf.mxu3 }
 0x609   :  { %v3250_v28 = vadd.f32 %v3249_v44, %v2837_v20  ;;  %v3263_v52 = vpop.f32.mrf.mxu2 }
 0x60a   :  { %v3264_v40 = vadd.f32 %v3263_v52, %v2838_v3 }
 0x60b   :  { %v3306_v11 = vsel %vm3288_vm3, %v3250_v28, -1e+30 }
 0x60c   :  { %3322 = vst [vmem:[#allocation2 + $0x68] sm:$0xff] %v3306_v11  ;;  %v3307_v1 = vsel %vm3288_vm3, %v3264_v40, -1e+30 }
 0x60d   :  { %3323 = vst [vmem:[#allocation2 + $0x70] sm:$0xff] %v3307_v1 }
 0x60e   :  { %3337 = dma.vmem_to_hbm [thread:$0]  %s3330_s17, 2048, %s3332_s7, [#allocation3], %s4431_s19, %s4431_s19, %s4432_s6  }
 0x60f   :  { %4428 = dma.done.wait [#allocation3], 2048  }
 0x610   :  { %4429 = vsyncadd [#allocation3], 4294965248 }
 0x611   :  { %3342 = vsyncpa [#allocation3], 1 }

</bundles_post_ra>
